<compile_context>
chip_gen: v7x
topology: tpu7x:2x2x1
jax: 0.10.0
libtpu: 0.0.40
codegen_flags: <defaults>
</compile_context>

<pallas_src>
import jax
import jax.numpy as jnp
from jax import lax
from jax.experimental import pallas as pl
from jax.experimental.pallas import tpu as pltpu

EPS = 1e-5


# ----------------------------- Pallas kernel -----------------------------
def _pv_heads_kernel(x_ref, wcp_ref, bcp_ref, wlp_ref, blp_ref,
                     wcv_ref, bcv_ref, wv1_ref, bv1_ref, wv2_ref, bv2_ref,
                     pol_ref, val_ref):
    """Fused policy + value heads.

    x_ref   : (TN, C*81)      features, NCHW flattened (c-major, then h, w)
    wcp_ref : (C*81, 2*81)    policy 1x1 conv (BN folded), kron-expanded
    bcp_ref : (1, 2*81)       policy conv bias (BN folded), repeated per pixel
    wlp_ref : (2*81, 82)      policy linear weight (transposed)
    blp_ref : (1, 82)         policy linear bias
    wcv_ref : (C*81, 81)      value 1x1 conv (BN folded), kron-expanded
    bcv_ref : (1, 81)         value conv bias
    wv1_ref : (81, C)         value linear-1 weight (transposed)
    bv1_ref : (1, C)          value linear-1 bias
    wv2_ref : (C, 1)          value linear-2 weight (transposed)
    bv2_ref : (1, 1)          value linear-2 bias
    pol_ref : (TN, 82)        log-softmax policy output
    val_ref : (TN, 1)         tanh value output
    """
    x = x_ref[...]  # (TN, C*81) f32

    # ---- policy head: 1x1 conv (+folded BN) -> ReLU -> linear -> log_softmax ----
    yp = jnp.dot(x, wcp_ref[...], preferred_element_type=jnp.float32) + bcp_ref[...]
    yp = jnp.maximum(yp, 0.0)                                             # (TN, 162)
    logits = jnp.dot(yp, wlp_ref[...],
                     preferred_element_type=jnp.float32) + blp_ref[...]   # (TN, 82)
    m = jnp.max(logits, axis=-1, keepdims=True)
    s = logits - m
    lse = jnp.log(jnp.sum(jnp.exp(s), axis=-1, keepdims=True))
    pol_ref[...] = (s - lse).astype(pol_ref.dtype)

    # ---- value head: 1x1 conv (+folded BN) -> ReLU -> linear -> ReLU -> linear -> tanh ----
    yv = jnp.dot(x, wcv_ref[...], preferred_element_type=jnp.float32) + bcv_ref[...]
    yv = jnp.maximum(yv, 0.0)                                             # (TN, 81)
    h = jnp.dot(yv, wv1_ref[...], preferred_element_type=jnp.float32) + bv1_ref[...]
    h = jnp.maximum(h, 0.0)                                               # (TN, C)
    v = jnp.dot(h, wv2_ref[...], preferred_element_type=jnp.float32) + bv2_ref[...]
    val_ref[...] = jnp.tanh(v).astype(val_ref.dtype)                      # (TN, 1)


# ----------------------------- parameter glue -----------------------------
def _fold_conv1x1_bn(w, b, gamma, beta, mean, var):
    """Fold eval-mode BN into a 1x1 conv. w: (Cout, Cin, 1, 1) -> (Cout, Cin)."""
    scale = gamma / jnp.sqrt(var + EPS)                # (Cout,)
    wf = w[:, :, 0, 0] * scale[:, None]                # (Cout, Cin)
    bf = (b - mean) * scale + beta                     # (Cout,)
    return wf, bf


# ----------------------------- public wrapper -----------------------------
@jax.jit
def beta_gobang_forward(x_nchw, params):
    """NCHW features in -> (log_softmax policy (N, 82), tanh value (N, 1))."""
    N, C, H, W = x_nchw.shape
    HW = H * W                      # 81
    P = HW + 1                      # 82
    CF = C * HW                     # flattened feature width

    TN = 8                          # batch tile (sublane-aligned)
    N_pad = pl.cdiv(N, TN) * TN

    x_flat = x_nchw.reshape(N, CF).astype(jnp.float32)
    if N_pad != N:
        x_flat = jnp.pad(x_flat, ((0, N_pad - N), (0, 0)))

    # Fold BN into the 1x1 convs and Kronecker-expand so the conv output is already
    # in PyTorch's NCHW flatten order (c-major, then spatial).
    wp_f, bp_f = _fold_conv1x1_bn(params["p_conv_w"], params["p_conv_b"],
                                  params["p_bn_gamma"], params["p_bn_beta"],
                                  params["p_bn_mean"], params["p_bn_var"])
    wv_f, bv_f = _fold_conv1x1_bn(params["v_conv_w"], params["v_conv_b"],
                                  params["v_bn_gamma"], params["v_bn_beta"],
                                  params["v_bn_mean"], params["v_bn_var"])

    eye = jnp.eye(HW, dtype=jnp.float32)
    wcp = jnp.kron(wp_f.T, eye)                        # (C*81, 2*81)
    bcp = jnp.repeat(bp_f, HW)[None, :]                # (1, 2*81)
    wcv = jnp.kron(wv_f.T, eye)                        # (C*81, 81)
    bcv = jnp.repeat(bv_f, HW)[None, :]                # (1, 81)

    wlp = params["p_lin_w"].T.astype(jnp.float32)      # (2*81, 82)
    blp = params["p_lin_b"][None, :].astype(jnp.float32)
    wv1 = params["v_lin1_w"].T.astype(jnp.float32)     # (81, C)
    bv1 = params["v_lin1_b"][None, :].astype(jnp.float32)
    wv2 = params["v_lin2_w"].T.astype(jnp.float32)     # (C, 1)
    bv2 = params["v_lin2_b"][None, :].astype(jnp.float32)

    inv = lambda i: (0, 0)          # grid-invariant blocks (weights stay resident)

    pol_pad, val_pad = pl.pallas_call(
        _pv_heads_kernel,
        out_shape=(jax.ShapeDtypeStruct((N_pad, P), jnp.float32),
                   jax.ShapeDtypeStruct((N_pad, 1), jnp.float32)),
        grid=(N_pad // TN,),
        in_specs=[
            pl.BlockSpec((TN, CF), lambda i: (i, 0)),      # x
            pl.BlockSpec((CF, 2 * HW), inv),               # policy conv (kron)
            pl.BlockSpec((1, 2 * HW), inv),
            pl.BlockSpec((2 * HW, P), inv),                # policy linear
            pl.BlockSpec((1, P), inv),
            pl.BlockSpec((CF, HW), inv),                   # value conv (kron)
            pl.BlockSpec((1, HW), inv),
            pl.BlockSpec((HW, C), inv),                    # value linear 1
            pl.BlockSpec((1, C), inv),
            pl.BlockSpec((C, 1), inv),                     # value linear 2
            pl.BlockSpec((1, 1), inv),
        ],
        out_specs=(pl.BlockSpec((TN, P), lambda i: (i, 0)),
                   pl.BlockSpec((TN, 1), lambda i: (i, 0))),
        compiler_params=pltpu.CompilerParams(
            dimension_semantics=("parallel",),
            vmem_limit_bytes=64 * 1024 * 1024),
    )(x_flat, wcp, bcp, wlp, blp, wcv, bcv, wv1, bv1, wv2, bv2)

    return pol_pad[:N], val_pad[:N]


# ----------------------- pure-JAX reference (verification) -----------------------
def _reference(x, params):
    def conv_bn_relu(x, w, b, gamma, beta, mean, var):
        y = lax.conv_general_dilated(x, w, window_strides=(1, 1), padding="VALID",
                                     dimension_numbers=("NCHW", "OIHW", "NCHW"))
        y = y + b[None, :, None, None]
        inv = gamma / jnp.sqrt(var + EPS)
        y = (y - mean[None, :, None, None]) * inv[None, :, None, None] + beta[None, :, None, None]
        return jax.nn.relu(y)

    N = x.shape[0]
    p = conv_bn_relu(x, params["p_conv_w"], params["p_conv_b"], params["p_bn_gamma"],
                     params["p_bn_beta"], params["p_bn_mean"], params["p_bn_var"])
    logits = p.reshape(N, -1) @ params["p_lin_w"].T + params["p_lin_b"]
    pol = jax.nn.log_softmax(logits, axis=1)

    v = conv_bn_relu(x, params["v_conv_w"], params["v_conv_b"], params["v_bn_gamma"],
                     params["v_bn_beta"], params["v_bn_mean"], params["v_bn_var"])
    h = jax.nn.relu(v.reshape(N, -1) @ params["v_lin1_w"].T + params["v_lin1_b"])
    val = jnp.tanh(h @ params["v_lin2_w"].T + params["v_lin2_b"])
    return pol, val


if __name__ == "__main__":
    # small shapes consistent with the module: board 9x9 (fixed by the linear dims),
    # small feature_dim, tiny batch
    N, C, L = 2, 32, 9
    key = jax.random.PRNGKey(0)
    ks = jax.random.split(key, 18)

    def rnd(k, shape, s=0.1):
        return s * jax.random.normal(k, shape, jnp.float32)

    params = {
        # policy head: ConvolutionBlock(C -> 2, k=1) then Linear(2*81 -> 82)
        "p_conv_w": rnd(ks[0], (2, C, 1, 1)),
        "p_conv_b": rnd(ks[1], (2,)),
        "p_bn_gamma": 1.0 + rnd(ks[2], (2,)),
        "p_bn_beta": rnd(ks[3], (2,)),
        "p_bn_mean": rnd(ks[4], (2,)),
        "p_bn_var": 1.0 + 0.1 * jax.random.uniform(ks[5], (2,), jnp.float32),
        "p_lin_w": rnd(ks[6], (L * L + 1, 2 * L * L)),
        "p_lin_b": rnd(ks[7], (L * L + 1,)),
        # value head: ConvolutionBlock(C -> 1, k=1) then Linear(81 -> C) -> ReLU -> Linear(C -> 1) -> Tanh
        "v_conv_w": rnd(ks[8], (1, C, 1, 1)),
        "v_conv_b": rnd(ks[9], (1,)),
        "v_bn_gamma": 1.0 + rnd(ks[10], (1,)),
        "v_bn_beta": rnd(ks[11], (1,)),
        "v_bn_mean": rnd(ks[12], (1,)),
        "v_bn_var": 1.0 + 0.1 * jax.random.uniform(ks[13], (1,), jnp.float32),
        "v_lin1_w": rnd(ks[14], (C, L * L)),
        "v_lin1_b": rnd(ks[15], (C,)),
        "v_lin2_w": rnd(ks[16], (1, C)),
        "v_lin2_b": rnd(ks[17], (1,)),
    }

    x = jax.random.normal(jax.random.PRNGKey(42), (N, C, L, L), jnp.float32)

    pol, val = jax.block_until_ready(beta_gobang_forward(x, params))
    pol_ref, val_ref = jax.block_until_ready(_reference(x, params))

    assert pol.shape == (N, L * L + 1) and val.shape == (N, 1)
    assert jnp.allclose(pol, pol_ref, atol=1e-3, rtol=1e-3), float(jnp.max(jnp.abs(pol - pol_ref)))
    assert jnp.allclose(val, val_ref, atol=1e-3, rtol=1e-3), float(jnp.max(jnp.abs(val - val_ref)))
    print("KERNEL_OK")
</pallas_src>

<mosaic_0001>
module attributes {stable_mosaic.version = 11 : i64} {
  func.func @_pv_heads_kernel(%arg0: i32, %arg1: memref<8x2592xf32, #tpu.memory_space<vmem>>, %arg2: memref<2592x162xf32, #tpu.memory_space<vmem>>, %arg3: memref<1x162xf32, #tpu.memory_space<vmem>>, %arg4: memref<162x82xf32, #tpu.memory_space<vmem>>, %arg5: memref<1x82xf32, #tpu.memory_space<vmem>>, %arg6: memref<2592x81xf32, #tpu.memory_space<vmem>>, %arg7: memref<1x81xf32, #tpu.memory_space<vmem>>, %arg8: memref<81x32xf32, #tpu.memory_space<vmem>>, %arg9: memref<1x32xf32, #tpu.memory_space<vmem>>, %arg10: memref<32x1xf32, #tpu.memory_space<vmem>>, %arg11: memref<1x1xf32, #tpu.memory_space<vmem>>, %arg12: memref<8x82xf32, #tpu.memory_space<vmem>>, %arg13: memref<8x1xf32, #tpu.memory_space<vmem>>) attributes {dimension_semantics = [#tpu.dimension_semantics<parallel>], iteration_bounds = array<i64: 1>, scalar_prefetch = 0 : i64, scratch_operands = 0 : i64, tpu.core_type = #tpu.core_type<tc>, window_params = [{transform_indices = @transform_0, window_bounds = array<i64: 8, 2592>}, {pipeline_mode = #tpu.pipeline_mode<synchronous>, transform_indices = @transform_1, window_bounds = array<i64: 2592, 162>}, {pipeline_mode = #tpu.pipeline_mode<synchronous>, transform_indices = @transform_2, window_bounds = array<i64: 1, 162>}, {pipeline_mode = #tpu.pipeline_mode<synchronous>, transform_indices = @transform_3, window_bounds = array<i64: 162, 82>}, {pipeline_mode = #tpu.pipeline_mode<synchronous>, transform_indices = @transform_4, window_bounds = array<i64: 1, 82>}, {pipeline_mode = #tpu.pipeline_mode<synchronous>, transform_indices = @transform_5, window_bounds = array<i64: 2592, 81>}, {pipeline_mode = #tpu.pipeline_mode<synchronous>, transform_indices = @transform_6, window_bounds = array<i64: 1, 81>}, {pipeline_mode = #tpu.pipeline_mode<synchronous>, transform_indices = @transform_7, window_bounds = array<i64: 81, 32>}, {pipeline_mode = #tpu.pipeline_mode<synchronous>, transform_indices = @transform_8, window_bounds = array<i64: 1, 32>}, {pipeline_mode = #tpu.pipeline_mode<synchronous>, transform_indices = @transform_9, window_bounds = array<i64: 32, 1>}, {pipeline_mode = #tpu.pipeline_mode<synchronous>, transform_indices = @transform_10, window_bounds = array<i64: 1, 1>}, {transform_indices = @transform_11, window_bounds = array<i64: 8, 82>}, {transform_indices = @transform_12, window_bounds = array<i64: 8, 1>}]} {
    %c0 = arith.constant 0 : index
    %c0_0 = arith.constant 0 : index
    %0 = vector.load %arg1[%c0, %c0_0] : memref<8x2592xf32, #tpu.memory_space<vmem>>, vector<8x2592xf32>
    %c0_1 = arith.constant 0 : index
    %c0_2 = arith.constant 0 : index
    %1 = vector.load %arg2[%c0_1, %c0_2] : memref<2592x162xf32, #tpu.memory_space<vmem>>, vector<2592x162xf32>
    %cst = arith.constant dense<0.000000e+00> : vector<8x162xf32>
    %2 = tpu.matmul %0, %1, %cst {dimension_numbers = #tpu.dot_dimension_numbers<[1], [0], [0], [1], [0, 0, 1, 1], [], []>} : vector<8x2592xf32>, vector<2592x162xf32>, vector<8x162xf32> -> vector<8x162xf32>
    %c0_3 = arith.constant 0 : index
    %c0_4 = arith.constant 0 : index
    %3 = vector.load %arg3[%c0_3, %c0_4] : memref<1x162xf32, #tpu.memory_space<vmem>>, vector<1x162xf32>
    %4 = vector.broadcast %3 : vector<1x162xf32> to vector<8x162xf32>
    %5 = arith.addf %2, %4 : vector<8x162xf32>
    %cst_5 = arith.constant 0.000000e+00 : f32
    %6 = vector.broadcast %cst_5 : f32 to vector<8x162xf32>
    %7 = arith.maximumf %5, %6 : vector<8x162xf32>
    %c0_6 = arith.constant 0 : index
    %c0_7 = arith.constant 0 : index
    %8 = vector.load %arg4[%c0_6, %c0_7] : memref<162x82xf32, #tpu.memory_space<vmem>>, vector<162x82xf32>
    %cst_8 = arith.constant dense<0.000000e+00> : vector<8x82xf32>
    %9 = tpu.matmul %7, %8, %cst_8 {dimension_numbers = #tpu.dot_dimension_numbers<[1], [0], [0], [1], [0, 0, 1, 1], [], []>} : vector<8x162xf32>, vector<162x82xf32>, vector<8x82xf32> -> vector<8x82xf32>
    %c0_9 = arith.constant 0 : index
    %c0_10 = arith.constant 0 : index
    %10 = vector.load %arg5[%c0_9, %c0_10] : memref<1x82xf32, #tpu.memory_space<vmem>>, vector<1x82xf32>
    %11 = vector.broadcast %10 : vector<1x82xf32> to vector<8x82xf32>
    %12 = arith.addf %9, %11 : vector<8x82xf32>
    %cst_11 = arith.constant dense<0xFF800000> : vector<8xf32>
    %13 = vector.multi_reduction <maximumf>, %12, %cst_11 [1] : vector<8x82xf32> to vector<8xf32>
    %14 = vector.shape_cast %13 : vector<8xf32> to vector<8x1xf32>
    %15 = vector.broadcast %14 : vector<8x1xf32> to vector<8x82xf32>
    %16 = arith.subf %12, %15 : vector<8x82xf32>
    %17 = math.exp %16 : vector<8x82xf32>
    %cst_12 = arith.constant dense<0.000000e+00> : vector<8xf32>
    %18 = vector.multi_reduction <add>, %17, %cst_12 [1] : vector<8x82xf32> to vector<8xf32>
    %19 = vector.shape_cast %18 : vector<8xf32> to vector<8x1xf32>
    %20 = math.log %19 : vector<8x1xf32>
    %21 = vector.broadcast %20 : vector<8x1xf32> to vector<8x82xf32>
    %22 = arith.subf %16, %21 : vector<8x82xf32>
    %c0_13 = arith.constant 0 : index
    %c0_14 = arith.constant 0 : index
    %23 = vector.load %arg12[%c0_13, %c0_14] : memref<8x82xf32, #tpu.memory_space<vmem>>, vector<8x82xf32>
    tpu.vector_store %arg12[%c0_13, %c0_14], %22 {strides = array<i32>} : memref<8x82xf32, #tpu.memory_space<vmem>>, vector<8x82xf32>,
    %c0_15 = arith.constant 0 : index
    %c0_16 = arith.constant 0 : index
    %24 = vector.load %arg6[%c0_15, %c0_16] : memref<2592x81xf32, #tpu.memory_space<vmem>>, vector<2592x81xf32>
    %cst_17 = arith.constant dense<0.000000e+00> : vector<8x81xf32>
    %25 = tpu.matmul %0, %24, %cst_17 {dimension_numbers = #tpu.dot_dimension_numbers<[1], [0], [0], [1], [0, 0, 1, 1], [], []>} : vector<8x2592xf32>, vector<2592x81xf32>, vector<8x81xf32> -> vector<8x81xf32>
    %c0_18 = arith.constant 0 : index
    %c0_19 = arith.constant 0 : index
    %26 = vector.load %arg7[%c0_18, %c0_19] : memref<1x81xf32, #tpu.memory_space<vmem>>, vector<1x81xf32>
    %27 = vector.broadcast %26 : vector<1x81xf32> to vector<8x81xf32>
    %28 = arith.addf %25, %27 : vector<8x81xf32>
    %cst_20 = arith.constant 0.000000e+00 : f32
    %29 = vector.broadcast %cst_20 : f32 to vector<8x81xf32>
    %30 = arith.maximumf %28, %29 : vector<8x81xf32>
    %c0_21 = arith.constant 0 : index
    %c0_22 = arith.constant 0 : index
    %31 = vector.load %arg8[%c0_21, %c0_22] : memref<81x32xf32, #tpu.memory_space<vmem>>, vector<81x32xf32>
    %cst_23 = arith.constant dense<0.000000e+00> : vector<8x32xf32>
    %32 = tpu.matmul %30, %31, %cst_23 {dimension_numbers = #tpu.dot_dimension_numbers<[1], [0], [0], [1], [0, 0, 1, 1], [], []>} : vector<8x81xf32>, vector<81x32xf32>, vector<8x32xf32> -> vector<8x32xf32>
    %c0_24 = arith.constant 0 : index
    %c0_25 = arith.constant 0 : index
    %33 = vector.load %arg9[%c0_24, %c0_25] : memref<1x32xf32, #tpu.memory_space<vmem>>, vector<1x32xf32>
    %34 = vector.broadcast %33 : vector<1x32xf32> to vector<8x32xf32>
    %35 = arith.addf %32, %34 : vector<8x32xf32>
    %cst_26 = arith.constant 0.000000e+00 : f32
    %36 = vector.broadcast %cst_26 : f32 to vector<8x32xf32>
    %37 = arith.maximumf %35, %36 : vector<8x32xf32>
    %c0_27 = arith.constant 0 : index
    %c0_28 = arith.constant 0 : index
    %38 = vector.load %arg10[%c0_27, %c0_28] : memref<32x1xf32, #tpu.memory_space<vmem>>, vector<32x1xf32>
    %cst_29 = arith.constant dense<0.000000e+00> : vector<8x1xf32>
    %39 = tpu.matmul %37, %38, %cst_29 {dimension_numbers = #tpu.dot_dimension_numbers<[1], [0], [0], [1], [0, 0, 1, 1], [], []>} : vector<8x32xf32>, vector<32x1xf32>, vector<8x1xf32> -> vector<8x1xf32>
    %c0_30 = arith.constant 0 : index
    %c0_31 = arith.constant 0 : index
    %40 = vector.load %arg11[%c0_30, %c0_31] : memref<1x1xf32, #tpu.memory_space<vmem>>, vector<1x1xf32>
    %41 = vector.broadcast %40 : vector<1x1xf32> to vector<8x1xf32>
    %42 = arith.addf %39, %41 : vector<8x1xf32>
    %43 = math.tanh %42 : vector<8x1xf32>
    %c0_32 = arith.constant 0 : index
    %c0_33 = arith.constant 0 : index
    %44 = vector.load %arg13[%c0_32, %c0_33] : memref<8x1xf32, #tpu.memory_space<vmem>>, vector<8x1xf32>
    tpu.vector_store %arg13[%c0_32, %c0_33], %43 {strides = array<i32>} : memref<8x1xf32, #tpu.memory_space<vmem>>, vector<8x1xf32>,
    return
  }
  func.func @transform_0(%arg0: i32) -> (i32, i32) {
    %c0_i32 = arith.constant 0 : i32
    %c0_i32_0 = arith.constant 0 : i32
    return %arg0, %c0_i32 : i32, i32
  }
  func.func @transform_1(%arg0: i32) -> (i32, i32) {
    %c0_i32 = arith.constant 0 : i32
    %c0_i32_0 = arith.constant 0 : i32
    %c0_i32_1 = arith.constant 0 : i32
    return %c0_i32, %c0_i32_0 : i32, i32
  }
  func.func @transform_2(%arg0: i32) -> (i32, i32) {
    %c0_i32 = arith.constant 0 : i32
    %c0_i32_0 = arith.constant 0 : i32
    %c0_i32_1 = arith.constant 0 : i32
    return %c0_i32, %c0_i32_0 : i32, i32
  }
  func.func @transform_3(%arg0: i32) -> (i32, i32) {
    %c0_i32 = arith.constant 0 : i32
    %c0_i32_0 = arith.constant 0 : i32
    %c0_i32_1 = arith.constant 0 : i32
    return %c0_i32, %c0_i32_0 : i32, i32
  }
  func.func @transform_4(%arg0: i32) -> (i32, i32) {
    %c0_i32 = arith.constant 0 : i32
    %c0_i32_0 = arith.constant 0 : i32
    %c0_i32_1 = arith.constant 0 : i32
    return %c0_i32, %c0_i32_0 : i32, i32
  }
  func.func @transform_5(%arg0: i32) -> (i32, i32) {
    %c0_i32 = arith.constant 0 : i32
    %c0_i32_0 = arith.constant 0 : i32
    %c0_i32_1 = arith.constant 0 : i32
    return %c0_i32, %c0_i32_0 : i32, i32
  }
  func.func @transform_6(%arg0: i32) -> (i32, i32) {
    %c0_i32 = arith.constant 0 : i32
    %c0_i32_0 = arith.constant 0 : i32
    %c0_i32_1 = arith.constant 0 : i32
    return %c0_i32, %c0_i32_0 : i32, i32
  }
  func.func @transform_7(%arg0: i32) -> (i32, i32) {
    %c0_i32 = arith.constant 0 : i32
    %c0_i32_0 = arith.constant 0 : i32
    %c0_i32_1 = arith.constant 0 : i32
    return %c0_i32, %c0_i32_0 : i32, i32
  }
  func.func @transform_8(%arg0: i32) -> (i32, i32) {
    %c0_i32 = arith.constant 0 : i32
    %c0_i32_0 = arith.constant 0 : i32
    %c0_i32_1 = arith.constant 0 : i32
    return %c0_i32, %c0_i32_0 : i32, i32
  }
  func.func @transform_9(%arg0: i32) -> (i32, i32) {
    %c0_i32 = arith.constant 0 : i32
    %c0_i32_0 = arith.constant 0 : i32
    %c0_i32_1 = arith.constant 0 : i32
    return %c0_i32, %c0_i32_0 : i32, i32
  }
  func.func @transform_10(%arg0: i32) -> (i32, i32) {
    %c0_i32 = arith.constant 0 : i32
    %c0_i32_0 = arith.constant 0 : i32
    %c0_i32_1 = arith.constant 0 : i32
    return %c0_i32, %c0_i32_0 : i32, i32
  }
  func.func @transform_11(%arg0: i32) -> (i32, i32) {
    %c0_i32 = arith.constant 0 : i32
    %c0_i32_0 = arith.constant 0 : i32
    return %arg0, %c0_i32 : i32, i32
  }
  func.func @transform_12(%arg0: i32) -> (i32, i32) {
    %c0_i32 = arith.constant 0 : i32
    %c0_i32_0 = arith.constant 0 : i32
    return %arg0, %c0_i32 : i32, i32
  }
}

</mosaic_0001>

<bundles_post_ra>
// kernel: beta_gobang_forward.1
= control target key start
LH: loop header
LB: loop body
LE: loop exit
PB: predicated region body
PF: predicated region fallthrough
CT: control target
= control target key end

     0   :  { %s5182_s0 = inlined_call_operand.hbm [shape: f32[8,2592], index: 0, kind: input, shape index: {}]   ;;  %s5183_s1 = inlined_call_operand.hbm [shape: f32[2592,162], index: 1, kind: input, shape index: {}]   ;;  %s5184_s2 = inlined_call_operand.hbm [shape: f32[1,162], index: 2, kind: input, shape index: {}]   ;;  %s5185_s3 = inlined_call_operand.hbm [shape: f32[162,82], index: 3, kind: input, shape index: {}]   ;;  %s5186_s4 = inlined_call_operand.hbm [shape: f32[1,82], index: 4, kind: input, shape index: {}]   ;;  %s5187_s5 = inlined_call_operand.hbm [shape: f32[2592,81], index: 5, kind: input, shape index: {}]   ;;  %s5188_s6 = inlined_call_operand.hbm [shape: f32[1,81], index: 6, kind: input, shape index: {}]   ;;  %s5189_s7 = inlined_call_operand.hbm [shape: f32[81,32], index: 7, kind: input, shape index: {}]   ;;  %s5190_s8 = inlined_call_operand.hbm [shape: f32[1,32], index: 8, kind: input, shape index: {}]   ;;  %s5191_s9 = inlined_call_operand.hbm [shape: f32[32,1], index: 9, kind: input, shape index: {}]   ;;  %s5192_s10 = inlined_call_operand.<no memory space> [shape: f32[1,1], index: 10, kind: input, shape index: {}]   ;;  %s5193_s11 = inlined_call_operand.hbm [shape: f32[8,82], index: 11, kind: output, shape index: {0}]   ;;  %s5194_s12 = inlined_call_operand.hbm [shape: f32[8,1], index: 12, kind: output, shape index: {1}]  }
   0x1   :  { %v18_v0 = vstv %s5192_s10 }
   0x2   :  { %19 = vst [vmem:[#allocation2] sm:$0x1] %v18_v0 }
   0x3   :  { %20 = vsyncpa [#allocation4], 0 }
   0x4   :  { %21 = vsyncpa [#allocation7], 0 }
   0x5   :  { %22 = vsyncpa [#allocation10], 0 }
   0x6   :  { %23 = vsyncpa [#allocation13], 0 }
   0x7   :  { %24 = vsyncpa [#allocation16], 0 }
   0x8   :  { %25 = vsyncpa [#allocation19], 0 }
   0x9   :  { %26 = vsyncpa [#allocation5], 0 }
   0xa   :  { %27 = vsyncpa [#allocation22], 0  ;;  %s4881_s23 = smov [#allocation6]   ;;  %s4601_s27 = scalar_lea.hbm %s5183_s1, 82944 }
   0xb   :  { %s43_s24 = sshll.u32 %s4881_s23, 4  ;;  %p4602_p0 = scmp.ne.s32.totalorder %s5183_s1, %s4601_s27  ;;  %s44_s24 = int_to_ptr.vmem [resolvable:$true] %s43_s24 }
   0xc   :  { %p4605_p1 = scmp.lt.u32.totalorder %s4601_s27, %s5183_s1 }
   0xe   :  { %p4607_p2 = pnand %p4605_p1, %p4602_p0 }
  0x10   :  { %4610 = shalt.err (!%p4607_p2)
}
  0x11   :  { %s4611_s13 = scalar_lea.vmem %s44_s24, 82944  ;;  %p4616_p4 = scmp.lt.s32.totalorder %s44_s24, %s44_s24 }
  0x12   :  { %p4612_p3 = scmp.ne.s32.totalorder %s44_s24, %s4611_s13  ;;  %p4617_p5 = scmp.lt.s32.totalorder %s4611_s13, %s4611_s13 }
  0x14   :  { %p4618_p6 = por %p4617_p5, %p4616_p4 }
  0x16   :  { %p4619_p7 = pnand %p4618_p6, %p4612_p3 }
  0x18   :  { %4622 = shalt.err (!%p4619_p7)
}
  0x19   :  { %s4882_s14 = smov 256   ;;  %s4883_s15 = smov 16  }
  0x1a   :  { %49 = dma.hbm_to_vmem [thread:$0]  %s5183_s1, 82944, %s44_s24, [#allocation7], %s4882_s14, %s4882_s14, %s4883_s15  }
  0x1b   :  { %s4884_s18 = smov [#allocation9]   ;;  %s4623_s22 = scalar_lea.hbm %s5185_s3, 2688 }
  0x1c   :  { %s65_s19 = sshll.u32 %s4884_s18, 4  ;;  %p4624_p8 = scmp.ne.s32.totalorder %s5185_s3, %s4623_s22  ;;  %s66_s19 = int_to_ptr.vmem [resolvable:$true] %s65_s19 }
  0x1d   :  { %p4627_p9 = scmp.lt.u32.totalorder %s4623_s22, %s5185_s3 }
  0x1f   :  { %p4629_p10 = pnand %p4627_p9, %p4624_p8 }
  0x21   :  { %4632 = shalt.err (!%p4629_p10)
}
  0x22   :  { %s4633_s28 = scalar_lea.vmem %s66_s19, 2688  ;;  %p4638_p12 = scmp.lt.s32.totalorder %s66_s19, %s66_s19 }
  0x23   :  { %p4634_p11 = scmp.ne.s32.totalorder %s66_s19, %s4633_s28  ;;  %p4639_p13 = scmp.lt.s32.totalorder %s4633_s28, %s4633_s28 }
  0x25   :  { %p4640_p0 = por %p4639_p13, %p4638_p12 }
  0x27   :  { %p4641_p1 = pnand %p4640_p0, %p4634_p11 }
  0x29   :  { %4644 = shalt.err (!%p4641_p1)
}
  0x2a   :  { %s4885_s1 = smov 128   ;;  %s4886_s24 = smov 8  }
  0x2b   :  { %71 = dma.hbm_to_vmem [thread:$0]  %s5185_s3, 2688, %s66_s19, [#allocation10], %s4885_s1, %s4885_s1, %s4886_s24  }
  0x2c   :  { %s4887_s30 = smov [#allocation12]   ;;  %s4888_s14 = smov [#allocation15]  }
  0x2d   :  { %s87_s13 = sshll.u32 %s4887_s30, 4  ;;  %s109_s15 = sshll.u32 %s4888_s14, 4  ;;  %s88_s13 = int_to_ptr.vmem [resolvable:$true] %s87_s13  ;;  %s4995_s15 = int_to_ptr.vmem [resolvable:$true] %s109_s15 }
  0x2e   :  { %s4645_s18 = scalar_lea.hbm %s5187_s5, 41472 }
  0x2f   :  { %p4646_p2 = scmp.ne.s32.totalorder %s5187_s5, %s4645_s18  ;;  %p4649_p3 = scmp.lt.u32.totalorder %s4645_s18, %s5187_s5 }
  0x31   :  { %p4651_p4 = pnand %p4649_p3, %p4646_p2 }
  0x33   :  { %4654 = shalt.err (!%p4651_p4)
}
  0x34   :  { %s4655_s3 = scalar_lea.vmem %s88_s13, 41472  ;;  %p4660_p6 = scmp.lt.s32.totalorder %s88_s13, %s88_s13 }
  0x35   :  { %p4656_p5 = scmp.ne.s32.totalorder %s88_s13, %s4655_s3  ;;  %p4661_p7 = scmp.lt.s32.totalorder %s4655_s3, %s4655_s3 }
  0x37   :  { %p4662_p8 = por %p4661_p7, %p4660_p6 }
  0x39   :  { %p4663_p9 = pnand %p4662_p8, %p4656_p5 }
  0x3b   :  { %4666 = shalt.err (!%p4663_p9)
}
  0x3c   :  { %93 = dma.hbm_to_vmem [thread:$0]  %s5187_s5, 41472, %s88_s13, [#allocation13], %s4885_s1, %s4885_s1, %s4886_s24  }
  0x3d   :  { %s4667_s28 = scalar_lea.hbm %s5189_s7, 1408 }
  0x3e   :  { %p4668_p10 = scmp.ne.s32.totalorder %s5189_s7, %s4667_s28  ;;  %p4671_p11 = scmp.lt.u32.totalorder %s4667_s28, %s5189_s7 }
  0x40   :  { %p4673_p12 = pnand %p4671_p11, %p4668_p10 }
  0x42   :  { %4676 = shalt.err (!%p4673_p12)
}
  0x43   :  { %s4677_s16 = scalar_lea.vmem %s4995_s15, 1408  ;;  %p4682_p0 = scmp.lt.s32.totalorder %s4995_s15, %s4995_s15 }
  0x44   :  { %p4678_p13 = scmp.ne.s32.totalorder %s4995_s15, %s4677_s16  ;;  %p4683_p1 = scmp.lt.s32.totalorder %s4677_s16, %s4677_s16 }
  0x46   :  { %p4684_p2 = por %p4683_p1, %p4682_p0 }
  0x48   :  { %p4685_p3 = pnand %p4684_p2, %p4678_p13 }
  0x4a   :  { %4688 = shalt.err (!%p4685_p3)
}
  0x4b   :  { %115 = dma.hbm_to_vmem [thread:$0]  %s5189_s7, 1408, %s4995_s15, [#allocation16], %s4885_s1, %s4885_s1, %s4886_s24  }
  0x4c   :  { %s4889_s17 = smov [#allocation3]   ;;  %s4890_s20 = smov [#allocation8]  }
  0x4d   :  { %s34_s18 = sshll.u32 %s4889_s17, 4  ;;  %s56_s21 = sshll.u32 %s4890_s20, 4  ;;  %s35_s18 = int_to_ptr.vmem [resolvable:$true] %s34_s18  ;;  %s57_s21 = int_to_ptr.vmem [resolvable:$true] %s56_s21 }
  0x4e   :  { %s4689_s3 = scalar_lea.hbm %s5182_s0, 2688 }
  0x4f   :  { %p4690_p4 = scmp.ne.s32.totalorder %s5182_s0, %s4689_s3  ;;  %p4693_p5 = scmp.lt.u32.totalorder %s4689_s3, %s5182_s0 }
  0x51   :  { %p4695_p6 = pnand %p4693_p5, %p4690_p4 }
  0x53   :  { %4698 = shalt.err (!%p4695_p6)
}
  0x54   :  { %s4699_s7 = scalar_lea.vmem %s35_s18, 2688  ;;  %p4704_p8 = scmp.lt.s32.totalorder %s35_s18, %s35_s18 }
  0x55   :  { %p4700_p7 = scmp.ne.s32.totalorder %s35_s18, %s4699_s7  ;;  %p4705_p9 = scmp.lt.s32.totalorder %s4699_s7, %s4699_s7 }
  0x57   :  { %p4706_p10 = por %p4705_p9, %p4704_p8 }
  0x59   :  { %p4707_p11 = pnand %p4706_p10, %p4700_p7 }
  0x5b   :  { %4710 = shalt.err (!%p4707_p11)
}
  0x5c   :  { %37 = dma.hbm_to_vmem [thread:$0]  %s5182_s0, 2688, %s35_s18, [#allocation4]  }
  0x5d   :  { %s4711_s30 = scalar_lea.hbm %s5184_s2, 32 }
  0x5e   :  { %p4712_p12 = scmp.ne.s32.totalorder %s5184_s2, %s4711_s30  ;;  %p4715_p13 = scmp.lt.u32.totalorder %s4711_s30, %s5184_s2 }
  0x60   :  { %p4717_p0 = pnand %p4715_p13, %p4712_p12 }
  0x62   :  { %4720 = shalt.err (!%p4717_p0)
}
  0x63   :  { %s4721_s17 = scalar_lea.vmem %s57_s21, 32  ;;  %p4726_p2 = scmp.lt.s32.totalorder %s57_s21, %s57_s21 }
  0x64   :  { %p4722_p1 = scmp.ne.s32.totalorder %s57_s21, %s4721_s17  ;;  %p4727_p3 = scmp.lt.s32.totalorder %s4721_s17, %s4721_s17 }
  0x66   :  { %p4728_p4 = por %p4727_p3, %p4726_p2 }
  0x68   :  { %p4729_p5 = pnand %p4728_p4, %p4722_p1 }
  0x6a   :  { %4732 = shalt.err (!%p4729_p5)
}
  0x6b   :  { %59 = dma.hbm_to_vmem [thread:$0]  %s5184_s2, 32, %s57_s21, [#allocation7]  }
  0x6c   :  { %s4891_s20 = smov [#allocation11]   ;;  %s4892_s23 = smov [#allocation14]  }
  0x6d   :  { %s78_s22 = sshll.u32 %s4891_s20, 4  ;;  %s100_s3 = sshll.u32 %s4892_s23, 4  ;;  %s79_s22 = int_to_ptr.vmem [resolvable:$true] %s78_s22  ;;  %s101_s3 = int_to_ptr.vmem [resolvable:$true] %s100_s3 }
  0x6e   :  { %s4733_s26 = scalar_lea.hbm %s5186_s4, 16 }
  0x6f   :  { %p4734_p6 = scmp.ne.s32.totalorder %s5186_s4, %s4733_s26  ;;  %p4737_p7 = scmp.lt.u32.totalorder %s4733_s26, %s5186_s4 }
  0x71   :  { %p4739_p8 = pnand %p4737_p7, %p4734_p6 }
  0x73   :  { %4742 = shalt.err (!%p4739_p8)
}
  0x74   :  { %s4743_s2 = scalar_lea.vmem %s79_s22, 16  ;;  %s4747_s21 = scalar_lea.vmem %s79_s22, 32 }
  0x75   :  { %p4744_p9 = scmp.ne.s32.totalorder %s79_s22, %s4743_s2  ;;  %p4748_p10 = scmp.lt.s32.totalorder %s79_s22, %s79_s22 }
  0x76   :  { %p4749_p11 = scmp.lt.s32.totalorder %s4747_s21, %s4743_s2 }
  0x78   :  { %p4750_p12 = por %p4749_p11, %p4748_p10 }
  0x7a   :  { %p4751_p13 = pnand %p4750_p12, %p4744_p9 }
  0x7c   :  { %4754 = shalt.err (!%p4751_p13)
}
  0x7d   :  { %81 = dma.hbm_to_vmem [thread:$0]  %s5186_s4, 16, %s79_s22, [#allocation10]  }
  0x7e   :  { %s4755_s16 = scalar_lea.hbm %s5188_s6, 16 }
  0x7f   :  { %p4756_p0 = scmp.ne.s32.totalorder %s5188_s6, %s4755_s16  ;;  %p4759_p1 = scmp.lt.u32.totalorder %s4755_s16, %s5188_s6 }
  0x81   :  { %p4761_p2 = pnand %p4759_p1, %p4756_p0 }
  0x83   :  { %4764 = shalt.err (!%p4761_p2)
}
  0x84   :  { %s4765_s18 = scalar_lea.vmem %s101_s3, 16  ;;  %s4769_s20 = scalar_lea.vmem %s101_s3, 32 }
  0x85   :  { %p4766_p3 = scmp.ne.s32.totalorder %s101_s3, %s4765_s18  ;;  %p4770_p4 = scmp.lt.s32.totalorder %s101_s3, %s101_s3 }
  0x86   :  { %p4771_p5 = scmp.lt.s32.totalorder %s4769_s20, %s4765_s18 }
  0x88   :  { %p4772_p6 = por %p4771_p5, %p4770_p4 }
  0x8a   :  { %p4773_p7 = pnand %p4772_p6, %p4766_p3 }
  0x8c   :  { %4776 = shalt.err (!%p4773_p7)
}
  0x8d   :  { %103 = dma.hbm_to_vmem [thread:$0]  %s5188_s6, 16, %s101_s3, [#allocation13]  }
  0x8e   :  { %s4893_s23 = smov [#allocation17]   ;;  %s4894_s25 = smov [#allocation18]  }
  0x8f   :  { %s122_s19 = sshll.u32 %s4893_s23, 4  ;;  %s131_s26 = sshll.u32 %s4894_s25, 4  ;;  %s123_s19 = int_to_ptr.vmem [resolvable:$true] %s122_s19  ;;  %s5080_s26 = int_to_ptr.vmem [resolvable:$true] %s131_s26 }
  0x90   :  { %s4777_s15 = scalar_lea.hbm %s5190_s8, 16 }
  0x91   :  { %p4778_p8 = scmp.ne.s32.totalorder %s5190_s8, %s4777_s15  ;;  %p4781_p9 = scmp.lt.u32.totalorder %s4777_s15, %s5190_s8 }
  0x93   :  { %p4783_p10 = pnand %p4781_p9, %p4778_p8 }
  0x95   :  { %4786 = shalt.err (!%p4783_p10)
}
  0x96   :  { %s4787_s6 = scalar_lea.vmem %s123_s19, 16  ;;  %s4791_s3 = scalar_lea.vmem %s123_s19, 32 }
  0x97   :  { %p4788_p11 = scmp.ne.s32.totalorder %s123_s19, %s4787_s6  ;;  %p4792_p12 = scmp.lt.s32.totalorder %s123_s19, %s123_s19 }
  0x98   :  { %p4793_p13 = scmp.lt.s32.totalorder %s4791_s3, %s4787_s6 }
  0x9a   :  { %p4794_p0 = por %p4793_p13, %p4792_p12 }
  0x9c   :  { %p4795_p1 = pnand %p4794_p0, %p4788_p11 }
  0x9e   :  { %4798 = shalt.err (!%p4795_p1)
}
  0x9f   :  { %125 = dma.hbm_to_vmem [thread:$0]  %s5190_s8, 16, %s123_s19, [#allocation16]  }
  0xa0   :  { %s4799_s5 = scalar_lea.hbm %s5191_s9, 512 }
  0xa1   :  { %p4800_p2 = scmp.ne.s32.totalorder %s5191_s9, %s4799_s5  ;;  %p4803_p3 = scmp.lt.u32.totalorder %s4799_s5, %s5191_s9 }
  0xa3   :  { %p4805_p4 = pnand %p4803_p3, %p4800_p2 }
  0xa5   :  { %4808 = shalt.err (!%p4805_p4)
}
  0xa6   :  { %s4809_s20 = scalar_lea.vmem %s5080_s26, 512  ;;  %p4814_p6 = scmp.lt.s32.totalorder %s5080_s26, %s5080_s26 }
  0xa7   :  { %p4810_p5 = scmp.ne.s32.totalorder %s5080_s26, %s4809_s20  ;;  %p4815_p7 = scmp.lt.s32.totalorder %s4809_s20, %s4809_s20 }
  0xa9   :  { %p4816_p8 = por %p4815_p7, %p4814_p6 }
  0xab   :  { %p4817_p9 = pnand %p4816_p8, %p4810_p5 }
  0xad   :  { %4820 = shalt.err (!%p4817_p9)
}
  0xae   :  { %137 = dma.hbm_to_vmem [thread:$0]  %s5191_s9, 512, %s5080_s26, [#allocation19], %s4885_s1, %s4885_s1, %s4886_s24  }
  0xaf   :  { %4865 = dma.done.wait [#allocation4], 2688  }
  0xb0   :  { %4866 = vsyncadd [#allocation4], 4294964608 }
  0xb1   :  { %4867 = dma.done.wait [#allocation7], 82976  }
  0xb2   :  { %4868 = vsyncadd [#allocation7], 4294884320 }
  0xb3   :  { %4869 = dma.done.wait [#allocation10], 2704  }
  0xb4   :  { %4870 = vsyncadd [#allocation10], 4294964592 }
  0xb5   :  { %4871 = dma.done.wait [#allocation13], 41488  }
  0xb6   :  { %4872 = vsyncadd [#allocation13], 4294925808 }
  0xb7   :  { %4873 = dma.done.wait [#allocation16], 1424  }
  0xb8   :  { %4874 = vsyncadd [#allocation16], 4294965872 }
  0xb9   :  { %4875 = dma.done.wait [#allocation19], 512  }
  0xba   :  { %4876 = vsyncadd [#allocation19], 4294966784  ;;  %v320_v1 = vld [vmem:[#allocation6 + $0x408] sm:$0xff]  ;;  %v322_v2 = vld [vmem:[#allocation6 + $0x418] sm:$0xff]  ;;  %vm851_vm0 = vcmask 261120   ;;  %vm1670_vm1 = vcmask 1041408  }
  0xbb   :  { %v319_v3 = vld [vmem:[#allocation6 + $0x400] sm:$0xff]  ;;  %v3636_v4 = vpack.c.bf16 %v322_v2, %v320_v1  ;;  %v321_v5 = vld [vmem:[#allocation6 + $0x410] sm:$0xff]  ;;  %v324_v6 = vld [vmem:[#allocation6 + $0x428] sm:$0xff]  ;;  %vm1666_vm2 = vcmask 277504   ;;  %vm1744_vm3 = vcmask 670720   ;;  %vm4897_vm4 = vmmov 0  }
  0xbc   :  { %v326_v7 = vld [vmem:[#allocation6 + $0x438] sm:$0xff]  ;;  %v3638_v8 = vpack.c.bf16 %v321_v5, %v319_v3  ;;  %v323_v10 = vld [vmem:[#allocation6 + $0x420] sm:$0xff]  ;;  %v325_v11 = vld [vmem:[#allocation6 + $0x430] sm:$0xff]  ;;  %vm2882_vm5 = vcmask 1040384   ;;  %vm2878_vm6 = vcmask 662528   ;;  %s4898_s9 = smov [#allocation20]  }
  0xbd   :  { %v3640_v9 = vpack.c.bf16 %v326_v7, %v324_v6  ;;  %v328_v12 = vld [vmem:[#allocation6 + $0x448] sm:$0xff]  ;;  %3637 = vmatprep.subr.bf16.mxu0 %v3636_v4  ;;  %v330_v13 = vld [vmem:[#allocation6 + $0x458] sm:$0xff]  ;;  %v3642_v14 = vpack.c.bf16 %v325_v11, %v323_v10  ;;  %v327_v16 = vld [vmem:[#allocation6 + $0x440] sm:$0xff]  ;;  %s3050_s1 = sshll.u32 %s4898_s9, 4  ;;  %s3051_s1 = int_to_ptr.vmem [resolvable:$true] %s3050_s1 }
  0xbe   :  { %3639 = vmatpush1.bf16.msra.mxu0 %v3638_v8  ;;  %v3644_v15 = vpack.c.bf16 %v330_v13, %v328_v12  ;;  %v329_v17 = vld [vmem:[#allocation6 + $0x450] sm:$0xff]  ;;  %v332_v18 = vld [vmem:[#allocation6 + $0x468] sm:$0xff]  ;;  %v334_v19 = vld [vmem:[#allocation6 + $0x478] sm:$0xff]  ;;  %s4821_s24 = scalar_lea.vmem %s3051_s1, 128  ;;  %p4826_p11 = scmp.lt.s32.totalorder %s3051_s1, %s3051_s1 }
  0xbf   :  { %3641 = vmatprep.subr.bf16.mxu0 %v3640_v9  ;;  %v3646_v20 = vpack.c.bf16 %v329_v17, %v327_v16  ;;  %v3648_v21 = vpack.c.bf16 %v334_v19, %v332_v18  ;;  %v331_v22 = vld [vmem:[#allocation6 + $0x460] sm:$0xff]  ;;  %v333_v23 = vld [vmem:[#allocation6 + $0x470] sm:$0xff]  ;;  %v336_v24 = vld [vmem:[#allocation6 + $0x488] sm:$0xff]  ;;  %p4822_p10 = scmp.ne.s32.totalorder %s3051_s1, %s4821_s24  ;;  %p4827_p12 = scmp.lt.s32.totalorder %s4821_s24, %s4821_s24 }
  0xc0   :  { %v338_v25 = vld [vmem:[#allocation6 + $0x498] sm:$0xff]  ;;  %v3650_v26 = vpack.c.bf16 %v333_v23, %v331_v22  ;;  %v335_v28 = vld [vmem:[#allocation6 + $0x480] sm:$0xff]  ;;  %v337_v29 = vld [vmem:[#allocation6 + $0x490] sm:$0xff] }
  0xc1   :  { %v3652_v27 = vpack.c.bf16 %v338_v25, %v336_v24  ;;  %v340_v30 = vld [vmem:[#allocation6 + $0x4a8] sm:$0xff]  ;;  %v342_v31 = vld [vmem:[#allocation6 + $0x4b8] sm:$0xff]  ;;  %v3654_v32 = vpack.c.bf16 %v337_v29, %v335_v28  ;;  %v339_v34 = vld [vmem:[#allocation6 + $0x4a0] sm:$0xff]  ;;  %p4828_p13 = por %p4827_p12, %p4826_p11 }
  0xc2   :  { %3643 = vmatpush1.bf16.msra.mxu0 %v3642_v14  ;;  %v3656_v33 = vpack.c.bf16 %v342_v31, %v340_v30  ;;  %v341_v35 = vld [vmem:[#allocation6 + $0x4b0] sm:$0xff]  ;;  %v344_v36 = vld [vmem:[#allocation6 + $0x4c8] sm:$0xff]  ;;  %v346_v37 = vld [vmem:[#allocation6 + $0x4d8] sm:$0xff] }
  0xc3   :  { %3645 = vmatprep.subr.bf16.mxu0 %v3644_v15  ;;  %v3658_v38 = vpack.c.bf16 %v341_v35, %v339_v34  ;;  %v3660_v39 = vpack.c.bf16 %v346_v37, %v344_v36  ;;  %v343_v40 = vld [vmem:[#allocation6 + $0x4c0] sm:$0xff]  ;;  %v345_v41 = vld [vmem:[#allocation6 + $0x4d0] sm:$0xff]  ;;  %v348_v43 = vld [vmem:[#allocation6 + $0x4e8] sm:$0xff]  ;;  %p4829_p0 = pnand %p4828_p13, %p4822_p10 }
  0xc4   :  { %v175_v42 = vld [vmem:[#allocation3 + $0x28] sm:$0xff]  ;;  %v350_v44 = vld [vmem:[#allocation6 + $0x4f8] sm:$0xff]  ;;  %v3662_v45 = vpack.c.bf16 %v345_v41, %v343_v40  ;;  %v349_v48 = vld [vmem:[#allocation6 + $0x4f0] sm:$0xff] }
  0xc5   :  { %1061 = vmatprep.mubr.f32.mxu0 %v175_v42  ;;  %v3664_v46 = vpack.c.bf16 %v350_v44, %v348_v43  ;;  %v347_v47 = vld [vmem:[#allocation6 + $0x4e0] sm:$0xff]  ;;  %v352_v49 = vld [vmem:[#allocation6 + $0x508] sm:$0xff]  ;;  %v354_v50 = vld [vmem:[#allocation6 + $0x518] sm:$0xff] }
  0xc6   :  { %3647 = vmatpush1.bf16.msra.mxu0 %v3646_v20  ;;  %v3666_v51 = vpack.c.bf16 %v349_v48, %v347_v47  ;;  %v3668_v52 = vpack.c.bf16 %v354_v50, %v352_v49  ;;  %v351_v53 = vld [vmem:[#allocation6 + $0x500] sm:$0xff]  ;;  %v353_v54 = vld [vmem:[#allocation6 + $0x510] sm:$0xff]  ;;  %v356_v55 = vld [vmem:[#allocation6 + $0x528] sm:$0xff] }
  0xc7   :  { %3649 = vmatprep.subr.bf16.mxu0 %v3648_v21  ;;  %v358_v56 = vld [vmem:[#allocation6 + $0x538] sm:$0xff]  ;;  %v3670_v57 = vpack.c.bf16 %v353_v54, %v351_v53  ;;  %v355_v59 = vld [vmem:[#allocation6 + $0x520] sm:$0xff]  ;;  %v357_v60 = vld [vmem:[#allocation6 + $0x530] sm:$0xff] }
  0xc8   :  { %v3672_v58 = vpack.c.bf16 %v358_v56, %v356_v55  ;;  %v360_v61 = vld [vmem:[#allocation6 + $0x548] sm:$0xff]  ;;  %v362_v62 = vld [vmem:[#allocation6 + $0x558] sm:$0xff]  ;;  %v3674_v63 = vpack.c.bf16 %v357_v60, %v355_v59  ;;  %v359_v1 = vld [vmem:[#allocation6 + $0x540] sm:$0xff] }
  0xc9   :  { %v3676_v0 = vpack.c.bf16 %v362_v62, %v360_v61  ;;  %v361_v2 = vld [vmem:[#allocation6 + $0x550] sm:$0xff]  ;;  %v364_v3 = vld [vmem:[#allocation6 + $0x568] sm:$0xff]  ;;  %v366_v4 = vld [vmem:[#allocation6 + $0x578] sm:$0xff] }
  0xca   :  { %3651 = vmatpush1.bf16.msra.mxu0 %v3650_v26  ;;  %v3678_v5 = vpack.c.bf16 %v361_v2, %v359_v1  ;;  %v3680_v6 = vpack.c.bf16 %v366_v4, %v364_v3  ;;  %v363_v7 = vld [vmem:[#allocation6 + $0x560] sm:$0xff]  ;;  %v365_v8 = vld [vmem:[#allocation6 + $0x570] sm:$0xff]  ;;  %v368_v9 = vld [vmem:[#allocation6 + $0x588] sm:$0xff] }
  0xcb   :  { %3653 = vmatprep.subr.bf16.mxu0 %v3652_v27  ;;  %v370_v10 = vld [vmem:[#allocation6 + $0x598] sm:$0xff]  ;;  %v3682_v11 = vpack.c.bf16 %v365_v8, %v363_v7  ;;  %v367_v13 = vld [vmem:[#allocation6 + $0x580] sm:$0xff]  ;;  %v369_v14 = vld [vmem:[#allocation6 + $0x590] sm:$0xff] }
  0xcc   :  { %v3684_v12 = vpack.c.bf16 %v370_v10, %v368_v9  ;;  %v372_v15 = vld [vmem:[#allocation6 + $0x5a8] sm:$0xff]  ;;  %v374_v16 = vld [vmem:[#allocation6 + $0x5b8] sm:$0xff]  ;;  %v3686_v17 = vpack.c.bf16 %v369_v14, %v367_v13  ;;  %v371_v19 = vld [vmem:[#allocation6 + $0x5a0] sm:$0xff] }
  0xcd   :  { %v3688_v18 = vpack.c.bf16 %v374_v16, %v372_v15  ;;  %v373_v20 = vld [vmem:[#allocation6 + $0x5b0] sm:$0xff]  ;;  %v376_v21 = vld [vmem:[#allocation6 + $0x5c8] sm:$0xff]  ;;  %v378_v22 = vld [vmem:[#allocation6 + $0x5d8] sm:$0xff] }
  0xce   :  { %3655 = vmatpush1.bf16.msra.mxu0 %v3654_v32  ;;  %v3690_v23 = vpack.c.bf16 %v373_v20, %v371_v19  ;;  %v3692_v24 = vpack.c.bf16 %v378_v22, %v376_v21  ;;  %v375_v25 = vld [vmem:[#allocation6 + $0x5c0] sm:$0xff]  ;;  %v377_v26 = vld [vmem:[#allocation6 + $0x5d0] sm:$0xff]  ;;  %v380_v27 = vld [vmem:[#allocation6 + $0x5e8] sm:$0xff] }
  0xcf   :  { %3657 = vmatprep.subr.bf16.mxu0 %v3656_v33  ;;  %v382_v28 = vld [vmem:[#allocation6 + $0x5f8] sm:$0xff]  ;;  %v3694_v29 = vpack.c.bf16 %v377_v26, %v375_v25  ;;  %v379_v31 = vld [vmem:[#allocation6 + $0x5e0] sm:$0xff]  ;;  %v381_v32 = vld [vmem:[#allocation6 + $0x5f0] sm:$0xff] }
  0xd0   :  { %v3696_v30 = vpack.c.bf16 %v382_v28, %v380_v27  ;;  %v384_v33 = vld [vmem:[#allocation6 + $0x608] sm:$0xff]  ;;  %v386_v34 = vld [vmem:[#allocation6 + $0x618] sm:$0xff]  ;;  %v3698_v35 = vpack.c.bf16 %v381_v32, %v379_v31  ;;  %v383_v37 = vld [vmem:[#allocation6 + $0x600] sm:$0xff] }
  0xd1   :  { %v3700_v36 = vpack.c.bf16 %v386_v34, %v384_v33  ;;  %v390_v40 = vld [vmem:[#allocation6 + $0x638] sm:$0xff]  ;;  %v387_v44 = vld [vmem:[#allocation6 + $0x620] sm:$0xff]  ;;  %v392_v47 = vld [vmem:[#allocation6 + $0x648] sm:$0xff] }
  0xd2   :  { %3659 = vmatpush1.bf16.msra.mxu0 %v3658_v38  ;;  %v385_v38 = vld [vmem:[#allocation6 + $0x610] sm:$0xff]  ;;  %v174_v41 = vld [vmem:[#allocation3 + $0x20] sm:$0xff]  ;;  %v396_v53 = vld [vmem:[#allocation6 + $0x668] sm:$0xff] }
  0xd3   :  { %3661 = vmatprep.subr.bf16.mxu0 %v3660_v39  ;;  %v388_v39 = vld [vmem:[#allocation6 + $0x628] sm:$0xff]  ;;  %v3702_v42 = vpack.c.bf16 %v385_v38, %v383_v37  ;;  %v394_v48 = vld [vmem:[#allocation6 + $0x658] sm:$0xff] }
  0xd4   :  { %v3704_v43 = vpack.c.bf16 %v390_v40, %v388_v39  ;;  %v3708_v50 = vpack.c.bf16 %v394_v48, %v392_v47  ;;  %v398_v54 = vld [vmem:[#allocation6 + $0x678] sm:$0xff]  ;;  %v400_v59 = vld [vmem:[#allocation6 + $0x688] sm:$0xff]  ;;  %v431_v47 = vld [vmem:[#allocation6 + $0x780] sm:$0xff] }
  0xd5   :  { %v3712_v56 = vpack.c.bf16 %v398_v54, %v396_v53  ;;  %v402_v60 = vld [vmem:[#allocation6 + $0x698] sm:$0xff]  ;;  %v404_v1 = vld [vmem:[#allocation6 + $0x6a8] sm:$0xff]  ;;  %v433_v48 = vld [vmem:[#allocation6 + $0x790] sm:$0xff] }
  0xd6   :  { %3663 = vmatpush1.bf16.msra.mxu0 %v3662_v45  ;;  %v389_v45 = vld [vmem:[#allocation6 + $0x630] sm:$0xff]  ;;  %v3716_v62 = vpack.c.bf16 %v402_v60, %v400_v59  ;;  %v406_v2 = vld [vmem:[#allocation6 + $0x6b8] sm:$0xff]  ;;  %v408_v7 = vld [vmem:[#allocation6 + $0x6c8] sm:$0xff] }
  0xd7   :  { %3665 = vmatprep.subr.bf16.mxu0 %v3664_v46  ;;  %v177_v46 = vld [vmem:[#allocation3 + $0x38] sm:$0xff]  ;;  %v3706_v49 = vpack.c.bf16 %v389_v45, %v387_v44  ;;  %v3720_v4 = vpack.c.bf16 %v406_v2, %v404_v1  ;;  %v410_v8 = vld [vmem:[#allocation6 + $0x6d8] sm:$0xff]  ;;  %v412_v13 = vld [vmem:[#allocation6 + $0x6e8] sm:$0xff] }
  0xd8   :  { %v3724_v10 = vpack.c.bf16 %v410_v8, %v408_v7  ;;  %v414_v14 = vld [vmem:[#allocation6 + $0x6f8] sm:$0xff]  ;;  %v416_v19 = vld [vmem:[#allocation6 + $0x708] sm:$0xff]  ;;  %v435_v53 = vld [vmem:[#allocation6 + $0x7a0] sm:$0xff] }
  0xd9   :  { %v3728_v16 = vpack.c.bf16 %v414_v14, %v412_v13  ;;  %v418_v20 = vld [vmem:[#allocation6 + $0x718] sm:$0xff]  ;;  %v420_v25 = vld [vmem:[#allocation6 + $0x728] sm:$0xff]  ;;  %v437_v54 = vld [vmem:[#allocation6 + $0x7b0] sm:$0xff] }
  0xda   :  { %3667 = vmatpush1.bf16.msra.mxu0 %v3666_v51  ;;  %v391_v51 = vld [vmem:[#allocation6 + $0x640] sm:$0xff]  ;;  %v3732_v22 = vpack.c.bf16 %v418_v20, %v416_v19  ;;  %v422_v26 = vld [vmem:[#allocation6 + $0x738] sm:$0xff]  ;;  %v424_v31 = vld [vmem:[#allocation6 + $0x748] sm:$0xff] }
  0xdb   :  { %3669 = vmatprep.subr.bf16.mxu0 %v3668_v52  ;;  %v393_v52 = vld [vmem:[#allocation6 + $0x650] sm:$0xff]  ;;  %v3736_v28 = vpack.c.bf16 %v422_v26, %v420_v25  ;;  %v426_v32 = vld [vmem:[#allocation6 + $0x758] sm:$0xff]  ;;  %v428_v37 = vld [vmem:[#allocation6 + $0x768] sm:$0xff] }
  0xdc   :  { %v3710_v55 = vpack.c.bf16 %v393_v52, %v391_v51  ;;  %v3740_v34 = vpack.c.bf16 %v426_v32, %v424_v31  ;;  %v430_v38 = vld [vmem:[#allocation6 + $0x778] sm:$0xff]  ;;  %v3750_v51 = vpack.c.bf16 %v433_v48, %v431_v47  ;;  %v439_v59 = vld [vmem:[#allocation6 + $0x7c0] sm:$0xff]  ;;  %v441_v60 = vld [vmem:[#allocation6 + $0x7d0] sm:$0xff] }
  0xdd   :  { %v3744_v40 = vpack.c.bf16 %v430_v38, %v428_v37  ;;  %v434_v44 = vld [vmem:[#allocation6 + $0x798] sm:$0xff]  ;;  %v443_v1 = vld [vmem:[#allocation6 + $0x7e0] sm:$0xff]  ;;  %v445_v2 = vld [vmem:[#allocation6 + $0x7f0] sm:$0xff] }
  0xde   :  { %3671 = vmatpush1.bf16.msra.mxu0 %v3670_v57  ;;  %v395_v57 = vld [vmem:[#allocation6 + $0x660] sm:$0xff]  ;;  %v449_v8 = vld [vmem:[#allocation6 + $0x810] sm:$0xff]  ;;  %v476_v47 = vld [vmem:[#allocation6 + $0x8e8] sm:$0xff] }
  0xdf   :  { %3673 = vmatprep.subr.bf16.mxu0 %v3672_v58  ;;  %v397_v58 = vld [vmem:[#allocation6 + $0x670] sm:$0xff]  ;;  %v447_v7 = vld [vmem:[#allocation6 + $0x800] sm:$0xff]  ;;  %v478_v48 = vld [vmem:[#allocation6 + $0x8f8] sm:$0xff] }
  0xe0   :  { %v3714_v61 = vpack.c.bf16 %v397_v58, %v395_v57  ;;  %v3754_v57 = vpack.c.bf16 %v437_v54, %v435_v53  ;;  %v451_v14 = vld [vmem:[#allocation6 + $0x820] sm:$0xff]  ;;  %v480_v53 = vld [vmem:[#allocation6 + $0x908] sm:$0xff]  ;;  %v482_v54 = vld [vmem:[#allocation6 + $0x918] sm:$0xff] }
  0xe2   :  { %3675 = vmatpush1.bf16.msra.mxu0 %v3674_v63  ;;  %v399_v63 = vld [vmem:[#allocation6 + $0x680] sm:$0xff] }
  0xe3   :  { %3677 = vmatprep.subr.bf16.mxu0 %v3676_v0  ;;  %v401_v0 = vld [vmem:[#allocation6 + $0x690] sm:$0xff] }
  0xe4   :  { %v3718_v3 = vpack.c.bf16 %v401_v0, %v399_v63  ;;  %v3758_v63 = vpack.c.bf16 %v441_v60, %v439_v59  ;;  %v484_v59 = vld [vmem:[#allocation6 + $0x928] sm:$0xff]  ;;  %v486_v60 = vld [vmem:[#allocation6 + $0x938] sm:$0xff] }
  0xe6   :  { %3679 = vmatpush1.bf16.msra.mxu0 %v3678_v5  ;;  %v403_v5 = vld [vmem:[#allocation6 + $0x6a0] sm:$0xff] }
  0xe7   :  { %3681 = vmatprep.subr.bf16.mxu0 %v3680_v6  ;;  %v405_v6 = vld [vmem:[#allocation6 + $0x6b0] sm:$0xff] }
  0xe8   :  { %v3722_v9 = vpack.c.bf16 %v405_v6, %v403_v5  ;;  %v3762_v5 = vpack.c.bf16 %v445_v2, %v443_v1  ;;  %v488_v1 = vld [vmem:[#allocation6 + $0x948] sm:$0xff]  ;;  %v490_v2 = vld [vmem:[#allocation6 + $0x958] sm:$0xff] }
  0xea   :  { %3683 = vmatpush1.bf16.msra.mxu0 %v3682_v11  ;;  %v407_v11 = vld [vmem:[#allocation6 + $0x6c0] sm:$0xff] }
  0xeb   :  { %3685 = vmatprep.subr.bf16.mxu0 %v3684_v12  ;;  %v409_v12 = vld [vmem:[#allocation6 + $0x6d0] sm:$0xff] }
  0xec   :  { %v3726_v15 = vpack.c.bf16 %v409_v12, %v407_v11  ;;  %v176_v11 = vld [vmem:[#allocation3 + $0x30] sm:$0xff]  ;;  %v3766_v12 = vpack.c.bf16 %v449_v8, %v447_v7  ;;  %v494_v8 = vld [vmem:[#allocation6 + $0x978] sm:$0xff] }
  0xed   :  { %v492_v7 = vld [vmem:[#allocation6 + $0x968] sm:$0xff] }
  0xee   :  { %3687 = vmatpush1.bf16.msra.mxu0 %v3686_v17  ;;  %v411_v17 = vld [vmem:[#allocation6 + $0x6e0] sm:$0xff] }
  0xef   :  { %3689 = vmatprep.subr.bf16.mxu0 %v3688_v18  ;;  %v413_v18 = vld [vmem:[#allocation6 + $0x6f0] sm:$0xff] }
  0xf0   :  { %v3730_v21 = vpack.c.bf16 %v413_v18, %v411_v17  ;;  %v456_v17 = vld [vmem:[#allocation6 + $0x848] sm:$0xff]  ;;  %v458_v18 = vld [vmem:[#allocation6 + $0x858] sm:$0xff] }
  0xf1   :  { %v3772_v20 = vpack.c.bf16 %v458_v18, %v456_v17  ;;  %v495_v17 = vld [vmem:[#allocation6 + $0x980] sm:$0xff]  ;;  %v497_v18 = vld [vmem:[#allocation6 + $0x990] sm:$0xff] }
  0xf2   :  { %3691 = vmatpush1.bf16.msra.mxu0 %v3690_v23  ;;  %v415_v23 = vld [vmem:[#allocation6 + $0x700] sm:$0xff] }
  0xf3   :  { %3693 = vmatprep.subr.bf16.mxu0 %v3692_v24  ;;  %v417_v24 = vld [vmem:[#allocation6 + $0x710] sm:$0xff] }
  0xf4   :  { %v3734_v27 = vpack.c.bf16 %v417_v24, %v415_v23  ;;  %v460_v23 = vld [vmem:[#allocation6 + $0x868] sm:$0xff]  ;;  %v462_v24 = vld [vmem:[#allocation6 + $0x878] sm:$0xff] }
  0xf5   :  { %v3776_v26 = vpack.c.bf16 %v462_v24, %v460_v23  ;;  %v499_v23 = vld [vmem:[#allocation6 + $0x9a0] sm:$0xff]  ;;  %v501_v24 = vld [vmem:[#allocation6 + $0x9b0] sm:$0xff] }
  0xf6   :  { %3695 = vmatpush1.bf16.msra.mxu0 %v3694_v29  ;;  %v419_v29 = vld [vmem:[#allocation6 + $0x720] sm:$0xff] }
  0xf7   :  { %3697 = vmatprep.subr.bf16.mxu0 %v3696_v30  ;;  %v421_v30 = vld [vmem:[#allocation6 + $0x730] sm:$0xff] }
  0xf8   :  { %v3738_v33 = vpack.c.bf16 %v421_v30, %v419_v29  ;;  %v464_v29 = vld [vmem:[#allocation6 + $0x888] sm:$0xff]  ;;  %v466_v30 = vld [vmem:[#allocation6 + $0x898] sm:$0xff] }
  0xf9   :  { %v3780_v32 = vpack.c.bf16 %v466_v30, %v464_v29  ;;  %v503_v29 = vld [vmem:[#allocation6 + $0x9c0] sm:$0xff]  ;;  %v505_v30 = vld [vmem:[#allocation6 + $0x9d0] sm:$0xff] }
  0xfa   :  { %3699 = vmatpush1.bf16.msra.mxu0 %v3698_v35  ;;  %v423_v35 = vld [vmem:[#allocation6 + $0x740] sm:$0xff] }
  0xfb   :  { %3701 = vmatprep.subr.bf16.mxu0 %v3700_v36  ;;  %v425_v36 = vld [vmem:[#allocation6 + $0x750] sm:$0xff] }
  0xfc   :  { %v3742_v39 = vpack.c.bf16 %v425_v36, %v423_v35  ;;  %v468_v35 = vld [vmem:[#allocation6 + $0x8a8] sm:$0xff]  ;;  %v470_v36 = vld [vmem:[#allocation6 + $0x8b8] sm:$0xff] }
  0xfd   :  { %1062 = vmatmul.mubr.f32.vlgmr.msra.gmra.mrb[0].mxu0 %v174_v41  ;;  %v427_v41 = vld [vmem:[#allocation6 + $0x760] sm:$0xff]  ;;  %v3784_v38 = vpack.c.bf16 %v470_v36, %v468_v35  ;;  %v509_v36 = vld [vmem:[#allocation6 + $0x9f0] sm:$0xff] }
  0xfe   :  { %3703 = vmatpush1.bf16.msra.mxu0 %v3702_v42  ;;  %1132 = vmatprep.mubr.f32.mxu0 %v177_v46  ;;  %v429_v42 = vld [vmem:[#allocation6 + $0x770] sm:$0xff]  ;;  %v507_v35 = vld [vmem:[#allocation6 + $0x9e0] sm:$0xff] }
  0xff   :  { %3705 = vmatprep.subr.bf16.mxu0 %v3704_v43  ;;  %v432_v43 = vld [vmem:[#allocation6 + $0x788] sm:$0xff]  ;;  %v3746_v45 = vpack.c.bf16 %v429_v42, %v427_v41  ;;  %v474_v42 = vld [vmem:[#allocation6 + $0x8d8] sm:$0xff] }
 0x100   :  { %v3748_v46 = vpack.c.bf16 %v434_v44, %v432_v43  ;;  %v472_v41 = vld [vmem:[#allocation6 + $0x8c8] sm:$0xff] }
 0x101   :  { %v3788_v44 = vpack.c.bf16 %v474_v42, %v472_v41  ;;  %v511_v41 = vld [vmem:[#allocation6 + $0xa00] sm:$0xff]  ;;  %v513_v42 = vld [vmem:[#allocation6 + $0xa10] sm:$0xff] }
 0x102   :  { %3707 = vmatpush1.bf16.msra.mxu0 %v3706_v49  ;;  %v436_v49 = vld [vmem:[#allocation6 + $0x7a8] sm:$0xff] }
 0x103   :  { %3709 = vmatprep.subr.bf16.mxu0 %v3708_v50  ;;  %v438_v50 = vld [vmem:[#allocation6 + $0x7b8] sm:$0xff] }
 0x104   :  { %v3752_v52 = vpack.c.bf16 %v438_v50, %v436_v49  ;;  %v3792_v50 = vpack.c.bf16 %v478_v48, %v476_v47  ;;  %v515_v48 = vld [vmem:[#allocation6 + $0xa20] sm:$0xff] }
 0x106   :  { %3711 = vmatpush1.bf16.msra.mxu0 %v3710_v55  ;;  %v440_v55 = vld [vmem:[#allocation6 + $0x7c8] sm:$0xff] }
 0x107   :  { %3713 = vmatprep.subr.bf16.mxu0 %v3712_v56  ;;  %v442_v56 = vld [vmem:[#allocation6 + $0x7d8] sm:$0xff] }
 0x108   :  { %v3756_v58 = vpack.c.bf16 %v442_v56, %v440_v55  ;;  %v3796_v56 = vpack.c.bf16 %v482_v54, %v480_v53 }
 0x10a   :  { %3715 = vmatpush1.bf16.msra.mxu0 %v3714_v61  ;;  %v444_v61 = vld [vmem:[#allocation6 + $0x7e8] sm:$0xff] }
 0x10b   :  { %3717 = vmatprep.subr.bf16.mxu0 %v3716_v62  ;;  %v446_v62 = vld [vmem:[#allocation6 + $0x7f8] sm:$0xff] }
 0x10c   :  { %v3760_v0 = vpack.c.bf16 %v446_v62, %v444_v61  ;;  %v3800_v62 = vpack.c.bf16 %v486_v60, %v484_v59  ;;  %v192_v59 = vld [vmem:[#allocation6 + $0x8] sm:$0xff]  ;;  %v194_v60 = vld [vmem:[#allocation6 + $0x18] sm:$0xff] }
 0x10e   :  { %3719 = vmatpush1.bf16.msra.mxu0 %v3718_v3  ;;  %v448_v3 = vld [vmem:[#allocation6 + $0x808] sm:$0xff] }
 0x10f   :  { %3721 = vmatprep.subr.bf16.mxu0 %v3720_v4  ;;  %v450_v4 = vld [vmem:[#allocation6 + $0x818] sm:$0xff] }
 0x110   :  { %v3764_v6 = vpack.c.bf16 %v450_v4, %v448_v3  ;;  %v3804_v4 = vpack.c.bf16 %v490_v2, %v488_v1 }
 0x112   :  { %3723 = vmatpush1.bf16.msra.mxu0 %v3722_v9  ;;  %v452_v9 = vld [vmem:[#allocation6 + $0x828] sm:$0xff] }
 0x113   :  { %3725 = vmatprep.subr.bf16.mxu0 %v3724_v10  ;;  %v454_v10 = vld [vmem:[#allocation6 + $0x838] sm:$0xff] }
 0x114   :  { %v3768_v13 = vpack.c.bf16 %v454_v10, %v452_v9  ;;  %v3808_v10 = vpack.c.bf16 %v494_v8, %v492_v7  ;;  %v196_v7 = vld [vmem:[#allocation6 + $0x28] sm:$0xff]  ;;  %v198_v8 = vld [vmem:[#allocation6 + $0x38] sm:$0xff] }
 0x116   :  { %3727 = vmatpush1.bf16.msra.mxu0 %v3726_v15  ;;  %v453_v15 = vld [vmem:[#allocation6 + $0x830] sm:$0xff] }
 0x117   :  { %3729 = vmatprep.subr.bf16.mxu0 %v3728_v16  ;;  %v179_v16 = vld [vmem:[#allocation3 + $0x48] sm:$0xff]  ;;  %v3770_v19 = vpack.c.bf16 %v453_v15, %v451_v14  ;;  %v498_v14 = vld [vmem:[#allocation6 + $0x998] sm:$0xff] }
 0x11a   :  { %3731 = vmatpush1.bf16.msra.mxu0 %v3730_v21  ;;  %v455_v21 = vld [vmem:[#allocation6 + $0x840] sm:$0xff] }
 0x11b   :  { %3733 = vmatprep.subr.bf16.mxu0 %v3732_v22  ;;  %v457_v22 = vld [vmem:[#allocation6 + $0x850] sm:$0xff] }
 0x11c   :  { %v3774_v25 = vpack.c.bf16 %v457_v22, %v455_v21  ;;  %v3814_v21 = vpack.c.bf16 %v497_v18, %v495_v17  ;;  %v532_v17 = vld [vmem:[#allocation6 + $0xaa8] sm:$0xff]  ;;  %v534_v18 = vld [vmem:[#allocation6 + $0xab8] sm:$0xff] }
 0x11e   :  { %3735 = vmatpush1.bf16.msra.mxu0 %v3734_v27  ;;  %v459_v27 = vld [vmem:[#allocation6 + $0x860] sm:$0xff] }
 0x11f   :  { %3737 = vmatprep.subr.bf16.mxu0 %v3736_v28  ;;  %v461_v28 = vld [vmem:[#allocation6 + $0x870] sm:$0xff] }
 0x120   :  { %v3778_v31 = vpack.c.bf16 %v461_v28, %v459_v27  ;;  %v3818_v27 = vpack.c.bf16 %v501_v24, %v499_v23  ;;  %v201_v23 = vld [vmem:[#allocation6 + $0x50] sm:$0xff] }
 0x122   :  { %3739 = vmatpush1.bf16.msra.mxu0 %v3738_v33  ;;  %v463_v33 = vld [vmem:[#allocation6 + $0x880] sm:$0xff] }
 0x123   :  { %3741 = vmatprep.subr.bf16.mxu0 %v3740_v34  ;;  %v465_v34 = vld [vmem:[#allocation6 + $0x890] sm:$0xff] }
 0x124   :  { %v3782_v37 = vpack.c.bf16 %v465_v34, %v463_v33  ;;  %v3822_v33 = vpack.c.bf16 %v505_v30, %v503_v29  ;;  %v536_v29 = vld [vmem:[#allocation6 + $0xac8] sm:$0xff]  ;;  %v538_v30 = vld [vmem:[#allocation6 + $0xad8] sm:$0xff] }
 0x126   :  { %3743 = vmatpush1.bf16.msra.mxu0 %v3742_v39  ;;  %v467_v39 = vld [vmem:[#allocation6 + $0x8a0] sm:$0xff] }
 0x127   :  { %3745 = vmatprep.subr.bf16.mxu0 %v3744_v40  ;;  %v469_v40 = vld [vmem:[#allocation6 + $0x8b0] sm:$0xff] }
 0x128   :  { %v3786_v43 = vpack.c.bf16 %v469_v40, %v467_v39  ;;  %v3826_v39 = vpack.c.bf16 %v509_v36, %v507_v35  ;;  %v205_v35 = vld [vmem:[#allocation6 + $0x70] sm:$0xff] }
 0x12a   :  { %3747 = vmatpush1.bf16.msra.mxu0 %v3746_v45  ;;  %v471_v45 = vld [vmem:[#allocation6 + $0x8c0] sm:$0xff] }
 0x12b   :  { %3749 = vmatprep.subr.bf16.mxu0 %v3748_v46  ;;  %v473_v46 = vld [vmem:[#allocation6 + $0x8d0] sm:$0xff] }
 0x12c   :  { %v3790_v49 = vpack.c.bf16 %v473_v46, %v471_v45  ;;  %v178_v45 = vld [vmem:[#allocation3 + $0x40] sm:$0xff]  ;;  %v3830_v46 = vpack.c.bf16 %v513_v42, %v511_v41  ;;  %v540_v41 = vld [vmem:[#allocation6 + $0xae8] sm:$0xff] }
 0x12d   :  { %v542_v42 = vld [vmem:[#allocation6 + $0xaf8] sm:$0xff] }
 0x12e   :  { %3751 = vmatpush1.bf16.msra.mxu0 %v3750_v51  ;;  %v475_v51 = vld [vmem:[#allocation6 + $0x8e0] sm:$0xff] }
 0x12f   :  { %3753 = vmatprep.subr.bf16.mxu0 %v3752_v52  ;;  %v477_v52 = vld [vmem:[#allocation6 + $0x8f0] sm:$0xff] }
 0x130   :  { %v3794_v55 = vpack.c.bf16 %v477_v52, %v475_v51  ;;  %v520_v51 = vld [vmem:[#allocation6 + $0xa48] sm:$0xff]  ;;  %v522_v52 = vld [vmem:[#allocation6 + $0xa58] sm:$0xff] }
 0x131   :  { %v3836_v54 = vpack.c.bf16 %v522_v52, %v520_v51  ;;  %v539_v51 = vld [vmem:[#allocation6 + $0xae0] sm:$0xff]  ;;  %v541_v52 = vld [vmem:[#allocation6 + $0xaf0] sm:$0xff] }
 0x132   :  { %3755 = vmatpush1.bf16.msra.mxu0 %v3754_v57  ;;  %v479_v57 = vld [vmem:[#allocation6 + $0x900] sm:$0xff] }
 0x133   :  { %3757 = vmatprep.subr.bf16.mxu0 %v3756_v58  ;;  %v481_v58 = vld [vmem:[#allocation6 + $0x910] sm:$0xff] }
 0x134   :  { %v3798_v61 = vpack.c.bf16 %v481_v58, %v479_v57  ;;  %v524_v57 = vld [vmem:[#allocation6 + $0xa68] sm:$0xff]  ;;  %v526_v58 = vld [vmem:[#allocation6 + $0xa78] sm:$0xff] }
 0x135   :  { %v3840_v2 = vpack.c.bf16 %v526_v58, %v524_v57  ;;  %v211_v58 = vld [vmem:[#allocation6 + $0xa0] sm:$0xff] }
 0x136   :  { %3759 = vmatpush1.bf16.msra.mxu0 %v3758_v63  ;;  %v483_v63 = vld [vmem:[#allocation6 + $0x920] sm:$0xff] }
 0x137   :  { %3761 = vmatprep.subr.bf16.mxu0 %v3760_v0  ;;  %v485_v0 = vld [vmem:[#allocation6 + $0x930] sm:$0xff] }
 0x138   :  { %v3802_v3 = vpack.c.bf16 %v485_v0, %v483_v63  ;;  %v193_v63 = vld [vmem:[#allocation6 + $0x10] sm:$0xff] }
 0x13a   :  { %3763 = vmatpush1.bf16.msra.mxu0 %v3762_v5  ;;  %v487_v5 = vld [vmem:[#allocation6 + $0x940] sm:$0xff] }
 0x13b   :  { %3765 = vmatprep.subr.bf16.mxu0 %v3764_v6  ;;  %v489_v6 = vld [vmem:[#allocation6 + $0x950] sm:$0xff] }
 0x13c   :  { %v3806_v9 = vpack.c.bf16 %v489_v6, %v487_v5  ;;  %v528_v5 = vld [vmem:[#allocation6 + $0xa88] sm:$0xff]  ;;  %v530_v6 = vld [vmem:[#allocation6 + $0xa98] sm:$0xff] }
 0x13d   :  { %1133 = vmatmul.mubr.f32.vlgmr.msra.gmra.mrb[0].mxu0 %v176_v11  ;;  %v491_v11 = vld [vmem:[#allocation6 + $0x960] sm:$0xff] }
 0x13e   :  { %3767 = vmatpush1.bf16.msra.mxu0 %v3766_v12  ;;  %1203 = vmatprep.mubr.f32.mxu0 %v179_v16  ;;  %v493_v12 = vld [vmem:[#allocation6 + $0x970] sm:$0xff] }
 0x13f   :  { %3769 = vmatprep.subr.bf16.mxu0 %v3768_v13  ;;  %v496_v13 = vld [vmem:[#allocation6 + $0x988] sm:$0xff]  ;;  %v3810_v15 = vpack.c.bf16 %v493_v12, %v491_v11  ;;  %v197_v11 = vld [vmem:[#allocation6 + $0x30] sm:$0xff] }
 0x140   :  { %v3812_v16 = vpack.c.bf16 %v498_v14, %v496_v13  ;;  %v3844_v14 = vpack.c.bf16 %v530_v6, %v528_v5  ;;  %v215_v6 = vld [vmem:[#allocation6 + $0xc0] sm:$0xff] }
 0x142   :  { %3771 = vmatpush1.bf16.msra.mxu0 %v3770_v19  ;;  %v500_v19 = vld [vmem:[#allocation6 + $0x9a8] sm:$0xff] }
 0x143   :  { %3773 = vmatprep.subr.bf16.mxu0 %v3772_v20  ;;  %v502_v20 = vld [vmem:[#allocation6 + $0x9b8] sm:$0xff] }
 0x144   :  { %v3816_v22 = vpack.c.bf16 %v502_v20, %v500_v19  ;;  %v200_v19 = vld [vmem:[#allocation6 + $0x48] sm:$0xff]  ;;  %v202_v20 = vld [vmem:[#allocation6 + $0x58] sm:$0xff] }
 0x146   :  { %3775 = vmatpush1.bf16.msra.mxu0 %v3774_v25  ;;  %v504_v25 = vld [vmem:[#allocation6 + $0x9c8] sm:$0xff] }
 0x147   :  { %3777 = vmatprep.subr.bf16.mxu0 %v3776_v26  ;;  %v506_v26 = vld [vmem:[#allocation6 + $0x9d8] sm:$0xff] }
 0x148   :  { %v3820_v28 = vpack.c.bf16 %v506_v26, %v504_v25  ;;  %v3848_v26 = vpack.c.bf16 %v534_v18, %v532_v17  ;;  %v219_v18 = vld [vmem:[#allocation6 + $0xe0] sm:$0xff] }
 0x14a   :  { %3779 = vmatpush1.bf16.msra.mxu0 %v3778_v31  ;;  %v508_v31 = vld [vmem:[#allocation6 + $0x9e8] sm:$0xff] }
 0x14b   :  { %3781 = vmatprep.subr.bf16.mxu0 %v3780_v32  ;;  %v510_v32 = vld [vmem:[#allocation6 + $0x9f8] sm:$0xff] }
 0x14c   :  { %v3824_v34 = vpack.c.bf16 %v510_v32, %v508_v31  ;;  %v204_v31 = vld [vmem:[#allocation6 + $0x68] sm:$0xff]  ;;  %v206_v32 = vld [vmem:[#allocation6 + $0x78] sm:$0xff] }
 0x14e   :  { %3783 = vmatpush1.bf16.msra.mxu0 %v3782_v37  ;;  %v512_v37 = vld [vmem:[#allocation6 + $0xa08] sm:$0xff] }
 0x14f   :  { %3785 = vmatprep.subr.bf16.mxu0 %v3784_v38  ;;  %v514_v38 = vld [vmem:[#allocation6 + $0xa18] sm:$0xff] }
 0x150   :  { %v3828_v40 = vpack.c.bf16 %v514_v38, %v512_v37  ;;  %v3852_v38 = vpack.c.bf16 %v538_v30, %v536_v29  ;;  %v223_v30 = vld [vmem:[#allocation6 + $0x100] sm:$0xff] }
 0x152   :  { %3787 = vmatpush1.bf16.msra.mxu0 %v3786_v43  ;;  %v516_v43 = vld [vmem:[#allocation6 + $0xa28] sm:$0xff] }
 0x153   :  { %3789 = vmatprep.subr.bf16.mxu0 %v3788_v44  ;;  %v518_v44 = vld [vmem:[#allocation6 + $0xa38] sm:$0xff] }
 0x154   :  { %v3832_v47 = vpack.c.bf16 %v518_v44, %v516_v43  ;;  %v208_v43 = vld [vmem:[#allocation6 + $0x88] sm:$0xff]  ;;  %v210_v44 = vld [vmem:[#allocation6 + $0x98] sm:$0xff] }
 0x156   :  { %3791 = vmatpush1.bf16.msra.mxu0 %v3790_v49  ;;  %v517_v49 = vld [vmem:[#allocation6 + $0xa30] sm:$0xff] }
 0x157   :  { %3793 = vmatprep.subr.bf16.mxu0 %v3792_v50  ;;  %v181_v50 = vld [vmem:[#allocation3 + $0x58] sm:$0xff]  ;;  %v3834_v53 = vpack.c.bf16 %v517_v49, %v515_v48 }
 0x15a   :  { %3795 = vmatpush1.bf16.msra.mxu0 %v3794_v55  ;;  %v519_v55 = vld [vmem:[#allocation6 + $0xa40] sm:$0xff] }
 0x15b   :  { %3797 = vmatprep.subr.bf16.mxu0 %v3796_v56  ;;  %v521_v56 = vld [vmem:[#allocation6 + $0xa50] sm:$0xff] }
 0x15c   :  { %v3838_v0 = vpack.c.bf16 %v521_v56, %v519_v55  ;;  %v212_v55 = vld [vmem:[#allocation6 + $0xa8] sm:$0xff]  ;;  %v214_v56 = vld [vmem:[#allocation6 + $0xb8] sm:$0xff] }
 0x15d   :  { %v3528_v57 = vpack.c.bf16 %v214_v56, %v212_v55  ;;  %v233_v55 = vld [vmem:[#allocation6 + $0x150] sm:$0xff] }
 0x15e   :  { %3799 = vmatpush1.bf16.msra.mxu0 %v3798_v61  ;;  %v3508_v61 = vpack.c.bf16 %v194_v60, %v192_v59  ;;  %v213_v59 = vld [vmem:[#allocation6 + $0xb0] sm:$0xff]  ;;  %v3858_v60 = vpack.c.bf16 %v541_v52, %v539_v51  ;;  %v232_v51 = vld [vmem:[#allocation6 + $0x148] sm:$0xff]  ;;  %v234_v52 = vld [vmem:[#allocation6 + $0x158] sm:$0xff] }
 0x15f   :  { %3801 = vmatprep.subr.bf16.mxu0 %v3800_v62  ;;  %v191_v62 = vld [vmem:[#allocation6] sm:$0xff] }
 0x160   :  { %v3510_v1 = vpack.c.bf16 %v193_v63, %v191_v62  ;;  %3509 = vmatprep.subr.bf16.mxu1 %v3508_v61  ;;  %v3530_v61 = vpack.c.bf16 %v213_v59, %v211_v58  ;;  %v543_v63 = vld [vmem:[#allocation6 + $0xb00] sm:$0xff] }
 0x161   :  { %v563_v59 = vld [vmem:[#allocation6 + $0xba0] sm:$0xff] }
 0x162   :  { %3803 = vmatpush1.bf16.msra.mxu0 %v3802_v3  ;;  %v523_v3 = vld [vmem:[#allocation6 + $0xa60] sm:$0xff]  ;;  %3511 = vmatpush1.bf16.msra.mxu1 %v3510_v1  ;;  %v548_v1 = vld [vmem:[#allocation6 + $0xb28] sm:$0xff] }
 0x163   :  { %3805 = vmatprep.subr.bf16.mxu0 %v3804_v4  ;;  %v525_v4 = vld [vmem:[#allocation6 + $0xa70] sm:$0xff] }
 0x164   :  { %v3842_v12 = vpack.c.bf16 %v525_v4, %v523_v3  ;;  %v216_v3 = vld [vmem:[#allocation6 + $0xc8] sm:$0xff]  ;;  %v218_v4 = vld [vmem:[#allocation6 + $0xd8] sm:$0xff] }
 0x165   :  { %v3532_v5 = vpack.c.bf16 %v218_v4, %v216_v3  ;;  %v237_v3 = vld [vmem:[#allocation6 + $0x170] sm:$0xff] }
 0x166   :  { %3807 = vmatpush1.bf16.msra.mxu0 %v3806_v9  ;;  %v3512_v9 = vpack.c.bf16 %v198_v8, %v196_v7  ;;  %v217_v7 = vld [vmem:[#allocation6 + $0xd0] sm:$0xff] }
 0x167   :  { %3809 = vmatprep.subr.bf16.mxu0 %v3808_v10  ;;  %v195_v10 = vld [vmem:[#allocation6 + $0x20] sm:$0xff] }
 0x168   :  { %v3514_v13 = vpack.c.bf16 %v197_v11, %v195_v10  ;;  %3513 = vmatprep.subr.bf16.mxu1 %v3512_v9  ;;  %v3534_v9 = vpack.c.bf16 %v217_v7, %v215_v6  ;;  %v547_v11 = vld [vmem:[#allocation6 + $0xb20] sm:$0xff] }
 0x169   :  { %v567_v7 = vld [vmem:[#allocation6 + $0xbc0] sm:$0xff] }
 0x16a   :  { %3811 = vmatpush1.bf16.msra.mxu0 %v3810_v15  ;;  %v527_v15 = vld [vmem:[#allocation6 + $0xa80] sm:$0xff]  ;;  %3515 = vmatpush1.bf16.msra.mxu1 %v3514_v13  ;;  %v552_v13 = vld [vmem:[#allocation6 + $0xb48] sm:$0xff] }
 0x16b   :  { %3813 = vmatprep.subr.bf16.mxu0 %v3812_v16  ;;  %v529_v16 = vld [vmem:[#allocation6 + $0xa90] sm:$0xff] }
 0x16c   :  { %v3846_v24 = vpack.c.bf16 %v529_v16, %v527_v15  ;;  %v220_v15 = vld [vmem:[#allocation6 + $0xe8] sm:$0xff]  ;;  %v222_v16 = vld [vmem:[#allocation6 + $0xf8] sm:$0xff] }
 0x16d   :  { %v3536_v17 = vpack.c.bf16 %v222_v16, %v220_v15  ;;  %v241_v15 = vld [vmem:[#allocation6 + $0x190] sm:$0xff] }
 0x16e   :  { %3815 = vmatpush1.bf16.msra.mxu0 %v3814_v21  ;;  %v3516_v21 = vpack.c.bf16 %v202_v20, %v200_v19  ;;  %v221_v19 = vld [vmem:[#allocation6 + $0xf0] sm:$0xff] }
 0x16f   :  { %3817 = vmatprep.subr.bf16.mxu0 %v3816_v22  ;;  %v199_v22 = vld [vmem:[#allocation6 + $0x40] sm:$0xff] }
 0x170   :  { %v3518_v25 = vpack.c.bf16 %v201_v23, %v199_v22  ;;  %3517 = vmatprep.subr.bf16.mxu1 %v3516_v21  ;;  %v3538_v21 = vpack.c.bf16 %v221_v19, %v219_v18  ;;  %v551_v23 = vld [vmem:[#allocation6 + $0xb40] sm:$0xff] }
 0x171   :  { %v571_v19 = vld [vmem:[#allocation6 + $0xbe0] sm:$0xff] }
 0x172   :  { %3819 = vmatpush1.bf16.msra.mxu0 %v3818_v27  ;;  %v531_v27 = vld [vmem:[#allocation6 + $0xaa0] sm:$0xff]  ;;  %3519 = vmatpush1.bf16.msra.mxu1 %v3518_v25  ;;  %v556_v25 = vld [vmem:[#allocation6 + $0xb68] sm:$0xff] }
 0x173   :  { %3821 = vmatprep.subr.bf16.mxu0 %v3820_v28  ;;  %v533_v28 = vld [vmem:[#allocation6 + $0xab0] sm:$0xff] }
 0x174   :  { %v3850_v36 = vpack.c.bf16 %v533_v28, %v531_v27  ;;  %v224_v27 = vld [vmem:[#allocation6 + $0x108] sm:$0xff]  ;;  %v226_v28 = vld [vmem:[#allocation6 + $0x118] sm:$0xff] }
 0x175   :  { %v3540_v29 = vpack.c.bf16 %v226_v28, %v224_v27  ;;  %v245_v27 = vld [vmem:[#allocation6 + $0x1b0] sm:$0xff] }
 0x176   :  { %3823 = vmatpush1.bf16.msra.mxu0 %v3822_v33  ;;  %v3520_v33 = vpack.c.bf16 %v206_v32, %v204_v31  ;;  %v225_v31 = vld [vmem:[#allocation6 + $0x110] sm:$0xff] }
 0x177   :  { %3825 = vmatprep.subr.bf16.mxu0 %v3824_v34  ;;  %v203_v34 = vld [vmem:[#allocation6 + $0x60] sm:$0xff] }
 0x178   :  { %v3522_v37 = vpack.c.bf16 %v205_v35, %v203_v34  ;;  %3521 = vmatprep.subr.bf16.mxu1 %v3520_v33  ;;  %v3542_v33 = vpack.c.bf16 %v225_v31, %v223_v30  ;;  %v555_v35 = vld [vmem:[#allocation6 + $0xb60] sm:$0xff] }
 0x179   :  { %v575_v31 = vld [vmem:[#allocation6 + $0xc00] sm:$0xff] }
 0x17a   :  { %3827 = vmatpush1.bf16.msra.mxu0 %v3826_v39  ;;  %v535_v39 = vld [vmem:[#allocation6 + $0xac0] sm:$0xff]  ;;  %3523 = vmatpush1.bf16.msra.mxu1 %v3522_v37  ;;  %v560_v37 = vld [vmem:[#allocation6 + $0xb88] sm:$0xff] }
 0x17b   :  { %3829 = vmatprep.subr.bf16.mxu0 %v3828_v40  ;;  %v537_v40 = vld [vmem:[#allocation6 + $0xad0] sm:$0xff] }
 0x17c   :  { %v3854_v48 = vpack.c.bf16 %v537_v40, %v535_v39  ;;  %v228_v39 = vld [vmem:[#allocation6 + $0x128] sm:$0xff]  ;;  %v230_v40 = vld [vmem:[#allocation6 + $0x138] sm:$0xff] }
 0x17d   :  { %1204 = vmatmul.mubr.f32.vlgmr.msra.gmra.mrb[0].mxu0 %v178_v45  ;;  %v3524_v45 = vpack.c.bf16 %v210_v44, %v208_v43  ;;  %v229_v43 = vld [vmem:[#allocation6 + $0x130] sm:$0xff] }
 0x17e   :  { %3831 = vmatpush1.bf16.msra.mxu0 %v3830_v46  ;;  %1274 = vmatprep.mubr.f32.mxu0 %v181_v50  ;;  %v207_v46 = vld [vmem:[#allocation6 + $0x80] sm:$0xff]  ;;  %v3856_v50 = vpack.c.bf16 %v542_v42, %v540_v41  ;;  %v3544_v41 = vpack.c.bf16 %v230_v40, %v228_v39  ;;  %v249_v39 = vld [vmem:[#allocation6 + $0x1d0] sm:$0xff]  ;;  %v180_v40 = vld [vmem:[#allocation3 + $0x50] sm:$0xff] }
 0x17f   :  { %3833 = vmatprep.subr.bf16.mxu0 %v3832_v47  ;;  %v209_v47 = vld [vmem:[#allocation6 + $0x90] sm:$0xff]  ;;  %3525 = vmatprep.subr.bf16.mxu1 %v3524_v45  ;;  %v227_v42 = vld [vmem:[#allocation6 + $0x120] sm:$0xff] }
 0x180   :  { %v3526_v49 = vpack.c.bf16 %v209_v47, %v207_v46  ;;  %v3546_v45 = vpack.c.bf16 %v229_v43, %v227_v42  ;;  %v559_v47 = vld [vmem:[#allocation6 + $0xb80] sm:$0xff] }
 0x181   :  { %v579_v42 = vld [vmem:[#allocation6 + $0xc20] sm:$0xff] }
 0x182   :  { %3835 = vmatpush1.bf16.msra.mxu0 %v3834_v53  ;;  %v544_v53 = vld [vmem:[#allocation6 + $0xb08] sm:$0xff]  ;;  %3527 = vmatpush1.bf16.msra.mxu1 %v3526_v49 }
 0x183   :  { %3837 = vmatprep.subr.bf16.mxu0 %v3836_v54  ;;  %v546_v54 = vld [vmem:[#allocation6 + $0xb18] sm:$0xff]  ;;  %3529 = vmatprep.subr.bf16.mxu1 %v3528_v57  ;;  %v564_v49 = vld [vmem:[#allocation6 + $0xba8] sm:$0xff] }
 0x184   :  { %v3860_v62 = vpack.c.bf16 %v546_v54, %v544_v53  ;;  %v3548_v53 = vpack.c.bf16 %v234_v52, %v232_v51  ;;  %v231_v54 = vld [vmem:[#allocation6 + $0x140] sm:$0xff] }
 0x185   :  { %v3550_v57 = vpack.c.bf16 %v233_v55, %v231_v54  ;;  %v251_v52 = vld [vmem:[#allocation6 + $0x1e0] sm:$0xff] }
 0x186   :  { %3839 = vmatpush1.bf16.msra.mxu0 %v3838_v0  ;;  %v545_v0 = vld [vmem:[#allocation6 + $0xb10] sm:$0xff]  ;;  %3531 = vmatpush1.bf16.msra.mxu1 %v3530_v61  ;;  %v568_v61 = vld [vmem:[#allocation6 + $0xbc8] sm:$0xff] }
 0x187   :  { %3841 = vmatprep.subr.bf16.mxu0 %v3840_v2  ;;  %v550_v2 = vld [vmem:[#allocation6 + $0xb38] sm:$0xff]  ;;  %v3862_v8 = vpack.c.bf16 %v545_v0, %v543_v63  ;;  %3533 = vmatprep.subr.bf16.mxu1 %v3532_v5  ;;  %v236_v63 = vld [vmem:[#allocation6 + $0x168] sm:$0xff] }
 0x188   :  { %v3864_v10 = vpack.c.bf16 %v550_v2, %v548_v1  ;;  %v238_v0 = vld [vmem:[#allocation6 + $0x178] sm:$0xff]  ;;  %v235_v2 = vld [vmem:[#allocation6 + $0x160] sm:$0xff] }
 0x189   :  { %v3552_v1 = vpack.c.bf16 %v238_v0, %v236_v63  ;;  %v3554_v5 = vpack.c.bf16 %v237_v3, %v235_v2  ;;  %v255_v0 = vld [vmem:[#allocation6 + $0x200] sm:$0xff] }
 0x18a   :  { %3843 = vmatpush1.bf16.msra.mxu0 %v3842_v12  ;;  %v549_v12 = vld [vmem:[#allocation6 + $0xb30] sm:$0xff]  ;;  %3535 = vmatpush1.bf16.msra.mxu1 %v3534_v9  ;;  %v572_v9 = vld [vmem:[#allocation6 + $0xbe8] sm:$0xff]  ;;  %v171_v3 = vld [vmem:[#allocation3 + $0x8] sm:$0xff] }
 0x18b   :  { %3845 = vmatprep.subr.bf16.mxu0 %v3844_v14  ;;  %v554_v14 = vld [vmem:[#allocation6 + $0xb58] sm:$0xff]  ;;  %v3866_v20 = vpack.c.bf16 %v549_v12, %v547_v11  ;;  %3537 = vmatprep.subr.bf16.mxu1 %v3536_v17  ;;  %v240_v11 = vld [vmem:[#allocation6 + $0x188] sm:$0xff] }
 0x18c   :  { %v3868_v22 = vpack.c.bf16 %v554_v14, %v552_v13  ;;  %v242_v12 = vld [vmem:[#allocation6 + $0x198] sm:$0xff]  ;;  %v239_v14 = vld [vmem:[#allocation6 + $0x180] sm:$0xff]  ;;  %919 = vmatprep.mubr.f32.mxu1 %v171_v3 }
 0x18d   :  { %v3556_v13 = vpack.c.bf16 %v242_v12, %v240_v11  ;;  %v3558_v17 = vpack.c.bf16 %v241_v15, %v239_v14  ;;  %v260_v11 = vld [vmem:[#allocation6 + $0x228] sm:$0xff]  ;;  %v262_v12 = vld [vmem:[#allocation6 + $0x238] sm:$0xff]  ;;  %v259_v14 = vld [vmem:[#allocation6 + $0x220] sm:$0xff] }
 0x18e   :  { %3847 = vmatpush1.bf16.msra.mxu0 %v3846_v24  ;;  %v553_v24 = vld [vmem:[#allocation6 + $0xb50] sm:$0xff]  ;;  %3539 = vmatpush1.bf16.msra.mxu1 %v3538_v21  ;;  %v576_v21 = vld [vmem:[#allocation6 + $0xc08] sm:$0xff]  ;;  %v607_v3 = vld [vmem:[#allocation6 + $0xd00] sm:$0xff] }
 0x18f   :  { %3849 = vmatprep.subr.bf16.mxu0 %v3848_v26  ;;  %v558_v26 = vld [vmem:[#allocation6 + $0xb78] sm:$0xff]  ;;  %v3870_v32 = vpack.c.bf16 %v553_v24, %v551_v23  ;;  %3541 = vmatprep.subr.bf16.mxu1 %v3540_v29  ;;  %v244_v23 = vld [vmem:[#allocation6 + $0x1a8] sm:$0xff]  ;;  %v261_v15 = vld [vmem:[#allocation6 + $0x230] sm:$0xff] }
 0x190   :  { %v3872_v34 = vpack.c.bf16 %v558_v26, %v556_v25  ;;  %v246_v24 = vld [vmem:[#allocation6 + $0x1b8] sm:$0xff]  ;;  %v243_v26 = vld [vmem:[#allocation6 + $0x1a0] sm:$0xff] }
 0x191   :  { %v3560_v25 = vpack.c.bf16 %v246_v24, %v244_v23  ;;  %v3562_v29 = vpack.c.bf16 %v245_v27, %v243_v26  ;;  %v264_v23 = vld [vmem:[#allocation6 + $0x248] sm:$0xff]  ;;  %v266_v24 = vld [vmem:[#allocation6 + $0x258] sm:$0xff]  ;;  %v263_v26 = vld [vmem:[#allocation6 + $0x240] sm:$0xff] }
 0x192   :  { %3851 = vmatpush1.bf16.msra.mxu0 %v3850_v36  ;;  %v557_v36 = vld [vmem:[#allocation6 + $0xb70] sm:$0xff]  ;;  %3543 = vmatpush1.bf16.msra.mxu1 %v3542_v33  ;;  %v580_v33 = vld [vmem:[#allocation6 + $0xc28] sm:$0xff] }
 0x193   :  { %3853 = vmatprep.subr.bf16.mxu0 %v3852_v38  ;;  %v562_v38 = vld [vmem:[#allocation6 + $0xb98] sm:$0xff]  ;;  %v3874_v44 = vpack.c.bf16 %v557_v36, %v555_v35  ;;  %3545 = vmatprep.subr.bf16.mxu1 %v3544_v41  ;;  %v248_v35 = vld [vmem:[#allocation6 + $0x1c8] sm:$0xff]  ;;  %v265_v27 = vld [vmem:[#allocation6 + $0x250] sm:$0xff] }
 0x194   :  { %v3876_v46 = vpack.c.bf16 %v562_v38, %v560_v37  ;;  %v250_v36 = vld [vmem:[#allocation6 + $0x1d8] sm:$0xff]  ;;  %v247_v38 = vld [vmem:[#allocation6 + $0x1c0] sm:$0xff] }
 0x195   :  { %v3564_v37 = vpack.c.bf16 %v250_v36, %v248_v35  ;;  %v3566_v43 = vpack.c.bf16 %v249_v39, %v247_v38  ;;  %v268_v35 = vld [vmem:[#allocation6 + $0x268] sm:$0xff]  ;;  %v270_v36 = vld [vmem:[#allocation6 + $0x278] sm:$0xff]  ;;  %v267_v38 = vld [vmem:[#allocation6 + $0x260] sm:$0xff] }
 0x196   :  { %3855 = vmatpush1.bf16.msra.mxu0 %v3854_v48  ;;  %v561_v48 = vld [vmem:[#allocation6 + $0xb90] sm:$0xff]  ;;  %3547 = vmatpush1.bf16.msra.mxu1 %v3546_v45 }
 0x197   :  { %3857 = vmatprep.subr.bf16.mxu0 %v3856_v50  ;;  %v566_v50 = vld [vmem:[#allocation6 + $0xbb8] sm:$0xff]  ;;  %v3878_v56 = vpack.c.bf16 %v561_v48, %v559_v47  ;;  %3549 = vmatprep.subr.bf16.mxu1 %v3548_v53  ;;  %v581_v45 = vld [vmem:[#allocation6 + $0xc30] sm:$0xff]  ;;  %v183_v47 = vld [vmem:[#allocation3 + $0x68] sm:$0xff] }
 0x198   :  { %v3880_v58 = vpack.c.bf16 %v566_v50, %v564_v49  ;;  %v586_v48 = vld [vmem:[#allocation6 + $0xc58] sm:$0xff]  ;;  %v252_v49 = vld [vmem:[#allocation6 + $0x1e8] sm:$0xff]  ;;  %v253_v53 = vld [vmem:[#allocation6 + $0x1f0] sm:$0xff]  ;;  %v3898_v54 = vpack.c.bf16 %v581_v45, %v579_v42 }
 0x199   :  { %v254_v50 = vld [vmem:[#allocation6 + $0x1f8] sm:$0xff]  ;;  %v3570_v55 = vpack.c.bf16 %v253_v53, %v251_v52  ;;  %v269_v39 = vld [vmem:[#allocation6 + $0x270] sm:$0xff]  ;;  %v604_v45 = vld [vmem:[#allocation6 + $0xce8] sm:$0xff] }
 0x19a   :  { %3859 = vmatpush1.bf16.msra.mxu0 %v3858_v60  ;;  %v565_v60 = vld [vmem:[#allocation6 + $0xbb0] sm:$0xff]  ;;  %3551 = vmatpush1.bf16.msra.mxu1 %v3550_v57  ;;  %v3568_v51 = vpack.c.bf16 %v254_v50, %v252_v49  ;;  %v583_v57 = vld [vmem:[#allocation6 + $0xc40] sm:$0xff] }
 0x19b   :  { %3861 = vmatprep.subr.bf16.mxu0 %v3860_v62  ;;  %v570_v62 = vld [vmem:[#allocation6 + $0xbd8] sm:$0xff]  ;;  %v3882_v4 = vpack.c.bf16 %v565_v60, %v563_v59  ;;  %3553 = vmatprep.subr.bf16.mxu1 %v3552_v1  ;;  %v588_v59 = vld [vmem:[#allocation6 + $0xc68] sm:$0xff]  ;;  %v257_v1 = vld [vmem:[#allocation6 + $0x210] sm:$0xff] }
 0x19c   :  { %v3884_v6 = vpack.c.bf16 %v570_v62, %v568_v61  ;;  %v590_v60 = vld [vmem:[#allocation6 + $0xc78] sm:$0xff]  ;;  %v256_v61 = vld [vmem:[#allocation6 + $0x208] sm:$0xff]  ;;  %v271_v50 = vld [vmem:[#allocation6 + $0x280] sm:$0xff] }
 0x19d   :  { %v258_v62 = vld [vmem:[#allocation6 + $0x218] sm:$0xff] }
 0x19e   :  { %3863 = vmatpush1.bf16.msra.mxu0 %v3862_v8  ;;  %v569_v8 = vld [vmem:[#allocation6 + $0xbd0] sm:$0xff]  ;;  %3555 = vmatpush1.bf16.msra.mxu1 %v3554_v5  ;;  %v3572_v63 = vpack.c.bf16 %v258_v62, %v256_v61  ;;  %v3574_v5 = vpack.c.bf16 %v257_v1, %v255_v0  ;;  %v275_v62 = vld [vmem:[#allocation6 + $0x2a0] sm:$0xff] }
 0x19f   :  { %3865 = vmatprep.subr.bf16.mxu0 %v3864_v10  ;;  %v574_v10 = vld [vmem:[#allocation6 + $0xbf8] sm:$0xff]  ;;  %v3886_v16 = vpack.c.bf16 %v569_v8, %v567_v7  ;;  %3557 = vmatprep.subr.bf16.mxu1 %v3556_v13  ;;  %v587_v7 = vld [vmem:[#allocation6 + $0xc60] sm:$0xff]  ;;  %v589_v8 = vld [vmem:[#allocation6 + $0xc70] sm:$0xff]  ;;  %v3576_v13 = vpack.c.bf16 %v262_v12, %v260_v11 }
 0x1a0   :  { %v3888_v18 = vpack.c.bf16 %v574_v10, %v572_v9  ;;  %v592_v9 = vld [vmem:[#allocation6 + $0xc88] sm:$0xff]  ;;  %v594_v10 = vld [vmem:[#allocation6 + $0xc98] sm:$0xff]  ;;  %v281_v11 = vld [vmem:[#allocation6 + $0x2d0] sm:$0xff] }
 0x1a2   :  { %3867 = vmatpush1.bf16.msra.mxu0 %v3866_v20  ;;  %v573_v20 = vld [vmem:[#allocation6 + $0xbf0] sm:$0xff]  ;;  %3559 = vmatpush1.bf16.msra.mxu1 %v3558_v17  ;;  %v3578_v17 = vpack.c.bf16 %v261_v15, %v259_v14  ;;  %v611_v15 = vld [vmem:[#allocation6 + $0xd20] sm:$0xff] }
 0x1a3   :  { %3869 = vmatprep.subr.bf16.mxu0 %v3868_v22  ;;  %v578_v22 = vld [vmem:[#allocation6 + $0xc18] sm:$0xff]  ;;  %v3890_v28 = vpack.c.bf16 %v573_v20, %v571_v19  ;;  %3561 = vmatprep.subr.bf16.mxu1 %v3560_v25  ;;  %v591_v19 = vld [vmem:[#allocation6 + $0xc80] sm:$0xff]  ;;  %v593_v20 = vld [vmem:[#allocation6 + $0xc90] sm:$0xff]  ;;  %v3580_v25 = vpack.c.bf16 %v266_v24, %v264_v23 }
 0x1a4   :  { %v3892_v30 = vpack.c.bf16 %v578_v22, %v576_v21  ;;  %v596_v21 = vld [vmem:[#allocation6 + $0xca8] sm:$0xff]  ;;  %v598_v22 = vld [vmem:[#allocation6 + $0xcb8] sm:$0xff]  ;;  %v285_v23 = vld [vmem:[#allocation6 + $0x2f0] sm:$0xff] }
 0x1a6   :  { %3871 = vmatpush1.bf16.msra.mxu0 %v3870_v32  ;;  %v577_v32 = vld [vmem:[#allocation6 + $0xc10] sm:$0xff]  ;;  %3563 = vmatpush1.bf16.msra.mxu1 %v3562_v29  ;;  %v3582_v29 = vpack.c.bf16 %v265_v27, %v263_v26  ;;  %v615_v27 = vld [vmem:[#allocation6 + $0xd40] sm:$0xff] }
 0x1a7   :  { %3873 = vmatprep.subr.bf16.mxu0 %v3872_v34  ;;  %v582_v34 = vld [vmem:[#allocation6 + $0xc38] sm:$0xff]  ;;  %v3894_v41 = vpack.c.bf16 %v577_v32, %v575_v31  ;;  %3565 = vmatprep.subr.bf16.mxu1 %v3564_v37  ;;  %v595_v31 = vld [vmem:[#allocation6 + $0xca0] sm:$0xff]  ;;  %v597_v32 = vld [vmem:[#allocation6 + $0xcb0] sm:$0xff]  ;;  %v3584_v37 = vpack.c.bf16 %v270_v36, %v268_v35 }
 0x1a8   :  { %v289_v35 = vld [vmem:[#allocation6 + $0x310] sm:$0xff] }
 0x1aa   :  { %3875 = vmatpush1.bf16.msra.mxu0 %v3874_v44  ;;  %v3896_v44 = vpack.c.bf16 %v582_v34, %v580_v33  ;;  %3567 = vmatpush1.bf16.msra.mxu1 %v3566_v43  ;;  %v600_v33 = vld [vmem:[#allocation6 + $0xcc8] sm:$0xff]  ;;  %v602_v34 = vld [vmem:[#allocation6 + $0xcd8] sm:$0xff]  ;;  %v599_v43 = vld [vmem:[#allocation6 + $0xcc0] sm:$0xff] }
 0x1ab   :  { %3877 = vmatprep.subr.bf16.mxu0 %v3876_v46  ;;  %v584_v46 = vld [vmem:[#allocation6 + $0xc48] sm:$0xff]  ;;  %3569 = vmatprep.subr.bf16.mxu1 %v3568_v51  ;;  %v3916_v42 = vpack.c.bf16 %v602_v34, %v600_v33  ;;  %v273_v51 = vld [vmem:[#allocation6 + $0x290] sm:$0xff]  ;;  %v287_v34 = vld [vmem:[#allocation6 + $0x300] sm:$0xff] }
 0x1ac   :  { %v3590_v53 = vpack.c.bf16 %v273_v51, %v271_v50  ;;  %v623_v51 = vld [vmem:[#allocation6 + $0xd80] sm:$0xff] }
 0x1ae   :  { %3879 = vmatpush1.bf16.msra.mxu0 %v3878_v56  ;;  %v3900_v56 = vpack.c.bf16 %v586_v48, %v584_v46  ;;  %3571 = vmatpush1.bf16.msra.mxu1 %v3570_v55  ;;  %v606_v46 = vld [vmem:[#allocation6 + $0xcf8] sm:$0xff]  ;;  %v603_v55 = vld [vmem:[#allocation6 + $0xce0] sm:$0xff] }
 0x1af   :  { %3881 = vmatprep.subr.bf16.mxu0 %v3880_v58  ;;  %v585_v58 = vld [vmem:[#allocation6 + $0xc50] sm:$0xff]  ;;  %3573 = vmatprep.subr.bf16.mxu1 %v3572_v63  ;;  %v274_v48 = vld [vmem:[#allocation6 + $0x298] sm:$0xff] }
 0x1b0   :  { %v3902_v2 = vpack.c.bf16 %v585_v58, %v583_v57  ;;  %v608_v57 = vld [vmem:[#allocation6 + $0xd08] sm:$0xff]  ;;  %v610_v58 = vld [vmem:[#allocation6 + $0xd18] sm:$0xff]  ;;  %v277_v63 = vld [vmem:[#allocation6 + $0x2b0] sm:$0xff] }
 0x1b1   :  { %v3594_v1 = vpack.c.bf16 %v277_v63, %v275_v62  ;;  %v627_v63 = vld [vmem:[#allocation6 + $0xda0] sm:$0xff] }
 0x1b2   :  { %3883 = vmatpush1.bf16.msra.mxu0 %v3882_v4  ;;  %v170_v4 = vld [vmem:[#allocation3] sm:$0xff] }
 0x1b3   :  { %3885 = vmatprep.subr.bf16.mxu0 %v3884_v6  ;;  %v3904_v6 = vpack.c.bf16 %v590_v60, %v588_v59  ;;  %920 = vmatmul.mubr.f32.vlgmr.msra.gmra.mrb[0].mxu1 %v170_v4  ;;  %v276_v59 = vld [vmem:[#allocation6 + $0x2a8] sm:$0xff]  ;;  %v278_v60 = vld [vmem:[#allocation6 + $0x2b8] sm:$0xff]  ;;  %v609_v4 = vld [vmem:[#allocation6 + $0xd10] sm:$0xff] }
 0x1b4   :  { %3575 = vmatpush1.bf16.msra.mxu1 %v3574_v5  ;;  %v3592_v61 = vpack.c.bf16 %v278_v60, %v276_v59  ;;  %v612_v5 = vld [vmem:[#allocation6 + $0xd28] sm:$0xff]  ;;  %v3926_v12 = vpack.c.bf16 %v609_v4, %v607_v3  ;;  %v297_v59 = vld [vmem:[#allocation6 + $0x350] sm:$0xff]  ;;  %v302_v4 = vld [vmem:[#allocation6 + $0x378] sm:$0xff] }
 0x1b5   :  { %3577 = vmatprep.subr.bf16.mxu1 %v3576_v13  ;;  %v300_v3 = vld [vmem:[#allocation6 + $0x368] sm:$0xff] }
 0x1b6   :  { %3887 = vmatpush1.bf16.msra.mxu0 %v3886_v16  ;;  %v3906_v16 = vpack.c.bf16 %v589_v8, %v587_v7  ;;  %v280_v7 = vld [vmem:[#allocation6 + $0x2c8] sm:$0xff]  ;;  %v282_v8 = vld [vmem:[#allocation6 + $0x2d8] sm:$0xff] }
 0x1b7   :  { %3889 = vmatprep.subr.bf16.mxu0 %v3888_v18  ;;  %v3908_v18 = vpack.c.bf16 %v594_v10, %v592_v9  ;;  %v3596_v9 = vpack.c.bf16 %v282_v8, %v280_v7  ;;  %v279_v10 = vld [vmem:[#allocation6 + $0x2c0] sm:$0xff]  ;;  %v301_v7 = vld [vmem:[#allocation6 + $0x370] sm:$0xff] }
 0x1b8   :  { %3579 = vmatpush1.bf16.msra.mxu1 %v3578_v17  ;;  %v3598_v13 = vpack.c.bf16 %v281_v11, %v279_v10  ;;  %v616_v17 = vld [vmem:[#allocation6 + $0xd48] sm:$0xff]  ;;  %v631_v11 = vld [vmem:[#allocation6 + $0xdc0] sm:$0xff] }
 0x1b9   :  { %3581 = vmatprep.subr.bf16.mxu1 %v3580_v25 }
 0x1ba   :  { %3891 = vmatpush1.bf16.msra.mxu0 %v3890_v28  ;;  %v3910_v28 = vpack.c.bf16 %v593_v20, %v591_v19  ;;  %v284_v19 = vld [vmem:[#allocation6 + $0x2e8] sm:$0xff]  ;;  %v286_v20 = vld [vmem:[#allocation6 + $0x2f8] sm:$0xff] }
 0x1bb   :  { %3893 = vmatprep.subr.bf16.mxu0 %v3892_v30  ;;  %v3912_v30 = vpack.c.bf16 %v598_v22, %v596_v21  ;;  %v3600_v21 = vpack.c.bf16 %v286_v20, %v284_v19  ;;  %v283_v22 = vld [vmem:[#allocation6 + $0x2e0] sm:$0xff]  ;;  %v305_v19 = vld [vmem:[#allocation6 + $0x390] sm:$0xff] }
 0x1bc   :  { %3583 = vmatpush1.bf16.msra.mxu1 %v3582_v29  ;;  %v3602_v25 = vpack.c.bf16 %v285_v23, %v283_v22  ;;  %v620_v29 = vld [vmem:[#allocation6 + $0xd68] sm:$0xff]  ;;  %v635_v23 = vld [vmem:[#allocation6 + $0xde0] sm:$0xff] }
 0x1bd   :  { %1275 = vmatmul.mubr.f32.vlgmr.msra.gmra.mrb[0].mxu0 %v180_v40  ;;  %v3914_v40 = vpack.c.bf16 %v597_v32, %v595_v31  ;;  %3585 = vmatprep.subr.bf16.mxu1 %v3584_v37  ;;  %v288_v31 = vld [vmem:[#allocation6 + $0x308] sm:$0xff]  ;;  %v290_v32 = vld [vmem:[#allocation6 + $0x318] sm:$0xff]  ;;  %v3606_v37 = vpack.c.bf16 %v289_v35, %v287_v34  ;;  %v639_v35 = vld [vmem:[#allocation6 + $0xe00] sm:$0xff] }
 0x1be   :  { %3895 = vmatpush1.bf16.msra.mxu0 %v3894_v41  ;;  %1345 = vmatprep.mubr.f32.mxu0 %v183_v47  ;;  %v3586_v41 = vpack.c.bf16 %v269_v39, %v267_v38  ;;  %v272_v47 = vld [vmem:[#allocation6 + $0x288] sm:$0xff]  ;;  %v3604_v33 = vpack.c.bf16 %v290_v32, %v288_v31  ;;  %v619_v39 = vld [vmem:[#allocation6 + $0xd60] sm:$0xff]  ;;  %v309_v31 = vld [vmem:[#allocation6 + $0x3b0] sm:$0xff] }
 0x1bf   :  { %3897 = vmatprep.subr.bf16.mxu0 %v3896_v44  ;;  %v601_v44 = vld [vmem:[#allocation6 + $0xcd0] sm:$0xff]  ;;  %v3588_v49 = vpack.c.bf16 %v274_v48, %v272_v47 }
 0x1c0   :  { %3587 = vmatpush1.bf16.msra.mxu1 %v3586_v41  ;;  %v3918_v52 = vpack.c.bf16 %v601_v44, %v599_v43  ;;  %v624_v41 = vld [vmem:[#allocation6 + $0xd88] sm:$0xff]  ;;  %v294_v44 = vld [vmem:[#allocation6 + $0x338] sm:$0xff]  ;;  %v293_v47 = vld [vmem:[#allocation6 + $0x330] sm:$0xff] }
 0x1c1   :  { %3589 = vmatprep.subr.bf16.mxu1 %v3588_v49  ;;  %v292_v43 = vld [vmem:[#allocation6 + $0x328] sm:$0xff] }
 0x1c2   :  { %3899 = vmatpush1.bf16.msra.mxu0 %v3898_v54  ;;  %v3920_v54 = vpack.c.bf16 %v606_v46, %v604_v45  ;;  %v3608_v45 = vpack.c.bf16 %v294_v44, %v292_v43  ;;  %v291_v46 = vld [vmem:[#allocation6 + $0x320] sm:$0xff]  ;;  %v313_v43 = vld [vmem:[#allocation6 + $0x3d0] sm:$0xff]  ;;  %v182_v44 = vld [vmem:[#allocation3 + $0x60] sm:$0xff] }
 0x1c3   :  { %3901 = vmatprep.subr.bf16.mxu0 %v3900_v56  ;;  %v605_v56 = vld [vmem:[#allocation6 + $0xcf0] sm:$0xff]  ;;  %v3610_v49 = vpack.c.bf16 %v293_v47, %v291_v46  ;;  %v643_v46 = vld [vmem:[#allocation6 + $0xe20] sm:$0xff] }
 0x1c4   :  { %3591 = vmatpush1.bf16.msra.mxu1 %v3590_v53  ;;  %v3922_v0 = vpack.c.bf16 %v605_v56, %v603_v55  ;;  %v628_v53 = vld [vmem:[#allocation6 + $0xda8] sm:$0xff]  ;;  %v298_v56 = vld [vmem:[#allocation6 + $0x358] sm:$0xff] }
 0x1c5   :  { %3593 = vmatprep.subr.bf16.mxu1 %v3592_v61  ;;  %v296_v55 = vld [vmem:[#allocation6 + $0x348] sm:$0xff] }
 0x1c6   :  { %3903 = vmatpush1.bf16.msra.mxu0 %v3902_v2  ;;  %v3924_v2 = vpack.c.bf16 %v610_v58, %v608_v57  ;;  %v3612_v57 = vpack.c.bf16 %v298_v56, %v296_v55  ;;  %v295_v58 = vld [vmem:[#allocation6 + $0x340] sm:$0xff] }
 0x1c7   :  { %3905 = vmatprep.subr.bf16.mxu0 %v3904_v6  ;;  %v614_v6 = vld [vmem:[#allocation6 + $0xd38] sm:$0xff]  ;;  %v3614_v61 = vpack.c.bf16 %v297_v59, %v295_v58  ;;  %v315_v56 = vld [vmem:[#allocation6 + $0x3e0] sm:$0xff] }
 0x1c8   :  { %3595 = vmatpush1.bf16.msra.mxu1 %v3594_v1  ;;  %v3928_v14 = vpack.c.bf16 %v614_v6, %v612_v5  ;;  %v632_v1 = vld [vmem:[#allocation6 + $0xdc8] sm:$0xff]  ;;  %v3616_v5 = vpack.c.bf16 %v302_v4, %v300_v3  ;;  %v299_v6 = vld [vmem:[#allocation6 + $0x360] sm:$0xff] }
 0x1c9   :  { %3597 = vmatprep.subr.bf16.mxu1 %v3596_v9  ;;  %v3618_v9 = vpack.c.bf16 %v301_v7, %v299_v6  ;;  %v172_v3 = vld [vmem:[#allocation3 + $0x10] sm:$0xff]  ;;  %v653_v6 = vld [vmem:[#allocation6 + $0xe70] sm:$0xff] }
 0x1ca   :  { %3907 = vmatpush1.bf16.msra.mxu0 %v3906_v16  ;;  %v613_v16 = vld [vmem:[#allocation6 + $0xd30] sm:$0xff]  ;;  %v656_v7 = vld [vmem:[#allocation6 + $0xe88] sm:$0xff] }
 0x1cb   :  { %3909 = vmatprep.subr.bf16.mxu0 %v3908_v18  ;;  %v618_v18 = vld [vmem:[#allocation6 + $0xd58] sm:$0xff]  ;;  %v3930_v24 = vpack.c.bf16 %v613_v16, %v611_v15  ;;  %v304_v15 = vld [vmem:[#allocation6 + $0x388] sm:$0xff] }
 0x1cc   :  { %3599 = vmatpush1.bf16.msra.mxu1 %v3598_v13  ;;  %v3932_v26 = vpack.c.bf16 %v618_v18, %v616_v17  ;;  %v636_v13 = vld [vmem:[#allocation6 + $0xde8] sm:$0xff]  ;;  %v306_v16 = vld [vmem:[#allocation6 + $0x398] sm:$0xff]  ;;  %v303_v18 = vld [vmem:[#allocation6 + $0x380] sm:$0xff] }
 0x1cd   :  { %3601 = vmatprep.subr.bf16.mxu1 %v3600_v21  ;;  %v3620_v17 = vpack.c.bf16 %v306_v16, %v304_v15  ;;  %v3622_v21 = vpack.c.bf16 %v305_v19, %v303_v18  ;;  %v661_v18 = vld [vmem:[#allocation6 + $0xeb0] sm:$0xff]  ;;  %v664_v19 = vld [vmem:[#allocation6 + $0xec8] sm:$0xff] }
 0x1ce   :  { %3911 = vmatpush1.bf16.msra.mxu0 %v3910_v28  ;;  %v617_v28 = vld [vmem:[#allocation6 + $0xd50] sm:$0xff] }
 0x1cf   :  { %3913 = vmatprep.subr.bf16.mxu0 %v3912_v30  ;;  %v622_v30 = vld [vmem:[#allocation6 + $0xd78] sm:$0xff]  ;;  %v3934_v36 = vpack.c.bf16 %v617_v28, %v615_v27  ;;  %v308_v27 = vld [vmem:[#allocation6 + $0x3a8] sm:$0xff] }
 0x1d0   :  { %3603 = vmatpush1.bf16.msra.mxu1 %v3602_v25  ;;  %v3936_v38 = vpack.c.bf16 %v622_v30, %v620_v29  ;;  %v640_v25 = vld [vmem:[#allocation6 + $0xe08] sm:$0xff]  ;;  %v310_v28 = vld [vmem:[#allocation6 + $0x3b8] sm:$0xff]  ;;  %v307_v30 = vld [vmem:[#allocation6 + $0x3a0] sm:$0xff] }
 0x1d1   :  { %3605 = vmatprep.subr.bf16.mxu1 %v3604_v33  ;;  %v3624_v29 = vpack.c.bf16 %v310_v28, %v308_v27  ;;  %v3626_v33 = vpack.c.bf16 %v309_v31, %v307_v30  ;;  %v669_v30 = vld [vmem:[#allocation6 + $0xef0] sm:$0xff]  ;;  %v672_v31 = vld [vmem:[#allocation6 + $0xf08] sm:$0xff] }
 0x1d2   :  { %3915 = vmatpush1.bf16.msra.mxu0 %v3914_v40  ;;  %v621_v40 = vld [vmem:[#allocation6 + $0xd70] sm:$0xff] }
 0x1d3   :  { %3917 = vmatprep.subr.bf16.mxu0 %v3916_v42  ;;  %v626_v42 = vld [vmem:[#allocation6 + $0xd98] sm:$0xff]  ;;  %v3938_v48 = vpack.c.bf16 %v621_v40, %v619_v39  ;;  %v312_v39 = vld [vmem:[#allocation6 + $0x3c8] sm:$0xff] }
 0x1d4   :  { %3607 = vmatpush1.bf16.msra.mxu1 %v3606_v37  ;;  %v3940_v50 = vpack.c.bf16 %v626_v42, %v624_v41  ;;  %v644_v37 = vld [vmem:[#allocation6 + $0xe28] sm:$0xff]  ;;  %v314_v40 = vld [vmem:[#allocation6 + $0x3d8] sm:$0xff]  ;;  %v311_v42 = vld [vmem:[#allocation6 + $0x3c0] sm:$0xff] }
 0x1d5   :  { %3609 = vmatprep.subr.bf16.mxu1 %v3608_v45  ;;  %v3628_v41 = vpack.c.bf16 %v314_v40, %v312_v39  ;;  %v3630_v47 = vpack.c.bf16 %v313_v43, %v311_v42  ;;  %v677_v42 = vld [vmem:[#allocation6 + $0xf30] sm:$0xff]  ;;  %v680_v43 = vld [vmem:[#allocation6 + $0xf48] sm:$0xff] }
 0x1d6   :  { %3919 = vmatpush1.bf16.msra.mxu0 %v3918_v52  ;;  %v625_v52 = vld [vmem:[#allocation6 + $0xd90] sm:$0xff] }
 0x1d7   :  { %3921 = vmatprep.subr.bf16.mxu0 %v3920_v54  ;;  %v630_v54 = vld [vmem:[#allocation6 + $0xdb8] sm:$0xff]  ;;  %v3942_v60 = vpack.c.bf16 %v625_v52, %v623_v51  ;;  %v185_v51 = vld [vmem:[#allocation3 + $0x78] sm:$0xff] }
 0x1d8   :  { %3611 = vmatpush1.bf16.msra.mxu1 %v3610_v49  ;;  %v3944_v62 = vpack.c.bf16 %v630_v54, %v628_v53  ;;  %v645_v49 = vld [vmem:[#allocation6 + $0xe30] sm:$0xff]  ;;  %v650_v52 = vld [vmem:[#allocation6 + $0xe58] sm:$0xff]  ;;  %v316_v53 = vld [vmem:[#allocation6 + $0x3e8] sm:$0xff] }
 0x1d9   :  { %3613 = vmatprep.subr.bf16.mxu1 %v3612_v57  ;;  %v318_v54 = vld [vmem:[#allocation6 + $0x3f8] sm:$0xff]  ;;  %v317_v57 = vld [vmem:[#allocation6 + $0x3f0] sm:$0xff]  ;;  %v3962_v58 = vpack.c.bf16 %v645_v49, %v643_v46  ;;  %v684_v49 = vld [vmem:[#allocation6 + $0xf68] sm:$0xff] }
 0x1da   :  { %3923 = vmatpush1.bf16.msra.mxu0 %v3922_v0  ;;  %v629_v0 = vld [vmem:[#allocation6 + $0xdb0] sm:$0xff]  ;;  %v3632_v55 = vpack.c.bf16 %v318_v54, %v316_v53  ;;  %v3634_v59 = vpack.c.bf16 %v317_v57, %v315_v56  ;;  %v683_v53 = vld [vmem:[#allocation6 + $0xf60] sm:$0xff]  ;;  %v690_v56 = vld [vmem:[#allocation6 + $0xf98] sm:$0xff] }
 0x1db   :  { %3925 = vmatprep.subr.bf16.mxu0 %v3924_v2  ;;  %v634_v2 = vld [vmem:[#allocation6 + $0xdd8] sm:$0xff]  ;;  %v3946_v8 = vpack.c.bf16 %v629_v0, %v627_v63  ;;  %v652_v63 = vld [vmem:[#allocation6 + $0xe68] sm:$0xff]  ;;  %v685_v54 = vld [vmem:[#allocation6 + $0xf70] sm:$0xff] }
 0x1dc   :  { %3615 = vmatpush1.bf16.msra.mxu1 %v3614_v61  ;;  %v3948_v10 = vpack.c.bf16 %v634_v2, %v632_v1  ;;  %v647_v61 = vld [vmem:[#allocation6 + $0xe40] sm:$0xff]  ;;  %v654_v0 = vld [vmem:[#allocation6 + $0xe78] sm:$0xff]  ;;  %v173_v1 = vld [vmem:[#allocation3 + $0x18] sm:$0xff]  ;;  %v4002_v57 = vpack.c.bf16 %v685_v54, %v683_v53 }
 0x1dd   :  { %3617 = vmatprep.subr.bf16.mxu1 %v3616_v5  ;;  %990 = vmatprep.mubr.f32.mxu1 %v173_v1  ;;  %v3968_v4 = vpack.c.bf16 %v654_v0, %v652_v63  ;;  %v651_v5 = vld [vmem:[#allocation6 + $0xe60] sm:$0xff]  ;;  %v728_v53 = vld [vmem:[#allocation6 + $0x10c8] sm:$0xff]  ;;  %v730_v54 = vld [vmem:[#allocation6 + $0x10d8] sm:$0xff] }
 0x1de   :  { %3927 = vmatpush1.bf16.msra.mxu0 %v3926_v12  ;;  %v633_v12 = vld [vmem:[#allocation6 + $0xdd0] sm:$0xff]  ;;  %v691_v1 = vld [vmem:[#allocation6 + $0xfa0] sm:$0xff] }
 0x1df   :  { %3929 = vmatprep.subr.bf16.mxu0 %v3928_v14  ;;  %v638_v14 = vld [vmem:[#allocation6 + $0xdf8] sm:$0xff]  ;;  %v3950_v20 = vpack.c.bf16 %v633_v12, %v631_v11  ;;  %v655_v11 = vld [vmem:[#allocation6 + $0xe80] sm:$0xff]  ;;  %v657_v12 = vld [vmem:[#allocation6 + $0xe90] sm:$0xff] }
 0x1e0   :  { %3619 = vmatpush1.bf16.msra.mxu1 %v3618_v9  ;;  %v3952_v22 = vpack.c.bf16 %v638_v14, %v636_v13  ;;  %v3970_v9 = vpack.c.bf16 %v653_v6, %v651_v5  ;;  %v660_v13 = vld [vmem:[#allocation6 + $0xea8] sm:$0xff]  ;;  %v662_v14 = vld [vmem:[#allocation6 + $0xeb8] sm:$0xff]  ;;  %v3974_v15 = vpack.c.bf16 %v657_v12, %v655_v11 }
 0x1e1   :  { %3621 = vmatprep.subr.bf16.mxu1 %v3620_v17  ;;  %v3976_v16 = vpack.c.bf16 %v662_v14, %v660_v13  ;;  %v659_v17 = vld [vmem:[#allocation6 + $0xea0] sm:$0xff]  ;;  %v701_v14 = vld [vmem:[#allocation6 + $0xff0] sm:$0xff] }
 0x1e2   :  { %3931 = vmatpush1.bf16.msra.mxu0 %v3930_v24  ;;  %v637_v24 = vld [vmem:[#allocation6 + $0xdf0] sm:$0xff]  ;;  %v699_v13 = vld [vmem:[#allocation6 + $0xfe0] sm:$0xff] }
 0x1e3   :  { %3933 = vmatprep.subr.bf16.mxu0 %v3932_v26  ;;  %v642_v26 = vld [vmem:[#allocation6 + $0xe18] sm:$0xff]  ;;  %v3954_v32 = vpack.c.bf16 %v637_v24, %v635_v23  ;;  %v663_v23 = vld [vmem:[#allocation6 + $0xec0] sm:$0xff]  ;;  %v665_v24 = vld [vmem:[#allocation6 + $0xed0] sm:$0xff] }
 0x1e4   :  { %3623 = vmatpush1.bf16.msra.mxu1 %v3622_v21  ;;  %v3956_v34 = vpack.c.bf16 %v642_v26, %v640_v25  ;;  %v3978_v21 = vpack.c.bf16 %v661_v18, %v659_v17  ;;  %v668_v25 = vld [vmem:[#allocation6 + $0xee8] sm:$0xff]  ;;  %v670_v26 = vld [vmem:[#allocation6 + $0xef8] sm:$0xff]  ;;  %v3982_v27 = vpack.c.bf16 %v665_v24, %v663_v23  ;;  %v4018_v17 = vpack.c.bf16 %v701_v14, %v699_v13 }
 0x1e5   :  { %3625 = vmatprep.subr.bf16.mxu1 %v3624_v29  ;;  %v3984_v28 = vpack.c.bf16 %v670_v26, %v668_v25  ;;  %v667_v29 = vld [vmem:[#allocation6 + $0xee0] sm:$0xff]  ;;  %v184_v23 = vld [vmem:[#allocation3 + $0x70] sm:$0xff]  ;;  %v4895_v13 = vmov 0.0|0.0  }
 0x1e6   :  { %3935 = vmatpush1.bf16.msra.mxu0 %v3934_v36  ;;  %v641_v36 = vld [vmem:[#allocation6 + $0xe10] sm:$0xff]  ;;  %v707_v26 = vld [vmem:[#allocation6 + $0x1020] sm:$0xff] }
 0x1e7   :  { %3937 = vmatprep.subr.bf16.mxu0 %v3936_v38  ;;  %v646_v38 = vld [vmem:[#allocation6 + $0xe38] sm:$0xff]  ;;  %v3958_v45 = vpack.c.bf16 %v641_v36, %v639_v35  ;;  %v671_v35 = vld [vmem:[#allocation6 + $0xf00] sm:$0xff]  ;;  %v673_v36 = vld [vmem:[#allocation6 + $0xf10] sm:$0xff] }
 0x1e8   :  { %3627 = vmatpush1.bf16.msra.mxu1 %v3626_v33  ;;  %v3986_v33 = vpack.c.bf16 %v669_v30, %v667_v29  ;;  %v3990_v39 = vpack.c.bf16 %v673_v36, %v671_v35  ;;  %v712_v29 = vld [vmem:[#allocation6 + $0x1048] sm:$0xff]  ;;  %v714_v30 = vld [vmem:[#allocation6 + $0x1058] sm:$0xff] }
 0x1e9   :  { %3629 = vmatprep.subr.bf16.mxu1 %v3628_v41  ;;  %v675_v41 = vld [vmem:[#allocation6 + $0xf20] sm:$0xff]  ;;  %v716_v35 = vld [vmem:[#allocation6 + $0x1068] sm:$0xff]  ;;  %v718_v36 = vld [vmem:[#allocation6 + $0x1078] sm:$0xff] }
 0x1ea   :  { %3939 = vmatpush1.bf16.msra.mxu0 %v3938_v48  ;;  %v3960_v48 = vpack.c.bf16 %v646_v38, %v644_v37  ;;  %v676_v37 = vld [vmem:[#allocation6 + $0xf28] sm:$0xff]  ;;  %v678_v38 = vld [vmem:[#allocation6 + $0xf38] sm:$0xff] }
 0x1eb   :  { %3941 = vmatprep.subr.bf16.mxu0 %v3940_v50  ;;  %v648_v50 = vld [vmem:[#allocation6 + $0xe48] sm:$0xff]  ;;  %v3992_v40 = vpack.c.bf16 %v678_v38, %v676_v37  ;;  %v4032_v38 = vpack.c.bf16 %v718_v36, %v716_v35  ;;  %v747_v35 = vld [vmem:[#allocation6 + $0x1160] sm:$0xff]  ;;  %v749_v36 = vld [vmem:[#allocation6 + $0x1170] sm:$0xff] }
 0x1ec   :  { %3631 = vmatpush1.bf16.msra.mxu1 %v3630_v47  ;;  %v679_v47 = vld [vmem:[#allocation6 + $0xf40] sm:$0xff] }
 0x1ed   :  { %3633 = vmatprep.subr.bf16.mxu1 %v3632_v55  ;;  %v688_v55 = vld [vmem:[#allocation6 + $0xf88] sm:$0xff] }
 0x1ee   :  { %3943 = vmatpush1.bf16.msra.mxu0 %v3942_v60  ;;  %v3964_v60 = vpack.c.bf16 %v650_v52, %v648_v50  ;;  %v686_v50 = vld [vmem:[#allocation6 + $0xf78] sm:$0xff] }
 0x1ef   :  { %3945 = vmatprep.subr.bf16.mxu0 %v3944_v62  ;;  %v649_v62 = vld [vmem:[#allocation6 + $0xe50] sm:$0xff]  ;;  %v4000_v52 = vpack.c.bf16 %v686_v50, %v684_v49 }
 0x1f0   :  { %3635 = vmatpush1.bf16.msra.mxu1 %v3634_v59  ;;  %v3966_v2 = vpack.c.bf16 %v649_v62, %v647_v61  ;;  %v687_v59 = vld [vmem:[#allocation6 + $0xf80] sm:$0xff]  ;;  %v692_v61 = vld [vmem:[#allocation6 + $0xfa8] sm:$0xff]  ;;  %v694_v62 = vld [vmem:[#allocation6 + $0xfb8] sm:$0xff] }
 0x1f1   :  { %v4008_v0 = vpack.c.bf16 %v694_v62, %v692_v61  ;;  %4156 = vmatprep.subr.bf16.mxu1 %v4895_v13 }
 0x1f2   :  { %3947 = vmatpush1.bf16.msra.mxu0 %v3946_v8  ;;  %v658_v8 = vld [vmem:[#allocation6 + $0xe98] sm:$0xff] }
 0x1f3   :  { %3949 = vmatprep.subr.bf16.mxu0 %v3948_v10  ;;  %991 = vmatmul.mubr.f32.vlgmr.msra.gmra.mrb[0].mxu1 %v172_v3  ;;  %v3972_v10 = vpack.c.bf16 %v658_v8, %v656_v7  ;;  %v696_v3 = vld [vmem:[#allocation6 + $0xfc8] sm:$0xff]  ;;  %v695_v7 = vld [vmem:[#allocation6 + $0xfc0] sm:$0xff]  ;;  %v697_v8 = vld [vmem:[#allocation6 + $0xfd0] sm:$0xff] }
 0x1f4   :  { %v4014_v11 = vpack.c.bf16 %v697_v8, %v695_v7  ;;  %v740_v7 = vld [vmem:[#allocation6 + $0x1128] sm:$0xff]  ;;  %v742_v8 = vld [vmem:[#allocation6 + $0x1138] sm:$0xff] }
 0x1f6   :  { %3951 = vmatpush1.bf16.msra.mxu0 %v3950_v20  ;;  %v666_v20 = vld [vmem:[#allocation6 + $0xed8] sm:$0xff] }
 0x1f7   :  { %3953 = vmatprep.subr.bf16.mxu0 %v3952_v22  ;;  %v3980_v22 = vpack.c.bf16 %v666_v20, %v664_v19  ;;  %v703_v19 = vld [vmem:[#allocation6 + $0x1000] sm:$0xff]  ;;  %v705_v20 = vld [vmem:[#allocation6 + $0x1010] sm:$0xff] }
 0x1f8   :  { %v4022_v24 = vpack.c.bf16 %v705_v20, %v703_v19  ;;  %v744_v19 = vld [vmem:[#allocation6 + $0x1148] sm:$0xff]  ;;  %v746_v20 = vld [vmem:[#allocation6 + $0x1158] sm:$0xff] }
 0x1fa   :  { %3955 = vmatpush1.bf16.msra.mxu0 %v3954_v32  ;;  %v674_v32 = vld [vmem:[#allocation6 + $0xf18] sm:$0xff] }
 0x1fb   :  { %3957 = vmatprep.subr.bf16.mxu0 %v3956_v34  ;;  %v3988_v34 = vpack.c.bf16 %v674_v32, %v672_v31  ;;  %v4028_v32 = vpack.c.bf16 %v714_v30, %v712_v29  ;;  %v750_v29 = vld [vmem:[#allocation6 + $0x1178] sm:$0xff] }
 0x1fd   :  { %1346 = vmatmul.mubr.f32.vlgmr.msra.gmra.mrb[0].mxu0 %v182_v44  ;;  %v682_v44 = vld [vmem:[#allocation6 + $0xf58] sm:$0xff] }
 0x1fe   :  { %3959 = vmatpush1.bf16.msra.mxu0 %v3958_v45  ;;  %1416 = vmatprep.mubr.f32.mxu0 %v185_v51  ;;  %v3994_v45 = vpack.c.bf16 %v677_v42, %v675_v41  ;;  %v3996_v46 = vpack.c.bf16 %v682_v44, %v680_v43  ;;  %v720_v41 = vld [vmem:[#allocation6 + $0x1088] sm:$0xff]  ;;  %v722_v42 = vld [vmem:[#allocation6 + $0x1098] sm:$0xff] }
 0x1ff   :  { %3961 = vmatprep.subr.bf16.mxu0 %v3960_v48  ;;  %v681_v48 = vld [vmem:[#allocation6 + $0xf50] sm:$0xff]  ;;  %v4036_v44 = vpack.c.bf16 %v722_v42, %v720_v41  ;;  %v4066_v42 = vpack.c.bf16 %v749_v36, %v747_v35  ;;  %v782_v35 = vld [vmem:[#allocation6 + $0x1278] sm:$0xff] }
 0x200   :  { %v3998_v51 = vpack.c.bf16 %v681_v48, %v679_v47  ;;  %v724_v47 = vld [vmem:[#allocation6 + $0x10a8] sm:$0xff]  ;;  %v726_v48 = vld [vmem:[#allocation6 + $0x10b8] sm:$0xff] }
 0x201   :  { %v4040_v50 = vpack.c.bf16 %v726_v48, %v724_v47  ;;  %v1647_v41 = vld [vmem:[#allocation9 + $0x48] sm:$0xff]  ;;  %v758_v47 = vld [vmem:[#allocation6 + $0x11b8] sm:$0xff] }
 0x202   :  { %3963 = vmatpush1.bf16.msra.mxu0 %v3962_v58  ;;  %v4004_v58 = vpack.c.bf16 %v690_v56, %v688_v55  ;;  %v4044_v56 = vpack.c.bf16 %v730_v54, %v728_v53  ;;  %v755_v53 = vld [vmem:[#allocation6 + $0x11a0] sm:$0xff]  ;;  %v757_v54 = vld [vmem:[#allocation6 + $0x11b0] sm:$0xff] }
 0x203   :  { %3965 = vmatprep.subr.bf16.mxu0 %v3964_v60  ;;  %v689_v60 = vld [vmem:[#allocation6 + $0xf90] sm:$0xff] }
 0x204   :  { %v4006_v63 = vpack.c.bf16 %v689_v60, %v687_v59  ;;  %v732_v59 = vld [vmem:[#allocation6 + $0x10e8] sm:$0xff]  ;;  %v734_v60 = vld [vmem:[#allocation6 + $0x10f8] sm:$0xff] }
 0x205   :  { %v4048_v62 = vpack.c.bf16 %v734_v60, %v732_v59  ;;  %v1651_v59 = vld [vmem:[#allocation9 + $0x68] sm:$0xff]  ;;  %v4074_v60 = vpack.c.bf16 %v757_v54, %v755_v53  ;;  %v794_v53 = vld [vmem:[#allocation6 + $0x12d8] sm:$0xff] }
 0x206   :  { %3967 = vmatpush1.bf16.msra.mxu0 %v3966_v2  ;;  %v693_v2 = vld [vmem:[#allocation6 + $0xfb0] sm:$0xff] }
 0x207   :  { %3969 = vmatprep.subr.bf16.mxu0 %v3968_v4  ;;  %v698_v4 = vld [vmem:[#allocation6 + $0xfd8] sm:$0xff]  ;;  %v4010_v5 = vpack.c.bf16 %v693_v2, %v691_v1  ;;  %v736_v1 = vld [vmem:[#allocation6 + $0x1108] sm:$0xff] }
 0x208   :  { %v4012_v6 = vpack.c.bf16 %v698_v4, %v696_v3  ;;  %v738_v2 = vld [vmem:[#allocation6 + $0x1118] sm:$0xff] }
 0x209   :  { %v4052_v4 = vpack.c.bf16 %v738_v2, %v736_v1  ;;  %v766_v1 = vld [vmem:[#allocation6 + $0x11f8] sm:$0xff] }
 0x20a   :  { %3971 = vmatpush1.bf16.msra.mxu0 %v3970_v9  ;;  %v700_v9 = vld [vmem:[#allocation6 + $0xfe8] sm:$0xff] }
 0x20b   :  { %3973 = vmatprep.subr.bf16.mxu0 %v3972_v10  ;;  %v702_v10 = vld [vmem:[#allocation6 + $0xff8] sm:$0xff] }
 0x20c   :  { %v4016_v12 = vpack.c.bf16 %v702_v10, %v700_v9  ;;  %v1638_v9 = vld [vmem:[#allocation9] sm:$0xff]  ;;  %v1639_v10 = vld [vmem:[#allocation9 + $0x8] sm:$0xff] }
 0x20d   :  { %v4157_v14 = vpack.c.bf16 %v1639_v10, %v1638_v9  ;;  %v768_v9 = vld [vmem:[#allocation6 + $0x1208] sm:$0xff]  ;;  %v770_v10 = vld [vmem:[#allocation6 + $0x1218] sm:$0xff] }
 0x20e   :  { %3975 = vmatpush1.bf16.msra.mxu0 %v3974_v15  ;;  %v704_v15 = vld [vmem:[#allocation6 + $0x1008] sm:$0xff] }
 0x20f   :  { %3977 = vmatprep.subr.bf16.mxu0 %v3976_v16  ;;  %v706_v16 = vld [vmem:[#allocation6 + $0x1018] sm:$0xff]  ;;  %4158 = vmatpush1.bf16.msra.mxu1 %v4157_v14  ;;  %v1655_v14 = vld [vmem:[#allocation9 + $0x88] sm:$0xff] }
 0x210   :  { %v4020_v18 = vpack.c.bf16 %v706_v16, %v704_v15  ;;  %v1641_v15 = vld [vmem:[#allocation9 + $0x18] sm:$0xff]  ;;  %v4056_v16 = vpack.c.bf16 %v742_v8, %v740_v7  ;;  %4159 = vmatprep.subr.bf16.mxu1 %v4895_v13  ;;  %v765_v8 = vld [vmem:[#allocation6 + $0x11f0] sm:$0xff] }
 0x211   :  { %v763_v7 = vld [vmem:[#allocation6 + $0x11e0] sm:$0xff] }
 0x212   :  { %3979 = vmatpush1.bf16.msra.mxu0 %v3978_v21  ;;  %v708_v21 = vld [vmem:[#allocation6 + $0x1028] sm:$0xff] }
 0x213   :  { %3981 = vmatprep.subr.bf16.mxu0 %v3980_v22  ;;  %v710_v22 = vld [vmem:[#allocation6 + $0x1038] sm:$0xff] }
 0x214   :  { %v4024_v25 = vpack.c.bf16 %v710_v22, %v708_v21  ;;  %v1642_v22 = vld [vmem:[#allocation9 + $0x20] sm:$0xff] }
 0x216   :  { %3983 = vmatpush1.bf16.msra.mxu0 %v3982_v27  ;;  %v709_v27 = vld [vmem:[#allocation6 + $0x1030] sm:$0xff] }
 0x217   :  { %3985 = vmatprep.subr.bf16.mxu0 %v3984_v28  ;;  %v187_v28 = vld [vmem:[#allocation3 + $0x88] sm:$0xff]  ;;  %v4026_v31 = vpack.c.bf16 %v709_v27, %v707_v26  ;;  %v745_v27 = vld [vmem:[#allocation6 + $0x1150] sm:$0xff] }
 0x218   :  { %v743_v26 = vld [vmem:[#allocation6 + $0x1140] sm:$0xff] }
 0x21a   :  { %3987 = vmatpush1.bf16.msra.mxu0 %v3986_v33  ;;  %v711_v33 = vld [vmem:[#allocation6 + $0x1040] sm:$0xff] }
 0x21b   :  { %3989 = vmatprep.subr.bf16.mxu0 %v3988_v34  ;;  %v713_v34 = vld [vmem:[#allocation6 + $0x1050] sm:$0xff] }
 0x21c   :  { %v4030_v37 = vpack.c.bf16 %v713_v34, %v711_v33  ;;  %v4062_v33 = vpack.c.bf16 %v745_v27, %v743_v26  ;;  %v773_v26 = vld [vmem:[#allocation6 + $0x1230] sm:$0xff] }
 0x21d   :  { %v189_v27 = vld [vmem:[#allocation3 + $0x98] sm:$0xff] }
 0x21e   :  { %3991 = vmatpush1.bf16.msra.mxu0 %v3990_v39  ;;  %v715_v39 = vld [vmem:[#allocation6 + $0x1060] sm:$0xff] }
 0x21f   :  { %3993 = vmatprep.subr.bf16.mxu0 %v3992_v40  ;;  %v717_v40 = vld [vmem:[#allocation6 + $0x1070] sm:$0xff] }
 0x220   :  { %v4034_v43 = vpack.c.bf16 %v717_v40, %v715_v39  ;;  %v1646_v40 = vld [vmem:[#allocation9 + $0x40] sm:$0xff] }
 0x221   :  { %v4169_v48 = vpack.c.bf16 %v1647_v41, %v1646_v40  ;;  %v784_v40 = vld [vmem:[#allocation6 + $0x1288] sm:$0xff]  ;;  %v786_v41 = vld [vmem:[#allocation6 + $0x1298] sm:$0xff] }
 0x222   :  { %3995 = vmatpush1.bf16.msra.mxu0 %v3994_v45  ;;  %v719_v45 = vld [vmem:[#allocation6 + $0x1080] sm:$0xff] }
 0x223   :  { %3997 = vmatprep.subr.bf16.mxu0 %v3996_v46  ;;  %v721_v46 = vld [vmem:[#allocation6 + $0x1090] sm:$0xff] }
 0x224   :  { %v4038_v49 = vpack.c.bf16 %v721_v46, %v719_v45  ;;  %v753_v45 = vld [vmem:[#allocation6 + $0x1190] sm:$0xff]  ;;  %v756_v46 = vld [vmem:[#allocation6 + $0x11a8] sm:$0xff] }
 0x226   :  { %3999 = vmatpush1.bf16.msra.mxu0 %v3998_v51  ;;  %v723_v51 = vld [vmem:[#allocation6 + $0x10a0] sm:$0xff] }
 0x227   :  { %4001 = vmatprep.subr.bf16.mxu0 %v4000_v52  ;;  %v725_v52 = vld [vmem:[#allocation6 + $0x10b0] sm:$0xff] }
 0x228   :  { %v4042_v55 = vpack.c.bf16 %v725_v52, %v723_v51  ;;  %v4072_v52 = vpack.c.bf16 %v758_v47, %v756_v46  ;;  %v788_v46 = vld [vmem:[#allocation6 + $0x12a8] sm:$0xff]  ;;  %v790_v47 = vld [vmem:[#allocation6 + $0x12b8] sm:$0xff] }
 0x22a   :  { %4003 = vmatpush1.bf16.msra.mxu0 %v4002_v57  ;;  %v727_v57 = vld [vmem:[#allocation6 + $0x10c0] sm:$0xff] }
 0x22b   :  { %4005 = vmatprep.subr.bf16.mxu0 %v4004_v58  ;;  %v729_v58 = vld [vmem:[#allocation6 + $0x10d0] sm:$0xff] }
 0x22c   :  { %v4046_v61 = vpack.c.bf16 %v729_v58, %v727_v57  ;;  %v1650_v58 = vld [vmem:[#allocation9 + $0x60] sm:$0xff] }
 0x22d   :  { %v4175_v2 = vpack.c.bf16 %v1651_v59, %v1650_v58  ;;  %v796_v58 = vld [vmem:[#allocation6 + $0x12e8] sm:$0xff]  ;;  %v798_v59 = vld [vmem:[#allocation6 + $0x12f8] sm:$0xff] }
 0x22e   :  { %4007 = vmatpush1.bf16.msra.mxu0 %v4006_v63  ;;  %v731_v63 = vld [vmem:[#allocation6 + $0x10e0] sm:$0xff] }
 0x22f   :  { %4009 = vmatprep.subr.bf16.mxu0 %v4008_v0  ;;  %v733_v0 = vld [vmem:[#allocation6 + $0x10f0] sm:$0xff] }
 0x230   :  { %v4050_v3 = vpack.c.bf16 %v733_v0, %v731_v63  ;;  %v761_v63 = vld [vmem:[#allocation6 + $0x11d0] sm:$0xff]  ;;  %v764_v0 = vld [vmem:[#allocation6 + $0x11e8] sm:$0xff] }
 0x232   :  { %4011 = vmatpush1.bf16.msra.mxu0 %v4010_v5  ;;  %v735_v5 = vld [vmem:[#allocation6 + $0x1100] sm:$0xff] }
 0x233   :  { %4013 = vmatprep.subr.bf16.mxu0 %v4012_v6  ;;  %v737_v6 = vld [vmem:[#allocation6 + $0x1110] sm:$0xff] }
 0x236   :  { %4015 = vmatpush1.bf16.msra.mxu0 %v4014_v11  ;;  %v1640_v11 = vld [vmem:[#allocation9 + $0x10] sm:$0xff] }
 0x237   :  { %4017 = vmatprep.subr.bf16.mxu0 %v4016_v12  ;;  %v4054_v12 = vpack.c.bf16 %v737_v6, %v735_v5  ;;  %v4160_v21 = vpack.c.bf16 %v1641_v15, %v1640_v11  ;;  %v4080_v6 = vpack.c.bf16 %v766_v1, %v764_v0  ;;  %v4082_v15 = vpack.c.bf16 %v765_v8, %v763_v7  ;;  %v800_v0 = vld [vmem:[#allocation6 + $0x1308] sm:$0xff]  ;;  %v802_v1 = vld [vmem:[#allocation6 + $0x1318] sm:$0xff] }
 0x238   :  { %v806_v7 = vld [vmem:[#allocation6 + $0x1338] sm:$0xff] }
 0x239   :  { %4161 = vmatpush1.bf16.msra.mxu1 %v4160_v21 }
 0x23a   :  { %4019 = vmatpush1.bf16.msra.mxu0 %v4018_v17  ;;  %v739_v17 = vld [vmem:[#allocation6 + $0x1120] sm:$0xff]  ;;  %4162 = vmatprep.subr.bf16.mxu1 %v4895_v13 }
 0x23b   :  { %4021 = vmatprep.subr.bf16.mxu0 %v4020_v18  ;;  %v741_v18 = vld [vmem:[#allocation6 + $0x1130] sm:$0xff] }
 0x23d   :  { %1417 = vmatmul.mubr.f32.vlgmr.msra.gmra.mrb[0].mxu0 %v184_v23  ;;  %v1643_v23 = vld [vmem:[#allocation9 + $0x28] sm:$0xff] }
 0x23e   :  { %4023 = vmatpush1.bf16.msra.mxu0 %v4022_v24  ;;  %1487 = vmatprep.mubr.f32.mxu0 %v187_v28  ;;  %v4058_v24 = vpack.c.bf16 %v741_v18, %v739_v17  ;;  %v748_v28 = vld [vmem:[#allocation6 + $0x1168] sm:$0xff]  ;;  %v4163_v30 = vpack.c.bf16 %v1643_v23, %v1642_v22  ;;  %v767_v17 = vld [vmem:[#allocation6 + $0x1200] sm:$0xff]  ;;  %v769_v18 = vld [vmem:[#allocation6 + $0x1210] sm:$0xff] }
 0x23f   :  { %4025 = vmatprep.subr.bf16.mxu0 %v4024_v25  ;;  %v4060_v25 = vpack.c.bf16 %v746_v20, %v744_v19  ;;  %v4064_v34 = vpack.c.bf16 %v750_v29, %v748_v28  ;;  %v772_v19 = vld [vmem:[#allocation6 + $0x1228] sm:$0xff]  ;;  %v774_v20 = vld [vmem:[#allocation6 + $0x1238] sm:$0xff]  ;;  %v4086_v23 = vpack.c.bf16 %v769_v18, %v767_v17  ;;  %v807_v17 = vld [vmem:[#allocation6 + $0x1340] sm:$0xff] }
 0x240   :  { %4164 = vmatpush1.bf16.msra.mxu1 %v4163_v30  ;;  %v186_v22 = vld [vmem:[#allocation3 + $0x80] sm:$0xff]  ;;  %v776_v28 = vld [vmem:[#allocation6 + $0x1248] sm:$0xff]  ;;  %v809_v18 = vld [vmem:[#allocation6 + $0x1350] sm:$0xff] }
 0x241   :  { %4165 = vmatprep.subr.bf16.mxu1 %v4895_v13  ;;  %v778_v29 = vld [vmem:[#allocation6 + $0x1258] sm:$0xff] }
 0x242   :  { %4027 = vmatpush1.bf16.msra.mxu0 %v4026_v31  ;;  %v1644_v31 = vld [vmem:[#allocation9 + $0x30] sm:$0xff] }
 0x243   :  { %4029 = vmatprep.subr.bf16.mxu0 %v4028_v32  ;;  %v1645_v32 = vld [vmem:[#allocation9 + $0x38] sm:$0xff] }
 0x244   :  { %v4166_v39 = vpack.c.bf16 %v1645_v32, %v1644_v31  ;;  %v4092_v31 = vpack.c.bf16 %v778_v29, %v776_v28  ;;  %v775_v32 = vld [vmem:[#allocation6 + $0x1240] sm:$0xff] }
 0x245   :  { %v815_v29 = vld [vmem:[#allocation6 + $0x1380] sm:$0xff] }
 0x246   :  { %4031 = vmatpush1.bf16.msra.mxu0 %v4030_v37  ;;  %v752_v37 = vld [vmem:[#allocation6 + $0x1188] sm:$0xff]  ;;  %4167 = vmatpush1.bf16.msra.mxu1 %v4166_v39  ;;  %v781_v39 = vld [vmem:[#allocation6 + $0x1270] sm:$0xff] }
 0x247   :  { %4033 = vmatprep.subr.bf16.mxu0 %v4032_v38  ;;  %v754_v38 = vld [vmem:[#allocation6 + $0x1198] sm:$0xff]  ;;  %4168 = vmatprep.subr.bf16.mxu1 %v4895_v13 }
 0x24a   :  { %4035 = vmatpush1.bf16.msra.mxu0 %v4034_v43  ;;  %v4068_v43 = vpack.c.bf16 %v754_v38, %v752_v37  ;;  %4170 = vmatpush1.bf16.msra.mxu1 %v4169_v48  ;;  %v779_v38 = vld [vmem:[#allocation6 + $0x1260] sm:$0xff] }
 0x24b   :  { %4037 = vmatprep.subr.bf16.mxu0 %v4036_v44  ;;  %v751_v44 = vld [vmem:[#allocation6 + $0x1180] sm:$0xff]  ;;  %4171 = vmatprep.subr.bf16.mxu1 %v4895_v13 }
 0x24c   :  { %v4070_v51 = vpack.c.bf16 %v753_v45, %v751_v44  ;;  %v783_v44 = vld [vmem:[#allocation6 + $0x1280] sm:$0xff]  ;;  %v785_v45 = vld [vmem:[#allocation6 + $0x1290] sm:$0xff] }
 0x24d   :  { %v4102_v48 = vpack.c.bf16 %v785_v45, %v783_v44  ;;  %v830_v44 = vld [vmem:[#allocation6 + $0x13f8] sm:$0xff] }
 0x24e   :  { %4039 = vmatpush1.bf16.msra.mxu0 %v4038_v49  ;;  %v1648_v49 = vld [vmem:[#allocation9 + $0x50] sm:$0xff] }
 0x24f   :  { %4041 = vmatprep.subr.bf16.mxu0 %v4040_v50  ;;  %v1649_v50 = vld [vmem:[#allocation9 + $0x58] sm:$0xff] }
 0x250   :  { %v4172_v57 = vpack.c.bf16 %v1649_v50, %v1648_v49  ;;  %v4104_v49 = vpack.c.bf16 %v790_v47, %v788_v46  ;;  %v787_v50 = vld [vmem:[#allocation6 + $0x12a0] sm:$0xff] }
 0x251   :  { %v827_v47 = vld [vmem:[#allocation6 + $0x13e0] sm:$0xff] }
 0x252   :  { %4043 = vmatpush1.bf16.msra.mxu0 %v4042_v55  ;;  %v760_v55 = vld [vmem:[#allocation6 + $0x11c8] sm:$0xff]  ;;  %4173 = vmatpush1.bf16.msra.mxu1 %v4172_v57  ;;  %v793_v57 = vld [vmem:[#allocation6 + $0x12d0] sm:$0xff] }
 0x253   :  { %4045 = vmatprep.subr.bf16.mxu0 %v4044_v56  ;;  %v762_v56 = vld [vmem:[#allocation6 + $0x11d8] sm:$0xff]  ;;  %4174 = vmatprep.subr.bf16.mxu1 %v4895_v13 }
 0x256   :  { %4047 = vmatpush1.bf16.msra.mxu0 %v4046_v61  ;;  %v4076_v61 = vpack.c.bf16 %v762_v56, %v760_v55  ;;  %4176 = vmatpush1.bf16.msra.mxu1 %v4175_v2  ;;  %v791_v56 = vld [vmem:[#allocation6 + $0x12c0] sm:$0xff] }
 0x257   :  { %4049 = vmatprep.subr.bf16.mxu0 %v4048_v62  ;;  %v759_v62 = vld [vmem:[#allocation6 + $0x11c0] sm:$0xff]  ;;  %4177 = vmatprep.subr.bf16.mxu1 %v4895_v13 }
 0x258   :  { %v4078_v5 = vpack.c.bf16 %v761_v63, %v759_v62  ;;  %v795_v62 = vld [vmem:[#allocation6 + $0x12e0] sm:$0xff]  ;;  %v797_v63 = vld [vmem:[#allocation6 + $0x12f0] sm:$0xff] }
 0x259   :  { %v4114_v2 = vpack.c.bf16 %v797_v63, %v795_v62  ;;  %v4896_v63 = vmov 0.0  }
 0x25a   :  { %4051 = vmatpush1.bf16.msra.mxu0 %v4050_v3  ;;  %v1652_v3 = vld [vmem:[#allocation9 + $0x70] sm:$0xff] }
 0x25b   :  { %4053 = vmatprep.subr.bf16.mxu0 %v4052_v4  ;;  %v1653_v4 = vld [vmem:[#allocation9 + $0x78] sm:$0xff] }
 0x25c   :  { %v4178_v11 = vpack.c.bf16 %v1653_v4, %v1652_v3  ;;  %v4116_v3 = vpack.c.bf16 %v802_v1, %v800_v0  ;;  %v799_v4 = vld [vmem:[#allocation6 + $0x1300] sm:$0xff]  ;;  %v190_v0 = vld [vmem:[#allocation3 + $0xa0] sm:$0xff] }
 0x25e   :  { %4055 = vmatpush1.bf16.msra.mxu0 %v4054_v12  ;;  %v1654_v12 = vld [vmem:[#allocation9 + $0x80] sm:$0xff]  ;;  %4179 = vmatpush1.bf16.msra.mxu1 %v4178_v11  ;;  %v805_v11 = vld [vmem:[#allocation6 + $0x1330] sm:$0xff] }
 0x25f   :  { %4057 = vmatprep.subr.bf16.mxu0 %v4056_v16  ;;  %v4084_v16 = vpack.c.bf16 %v770_v10, %v768_v9  ;;  %v4181_v21 = vpack.c.bf16 %v1655_v14, %v1654_v12  ;;  %4180 = vmatprep.subr.bf16.mxu1 %v4895_v13  ;;  %v803_v10 = vld [vmem:[#allocation6 + $0x1320] sm:$0xff]  ;;  %v808_v12 = vld [vmem:[#allocation6 + $0x1348] sm:$0xff]  ;;  %v810_v14 = vld [vmem:[#allocation6 + $0x1358] sm:$0xff] }
 0x262   :  { %4059 = vmatpush1.bf16.msra.mxu0 %v4058_v24  ;;  %v4088_v24 = vpack.c.bf16 %v774_v20, %v772_v19  ;;  %4182 = vmatpush1.bf16.msra.mxu1 %v4181_v21  ;;  %v812_v19 = vld [vmem:[#allocation6 + $0x1368] sm:$0xff]  ;;  %v814_v20 = vld [vmem:[#allocation6 + $0x1378] sm:$0xff]  ;;  %v4126_v21 = vpack.c.bf16 %v809_v18, %v807_v17 }
 0x263   :  { %4061 = vmatprep.subr.bf16.mxu0 %v4060_v25  ;;  %v771_v25 = vld [vmem:[#allocation6 + $0x1220] sm:$0xff]  ;;  %4183 = vmatprep.subr.bf16.mxu1 %v4895_v13 }
 0x264   :  { %v4090_v30 = vpack.c.bf16 %v773_v26, %v771_v25  ;;  %v816_v25 = vld [vmem:[#allocation6 + $0x1388] sm:$0xff]  ;;  %v818_v26 = vld [vmem:[#allocation6 + $0x1398] sm:$0xff] }
 0x265   :  { %v4132_v28 = vpack.c.bf16 %v818_v26, %v816_v25  ;;  %v1776_v26 = vld [vmem:[#allocation12 + $0x90] sm:$0xff] }
 0x266   :  { %4063 = vmatpush1.bf16.msra.mxu0 %v4062_v33  ;;  %v777_v33 = vld [vmem:[#allocation6 + $0x1250] sm:$0xff] }
 0x267   :  { %4065 = vmatprep.subr.bf16.mxu0 %v4064_v34  ;;  %v780_v34 = vld [vmem:[#allocation6 + $0x1268] sm:$0xff]  ;;  %v4094_v36 = vpack.c.bf16 %v777_v33, %v775_v32  ;;  %v822_v32 = vld [vmem:[#allocation6 + $0x13b8] sm:$0xff] }
 0x268   :  { %v4096_v37 = vpack.c.bf16 %v782_v35, %v780_v34  ;;  %v819_v35 = vld [vmem:[#allocation6 + $0x13a0] sm:$0xff] }
 0x26a   :  { %4067 = vmatpush1.bf16.msra.mxu0 %v4066_v42  ;;  %v4098_v42 = vpack.c.bf16 %v781_v39, %v779_v38  ;;  %v826_v38 = vld [vmem:[#allocation6 + $0x13d8] sm:$0xff] }
 0x26b   :  { %4069 = vmatprep.subr.bf16.mxu0 %v4068_v43  ;;  %v4100_v43 = vpack.c.bf16 %v786_v41, %v784_v40  ;;  %v823_v41 = vld [vmem:[#allocation6 + $0x13c0] sm:$0xff] }
 0x26e   :  { %4071 = vmatpush1.bf16.msra.mxu0 %v4070_v51  ;;  %v789_v51 = vld [vmem:[#allocation6 + $0x12b0] sm:$0xff] }
 0x26f   :  { %4073 = vmatprep.subr.bf16.mxu0 %v4072_v52  ;;  %v792_v52 = vld [vmem:[#allocation6 + $0x12c8] sm:$0xff]  ;;  %v4106_v54 = vpack.c.bf16 %v789_v51, %v787_v50  ;;  %v834_v50 = vld [vmem:[#allocation6 + $0x1418] sm:$0xff] }
 0x270   :  { %v4108_v55 = vpack.c.bf16 %v794_v53, %v792_v52  ;;  %v831_v53 = vld [vmem:[#allocation6 + $0x1400] sm:$0xff] }
 0x272   :  { %4075 = vmatpush1.bf16.msra.mxu0 %v4074_v60  ;;  %v4110_v60 = vpack.c.bf16 %v793_v57, %v791_v56  ;;  %v838_v56 = vld [vmem:[#allocation6 + $0x1438] sm:$0xff]  ;;  %v188_v57 = vld [vmem:[#allocation3 + $0x90] sm:$0xff] }
 0x273   :  { %4077 = vmatprep.subr.bf16.mxu0 %v4076_v61  ;;  %v4112_v61 = vpack.c.bf16 %v798_v59, %v796_v58 }
 0x276   :  { %4079 = vmatpush1.bf16.msra.mxu0 %v4078_v5  ;;  %v801_v5 = vld [vmem:[#allocation6 + $0x1310] sm:$0xff] }
 0x277   :  { %4081 = vmatprep.subr.bf16.mxu0 %v4080_v6  ;;  %v804_v6 = vld [vmem:[#allocation6 + $0x1328] sm:$0xff]  ;;  %v4118_v8 = vpack.c.bf16 %v801_v5, %v799_v4  ;;  %v1657_v4 = vld [vmem:[#allocation9 + $0x98] sm:$0xff] }
 0x278   :  { %v4120_v9 = vpack.c.bf16 %v806_v7, %v804_v6  ;;  %v1774_v6 = vld [vmem:[#allocation12 + $0x80] sm:$0xff]  ;;  %v1775_v7 = vld [vmem:[#allocation12 + $0x88] sm:$0xff] }
 0x27a   :  { %4083 = vmatpush1.bf16.msra.mxu0 %v4082_v15  ;;  %v4122_v15 = vpack.c.bf16 %v805_v11, %v803_v10  ;;  %v841_v10 = vlaneseq }
 0x27b   :  { %4085 = vmatprep.subr.bf16.mxu0 %v4084_v16  ;;  %v4124_v16 = vpack.c.bf16 %v810_v14, %v808_v12  ;;  %v839_v14 = vld [vmem:[#allocation8] sm:$0x3] }
 0x27c   :  { %v842_v11 = vshrl.u32 %v841_v10, 7 }
 0x27d   :  { %1488 = vmatmul.mubr.f32.vlgmr.msra.gmra.mrb[0].mxu0 %v186_v22  ;;  %v4128_v22 = vpack.c.bf16 %v814_v20, %v812_v19 }
 0x27e   :  { %4087 = vmatpush1.bf16.msra.mxu0 %v4086_v23  ;;  %1558 = vmatprep.mubr.f32.mxu0 %v189_v27  ;;  %v811_v23 = vld [vmem:[#allocation6 + $0x1360] sm:$0xff]  ;;  %v843_v12 = vsub.s32 0, %v842_v11 }
 0x27f   :  { %4089 = vmatprep.subr.bf16.mxu0 %v4088_v24  ;;  %v813_v24 = vld [vmem:[#allocation6 + $0x1370] sm:$0xff] }
 0x280   :  { %v4130_v27 = vpack.c.bf16 %v813_v24, %v811_v23  ;;  %v1758_v23 = vld [vmem:[#allocation12] sm:$0xff]  ;;  %v1759_v24 = vld [vmem:[#allocation12 + $0x8] sm:$0xff] }
 0x282   :  { %4091 = vmatpush1.bf16.msra.mxu0 %v4090_v30  ;;  %v817_v30 = vld [vmem:[#allocation6 + $0x1390] sm:$0xff] }
 0x283   :  { %4093 = vmatprep.subr.bf16.mxu0 %v4092_v31  ;;  %v820_v31 = vld [vmem:[#allocation6 + $0x13a8] sm:$0xff]  ;;  %v4134_v33 = vpack.c.bf16 %v817_v30, %v815_v29  ;;  %v4188_v29 = vpack.c.bf16 %v1759_v24, %v1758_v23  ;;  %v4581_v23 = vld [vmem:[#allocation3] sm:$0xff] }
 0x284   :  { %v4136_v34 = vpack.c.bf16 %v822_v32, %v820_v31  ;;  %v1760_v32 = vld [vmem:[#allocation12 + $0x10] sm:$0xff] }
 0x286   :  { %4095 = vmatpush1.bf16.msra.mxu0 %v4094_v36  ;;  %v821_v36 = vld [vmem:[#allocation6 + $0x13b0] sm:$0xff] }
 0x287   :  { %4097 = vmatprep.subr.bf16.mxu0 %v4096_v37  ;;  %v824_v37 = vld [vmem:[#allocation6 + $0x13c8] sm:$0xff]  ;;  %v4138_v39 = vpack.c.bf16 %v821_v36, %v819_v35  ;;  %v1779_v35 = vld [vmem:[#allocation12 + $0xa8] sm:$0xff] }
 0x288   :  { %v4140_v40 = vpack.c.bf16 %v826_v38, %v824_v37  ;;  %v4580_v37 = vld [vmem:[#allocation3 + $0x8] sm:$0xff] }
 0x28a   :  { %4099 = vmatpush1.bf16.msra.mxu0 %v4098_v42  ;;  %v825_v42 = vld [vmem:[#allocation6 + $0x13d0] sm:$0xff] }
 0x28b   :  { %4101 = vmatprep.subr.bf16.mxu0 %v4100_v43  ;;  %v828_v43 = vld [vmem:[#allocation6 + $0x13e8] sm:$0xff]  ;;  %v4142_v45 = vpack.c.bf16 %v825_v42, %v823_v41  ;;  %v1780_v41 = vld [vmem:[#allocation12 + $0xb0] sm:$0xff] }
 0x28c   :  { %v4144_v46 = vpack.c.bf16 %v830_v44, %v828_v43  ;;  %v1781_v42 = vld [vmem:[#allocation12 + $0xb8] sm:$0xff] }
 0x28d   :  { %v4198_v44 = vpack.c.bf16 %v1781_v42, %v1780_v41  ;;  %v1816_v41 = vld [vmem:[#allocation12 + $0x1d0] sm:$0xff]  ;;  %v1817_v42 = vld [vmem:[#allocation12 + $0x1d8] sm:$0xff] }
 0x28e   :  { %4103 = vmatpush1.bf16.msra.mxu0 %v4102_v48  ;;  %v829_v48 = vld [vmem:[#allocation6 + $0x13f0] sm:$0xff] }
 0x28f   :  { %4105 = vmatprep.subr.bf16.mxu0 %v4104_v49  ;;  %v832_v49 = vld [vmem:[#allocation6 + $0x1408] sm:$0xff]  ;;  %v4146_v51 = vpack.c.bf16 %v829_v48, %v827_v47  ;;  %v1783_v48 = vld [vmem:[#allocation12 + $0xc8] sm:$0xff] }
 0x290   :  { %v4148_v52 = vpack.c.bf16 %v834_v50, %v832_v49  ;;  %v1782_v47 = vld [vmem:[#allocation12 + $0xc0] sm:$0xff] }
 0x291   :  { %v4202_v50 = vpack.c.bf16 %v1783_v48, %v1782_v47  ;;  %v1818_v47 = vld [vmem:[#allocation12 + $0x1e0] sm:$0xff]  ;;  %v1819_v48 = vld [vmem:[#allocation12 + $0x1e8] sm:$0xff] }
 0x292   :  { %4107 = vmatpush1.bf16.msra.mxu0 %v4106_v54  ;;  %v833_v54 = vld [vmem:[#allocation6 + $0x1410] sm:$0xff] }
 0x293   :  { %4109 = vmatprep.subr.bf16.mxu0 %v4108_v55  ;;  %v836_v55 = vld [vmem:[#allocation6 + $0x1428] sm:$0xff]  ;;  %v4150_v58 = vpack.c.bf16 %v833_v54, %v831_v53  ;;  %v1784_v53 = vld [vmem:[#allocation12 + $0xd0] sm:$0xff] }
 0x294   :  { %v4152_v59 = vpack.c.bf16 %v838_v56, %v836_v55  ;;  %v1785_v54 = vld [vmem:[#allocation12 + $0xd8] sm:$0xff] }
 0x295   :  { %v4206_v56 = vpack.c.bf16 %v1785_v54, %v1784_v53  ;;  %v1820_v53 = vld [vmem:[#allocation12 + $0x1f0] sm:$0xff]  ;;  %v1821_v54 = vld [vmem:[#allocation12 + $0x1f8] sm:$0xff] }
 0x296   :  { %4111 = vmatpush1.bf16.msra.mxu0 %v4110_v60  ;;  %v835_v60 = vld [vmem:[#allocation6 + $0x1420] sm:$0xff] }
 0x297   :  { %4113 = vmatprep.subr.bf16.mxu0 %v4112_v61  ;;  %v837_v61 = vld [vmem:[#allocation6 + $0x1430] sm:$0xff] }
 0x298   :  { %v4154_v62 = vpack.c.bf16 %v837_v61, %v835_v60  ;;  %v1787_v60 = vld [vmem:[#allocation12 + $0xe8] sm:$0xff] }
 0x29a   :  { %4115 = vmatpush1.bf16.msra.mxu0 %v4114_v2 }
 0x29b   :  { %4117 = vmatprep.subr.bf16.mxu0 %v4116_v3  ;;  %v1656_v3 = vld [vmem:[#allocation9 + $0x90] sm:$0xff] }
 0x29c   :  { %v4184_v5 = vpack.c.bf16 %v1657_v4, %v1656_v3  ;;  %v1789_v3 = vld [vmem:[#allocation12 + $0xf8] sm:$0xff] }
 0x29e   :  { %4119 = vmatpush1.bf16.msra.mxu0 %v4118_v8  ;;  %4185 = vmatpush1.bf16.msra.mxu1 %v4184_v5  ;;  %v1658_v8 = vld [vmem:[#allocation9 + $0xa0] sm:$0x3] }
 0x29f   :  { %4121 = vmatprep.subr.bf16.mxu0 %v4120_v9  ;;  %1714 = vmatprep.subr.mxu1 %v4896_v63  ;;  %v4186_v9 = vpack.c.bf16 %v1775_v7, %v1774_v6  ;;  %v1772_v6 = vld [vmem:[#allocation12 + $0x70] sm:$0xff]  ;;  %v1773_v7 = vld [vmem:[#allocation12 + $0x78] sm:$0xff] }
 0x2a0   :  { %v4216_v10 = vpack.c.bf16 %v1773_v7, %v1772_v6  ;;  %v1824_v6 = vld [vmem:[#allocation12 + $0x210] sm:$0xff]  ;;  %v1825_v7 = vld [vmem:[#allocation12 + $0x218] sm:$0xff] }
 0x2a2   :  { %4123 = vmatpush1.bf16.msra.mxu0 %v4122_v15  ;;  %3080 = vmatpush1.msk.msra.mxu1 %vm1670_vm1, %v1658_v8  ;;  %v847_v15 = vsub.s32 1, %v842_v11  ;;  %v1806_v8 = vld [vmem:[#allocation12 + $0x180] sm:$0xff] }
 0x2a3   :  { %4125 = vmatprep.subr.bf16.mxu0 %v4124_v16  ;;  %4187 = vmatprep.subr.bf16.mxu1 %v4186_v9  ;;  %v844_v16 = vrot.slane %v839_v14, %v843_v12  ;;  %v1807_v9 = vld [vmem:[#allocation12 + $0x188] sm:$0xff]  ;;  %v1790_v12 = vld [vmem:[#allocation12 + $0x100] sm:$0xff] }
 0x2a4   :  { %v848_v17 = vrot.slane %v839_v14, %v847_v15  ;;  %v4218_v11 = vpack.c.bf16 %v1807_v9, %v1806_v8  ;;  %v1791_v14 = vld [vmem:[#allocation12 + $0x108] sm:$0xff]  ;;  %v1808_v15 = vld [vmem:[#allocation12 + $0x190] sm:$0xff]  ;;  %v1842_v8 = vld [vmem:[#allocation12 + $0x2a0] sm:$0xff] }
 0x2a5   :  { %v1843_v9 = vld [vmem:[#allocation12 + $0x2a8] sm:$0xff] }
 0x2a6   :  { %4127 = vmatpush1.bf16.msra.mxu0 %v4126_v21 }
 0x2a7   :  { %4129 = vmatprep.subr.bf16.mxu0 %v4128_v22 }
 0x2aa   :  { %4131 = vmatpush1.bf16.msra.mxu0 %v4130_v27  ;;  %v1777_v27 = vld [vmem:[#allocation12 + $0x98] sm:$0xff] }
 0x2ab   :  { %4133 = vmatprep.subr.bf16.mxu0 %v4132_v28  ;;  %v4190_v31 = vpack.c.bf16 %v1777_v27, %v1776_v26  ;;  %v1794_v27 = vld [vmem:[#allocation12 + $0x120] sm:$0xff] }
 0x2ae   :  { %4135 = vmatpush1.bf16.msra.mxu0 %v4134_v33  ;;  %v1761_v33 = vld [vmem:[#allocation12 + $0x18] sm:$0xff] }
 0x2af   :  { %4137 = vmatprep.subr.bf16.mxu0 %v4136_v34  ;;  %v1778_v34 = vld [vmem:[#allocation12 + $0xa0] sm:$0xff]  ;;  %v4192_v36 = vpack.c.bf16 %v1761_v33, %v1760_v32  ;;  %v1796_v33 = vld [vmem:[#allocation12 + $0x130] sm:$0xff] }
 0x2b0   :  { %v4194_v38 = vpack.c.bf16 %v1779_v35, %v1778_v34  ;;  %v1797_v34 = vld [vmem:[#allocation12 + $0x138] sm:$0xff]  ;;  %v1814_v35 = vld [vmem:[#allocation12 + $0x1c0] sm:$0xff] }
 0x2b2   :  { %4139 = vmatpush1.bf16.msra.mxu0 %v4138_v39  ;;  %v1762_v39 = vld [vmem:[#allocation12 + $0x20] sm:$0xff] }
 0x2b3   :  { %4141 = vmatprep.subr.bf16.mxu0 %v4140_v40  ;;  %v1763_v40 = vld [vmem:[#allocation12 + $0x28] sm:$0xff] }
 0x2b4   :  { %v4196_v43 = vpack.c.bf16 %v1763_v40, %v1762_v39  ;;  %v1798_v39 = vld [vmem:[#allocation12 + $0x140] sm:$0xff]  ;;  %v1799_v40 = vld [vmem:[#allocation12 + $0x148] sm:$0xff] }
 0x2b6   :  { %4143 = vmatpush1.bf16.msra.mxu0 %v4142_v45  ;;  %v1764_v45 = vld [vmem:[#allocation12 + $0x30] sm:$0xff] }
 0x2b7   :  { %4145 = vmatprep.subr.bf16.mxu0 %v4144_v46  ;;  %v1765_v46 = vld [vmem:[#allocation12 + $0x38] sm:$0xff] }
 0x2b8   :  { %v4200_v49 = vpack.c.bf16 %v1765_v46, %v1764_v45  ;;  %v1800_v45 = vld [vmem:[#allocation12 + $0x150] sm:$0xff]  ;;  %v1801_v46 = vld [vmem:[#allocation12 + $0x158] sm:$0xff] }
 0x2ba   :  { %4147 = vmatpush1.bf16.msra.mxu0 %v4146_v51  ;;  %v1766_v51 = vld [vmem:[#allocation12 + $0x40] sm:$0xff] }
 0x2bb   :  { %4149 = vmatprep.subr.bf16.mxu0 %v4148_v52  ;;  %v1767_v52 = vld [vmem:[#allocation12 + $0x48] sm:$0xff] }
 0x2bc   :  { %v4204_v55 = vpack.c.bf16 %v1767_v52, %v1766_v51  ;;  %v1802_v51 = vld [vmem:[#allocation12 + $0x160] sm:$0xff]  ;;  %v1803_v52 = vld [vmem:[#allocation12 + $0x168] sm:$0xff] }
 0x2bd   :  { %1559 = vmatmul.mubr.f32.vlgmr.msra.gmra.mrb[0].mxu0 %v188_v57  ;;  %v1768_v57 = vld [vmem:[#allocation12 + $0x50] sm:$0xff] }
 0x2be   :  { %4151 = vmatpush1.bf16.msra.mxu0 %v4150_v58  ;;  %1629 = vmatprep.mubr.f32.mxu0 %v4896_v63  ;;  %v1769_v58 = vld [vmem:[#allocation12 + $0x58] sm:$0xff] }
 0x2bf   :  { %4153 = vmatprep.subr.bf16.mxu0 %v4152_v59  ;;  %v1786_v59 = vld [vmem:[#allocation12 + $0xe0] sm:$0xff]  ;;  %v4208_v61 = vpack.c.bf16 %v1769_v58, %v1768_v57  ;;  %v1804_v57 = vld [vmem:[#allocation12 + $0x170] sm:$0xff]  ;;  %v1805_v58 = vld [vmem:[#allocation12 + $0x178] sm:$0xff] }
 0x2c2   :  { %4155 = vmatpush1.bf16.msra.mxu0 %v4154_v62  ;;  %v4210_v62 = vpack.c.bf16 %v1787_v60, %v1786_v59  ;;  %v1838_v59 = vld [vmem:[#allocation12 + $0x280] sm:$0xff]  ;;  %v1839_v60 = vld [vmem:[#allocation12 + $0x288] sm:$0xff] }
 0x2c5   :  { %3078 = vmatmul.mubr.msk.f32.vlgmr.msra.gmra.mrb[0].mxu0 %vm851_vm0, %v190_v0  ;;  %v1770_v0 = vld [vmem:[#allocation12 + $0x60] sm:$0xff] }
 0x2c6   :  { %v992_v1 = vpop.f32.mrb[0].mxu1 }
 0x2c7   :  { %v994_v2 = vpop.f32.mrb[1].mxu1  ;;  %v4533_v18 = vadd.f32 %v992_v1, %v844_v16  ;;  %v1771_v1 = vld [vmem:[#allocation12 + $0x68] sm:$0xff]  ;;  %v1809_v16 = vld [vmem:[#allocation12 + $0x198] sm:$0xff] }
 0x2c8   :  { %v4535_v19 = vadd.f32 %v994_v2, %v848_v17  ;;  %v1788_v2 = vld [vmem:[#allocation12 + $0xf0] sm:$0xff]  ;;  %v4212_v4 = vpack.c.bf16 %v1771_v1, %v1770_v0  ;;  %v4220_v17 = vpack.c.bf16 %v1791_v14, %v1790_v12  ;;  %v1822_v0 = vld [vmem:[#allocation12 + $0x200] sm:$0xff]  ;;  %v1823_v1 = vld [vmem:[#allocation12 + $0x208] sm:$0xff]  ;;  %v4258_v14 = vpack.c.bf16 %v1843_v9, %v1842_v8 }
 0x2c9   :  { %v4214_v5 = vpack.c.bf16 %v1789_v3, %v1788_v2  ;;  %v1840_v2 = vld [vmem:[#allocation12 + $0x290] sm:$0xff]  ;;  %v1841_v3 = vld [vmem:[#allocation12 + $0x298] sm:$0xff] }
 0x2ca   :  { %v4584_v12 = vld [vmem:[#allocation3 + $0x28] sm:$0xff] }
 0x2cb   :  { %v1860_v8 = vld [vmem:[#allocation12 + $0x330] sm:$0xff]  ;;  %v1861_v9 = vld [vmem:[#allocation12 + $0x338] sm:$0xff] }
 0x398   :  { %v1631_v20 = vpop.f32.mrb[0].mxu0 }
 0x399   :  { %v4534_v21 = vadd.f32 %v4533_v18, %v1631_v20  ;;  %v1633_v22 = vpop.f32.mrb[1].mxu0  ;;  %v4222_v18 = vpack.c.bf16 %v1809_v16, %v1808_v15  ;;  %v1793_v20 = vld [vmem:[#allocation12 + $0x118] sm:$0xff]  ;;  %v1826_v15 = vld [vmem:[#allocation12 + $0x220] sm:$0xff]  ;;  %v1827_v16 = vld [vmem:[#allocation12 + $0x228] sm:$0xff] }
 0x39a   :  { %v4536_v25 = vadd.f32 %v4535_v19, %v1633_v22  ;;  %v1792_v19 = vld [vmem:[#allocation12 + $0x110] sm:$0xff]  ;;  %v1811_v22 = vld [vmem:[#allocation12 + $0x1a8] sm:$0xff] }
 0x39b   :  { %v1636_v30 = vmax.f32 %v4534_v21, 0.0  ;;  %v1810_v21 = vld [vmem:[#allocation12 + $0x1a0] sm:$0xff]  ;;  %v4224_v24 = vpack.c.bf16 %v1793_v20, %v1792_v19  ;;  %v4260_v19 = vpack.c.bf16 %v1827_v16, %v1826_v15  ;;  %v1863_v16 = vld [vmem:[#allocation12 + $0x348] sm:$0xff] }
 0x39c   :  { %v1637_v28 = vmax.f32 %v4536_v25, 0.0  ;;  %v4582_v25 = vld [vmem:[#allocation3 + $0x18] sm:$0xff]  ;;  %v4226_v26 = vpack.c.bf16 %v1811_v22, %v1810_v21  ;;  %v1828_v21 = vld [vmem:[#allocation12 + $0x230] sm:$0xff]  ;;  %v1829_v22 = vld [vmem:[#allocation12 + $0x238] sm:$0xff] }
 0x39d   :  { %v1862_v15 = vld [vmem:[#allocation12 + $0x340] sm:$0xff] }
 0x39e   :  { %3081 = vmatprep.mubr.msk.f32.mxu1 %vm1666_vm2, %v1637_v28  ;;  %v1795_v28 = vld [vmem:[#allocation12 + $0x128] sm:$0xff] }
 0x39f   :  { %1739 = vmatmul.mubr.f32.vlgmr.msra.gmra.mrb[2].mxu1 %v1636_v30  ;;  %v1813_v30 = vld [vmem:[#allocation12 + $0x1b8] sm:$0xff] }
 0x3a0   :  { %4189 = vmatpush3.bf16.msra.mxu1 %v4188_v29  ;;  %2153 = vmatprep.mubr.f32.mxu1 %v4580_v37  ;;  %v1812_v29 = vld [vmem:[#allocation12 + $0x1b0] sm:$0xff]  ;;  %v4232_v37 = vpack.c.bf16 %v1797_v34, %v1796_v33  ;;  %v1833_v34 = vld [vmem:[#allocation12 + $0x258] sm:$0xff] }
 0x3a1   :  { %4191 = vmatprep.subr.bf16.mxu1 %v4190_v31  ;;  %v4228_v31 = vpack.c.bf16 %v1795_v28, %v1794_v27  ;;  %v4230_v32 = vpack.c.bf16 %v1813_v30, %v1812_v29  ;;  %v1830_v27 = vld [vmem:[#allocation12 + $0x240] sm:$0xff]  ;;  %v1831_v28 = vld [vmem:[#allocation12 + $0x248] sm:$0xff]  ;;  %v1848_v29 = vld [vmem:[#allocation12 + $0x2d0] sm:$0xff] }
 0x3a2   :  { %v1849_v30 = vld [vmem:[#allocation12 + $0x2d8] sm:$0xff]  ;;  %v1832_v33 = vld [vmem:[#allocation12 + $0x250] sm:$0xff] }
 0x3a4   :  { %4193 = vmatpush3.bf16.msra.mxu1 %v4192_v36  ;;  %v1815_v36 = vld [vmem:[#allocation12 + $0x1c8] sm:$0xff] }
 0x3a5   :  { %4195 = vmatprep.subr.bf16.mxu1 %v4194_v38  ;;  %v4234_v38 = vpack.c.bf16 %v1815_v36, %v1814_v35  ;;  %v1850_v35 = vld [vmem:[#allocation12 + $0x2e0] sm:$0xff]  ;;  %v1851_v36 = vld [vmem:[#allocation12 + $0x2e8] sm:$0xff] }
 0x3a8   :  { %4197 = vmatpush3.bf16.msra.mxu1 %v4196_v43  ;;  %v4236_v43 = vpack.c.bf16 %v1799_v40, %v1798_v39  ;;  %v1834_v39 = vld [vmem:[#allocation12 + $0x260] sm:$0xff]  ;;  %v1835_v40 = vld [vmem:[#allocation12 + $0x268] sm:$0xff] }
 0x3a9   :  { %4199 = vmatprep.subr.bf16.mxu1 %v4198_v44  ;;  %v4238_v44 = vpack.c.bf16 %v1817_v42, %v1816_v41  ;;  %v1852_v41 = vld [vmem:[#allocation12 + $0x2f0] sm:$0xff]  ;;  %v1853_v42 = vld [vmem:[#allocation12 + $0x2f8] sm:$0xff] }
 0x3ac   :  { %4201 = vmatpush3.bf16.msra.mxu1 %v4200_v49  ;;  %v4240_v49 = vpack.c.bf16 %v1801_v46, %v1800_v45  ;;  %v1836_v45 = vld [vmem:[#allocation12 + $0x270] sm:$0xff]  ;;  %v1837_v46 = vld [vmem:[#allocation12 + $0x278] sm:$0xff] }
 0x3ad   :  { %4203 = vmatprep.subr.bf16.mxu1 %v4202_v50  ;;  %v4242_v50 = vpack.c.bf16 %v1819_v48, %v1818_v47  ;;  %v1870_v47 = vld [vmem:[#allocation12 + $0x380] sm:$0xff]  ;;  %v1871_v48 = vld [vmem:[#allocation12 + $0x388] sm:$0xff] }
 0x3b0   :  { %4205 = vmatpush3.bf16.msra.mxu1 %v4204_v55  ;;  %v4244_v55 = vpack.c.bf16 %v1803_v52, %v1802_v51  ;;  %v1854_v51 = vld [vmem:[#allocation12 + $0x300] sm:$0xff]  ;;  %v1855_v52 = vld [vmem:[#allocation12 + $0x308] sm:$0xff] }
 0x3b1   :  { %4207 = vmatprep.subr.bf16.mxu1 %v4206_v56  ;;  %v4246_v56 = vpack.c.bf16 %v1821_v54, %v1820_v53  ;;  %v1872_v53 = vld [vmem:[#allocation12 + $0x390] sm:$0xff]  ;;  %v1873_v54 = vld [vmem:[#allocation12 + $0x398] sm:$0xff] }
 0x3b4   :  { %4209 = vmatpush3.bf16.msra.mxu1 %v4208_v61  ;;  %v4248_v61 = vpack.c.bf16 %v1805_v58, %v1804_v57  ;;  %v1856_v57 = vld [vmem:[#allocation12 + $0x310] sm:$0xff]  ;;  %v1857_v58 = vld [vmem:[#allocation12 + $0x318] sm:$0xff] }
 0x3b5   :  { %4211 = vmatprep.subr.bf16.mxu1 %v4210_v62  ;;  %v4250_v62 = vpack.c.bf16 %v1839_v60, %v1838_v59  ;;  %v1874_v59 = vld [vmem:[#allocation12 + $0x3a0] sm:$0xff]  ;;  %v1875_v60 = vld [vmem:[#allocation12 + $0x3a8] sm:$0xff] }
 0x3b8   :  { %4213 = vmatpush3.bf16.msra.mxu1 %v4212_v4  ;;  %v4252_v4 = vpack.c.bf16 %v1823_v1, %v1822_v0  ;;  %v4586_v0 = vld [vmem:[#allocation3 + $0x38] sm:$0xff]  ;;  %v4290_v1 = vpack.c.bf16 %v1875_v60, %v1874_v59  ;;  %v1892_v59 = vld [vmem:[#allocation12 + $0x430] sm:$0xff]  ;;  %v1893_v60 = vld [vmem:[#allocation12 + $0x438] sm:$0xff] }
 0x3b9   :  { %4215 = vmatprep.subr.bf16.mxu1 %v4214_v5  ;;  %v4254_v5 = vpack.c.bf16 %v1841_v3, %v1840_v2  ;;  %v1858_v2 = vld [vmem:[#allocation12 + $0x320] sm:$0xff]  ;;  %v1859_v3 = vld [vmem:[#allocation12 + $0x328] sm:$0xff] }
 0x3bc   :  { %4217 = vmatpush3.bf16.msra.mxu1 %v4216_v10  ;;  %v4583_v10 = vld [vmem:[#allocation3 + $0x10] sm:$0xff] }
 0x3bd   :  { %4219 = vmatprep.subr.bf16.mxu1 %v4218_v11  ;;  %v4256_v11 = vpack.c.bf16 %v1825_v7, %v1824_v6  ;;  %v4292_v6 = vpack.c.bf16 %v1859_v3, %v1858_v2  ;;  %v1894_v2 = vld [vmem:[#allocation12 + $0x440] sm:$0xff]  ;;  %v1895_v3 = vld [vmem:[#allocation12 + $0x448] sm:$0xff] }
 0x3bf   :  { %2154 = vmatmul.mubr.f32.vlgmr.msra.gmra.mrb[4].mxu1 %v4581_v23  ;;  %v1846_v23 = vld [vmem:[#allocation12 + $0x2c0] sm:$0xff] }
 0x3c0   :  { %4221 = vmatpush3.bf16.msra.mxu1 %v4220_v17  ;;  %2223 = vmatprep.mubr.f32.mxu1 %v4582_v25  ;;  %v1844_v17 = vld [vmem:[#allocation12 + $0x2b0] sm:$0xff]  ;;  %v4264_v25 = vpack.c.bf16 %v1829_v22, %v1828_v21  ;;  %v1865_v22 = vld [vmem:[#allocation12 + $0x358] sm:$0xff] }
 0x3c1   :  { %4223 = vmatprep.subr.bf16.mxu1 %v4222_v18  ;;  %v1845_v18 = vld [vmem:[#allocation12 + $0x2b8] sm:$0xff]  ;;  %v1864_v21 = vld [vmem:[#allocation12 + $0x350] sm:$0xff] }
 0x3c2   :  { %v4262_v20 = vpack.c.bf16 %v1845_v18, %v1844_v17  ;;  %v1880_v17 = vld [vmem:[#allocation12 + $0x3d0] sm:$0xff]  ;;  %v1881_v18 = vld [vmem:[#allocation12 + $0x3d8] sm:$0xff] }
 0x3c4   :  { %4225 = vmatpush3.bf16.msra.mxu1 %v4224_v24  ;;  %v1847_v24 = vld [vmem:[#allocation12 + $0x2c8] sm:$0xff] }
 0x3c5   :  { %4227 = vmatprep.subr.bf16.mxu1 %v4226_v26  ;;  %v4266_v26 = vpack.c.bf16 %v1847_v24, %v1846_v23  ;;  %v1882_v23 = vld [vmem:[#allocation12 + $0x3e0] sm:$0xff]  ;;  %v1883_v24 = vld [vmem:[#allocation12 + $0x3e8] sm:$0xff] }
 0x3c8   :  { %4229 = vmatpush3.bf16.msra.mxu1 %v4228_v31  ;;  %v4268_v31 = vpack.c.bf16 %v1831_v28, %v1830_v27  ;;  %v1866_v27 = vld [vmem:[#allocation12 + $0x360] sm:$0xff]  ;;  %v1867_v28 = vld [vmem:[#allocation12 + $0x368] sm:$0xff] }
 0x3c9   :  { %4231 = vmatprep.subr.bf16.mxu1 %v4230_v32  ;;  %v4270_v32 = vpack.c.bf16 %v1849_v30, %v1848_v29  ;;  %v1884_v29 = vld [vmem:[#allocation12 + $0x3f0] sm:$0xff]  ;;  %v1885_v30 = vld [vmem:[#allocation12 + $0x3f8] sm:$0xff] }
 0x3cc   :  { %4233 = vmatpush3.bf16.msra.mxu1 %v4232_v37  ;;  %v4272_v37 = vpack.c.bf16 %v1833_v34, %v1832_v33  ;;  %v1868_v33 = vld [vmem:[#allocation12 + $0x370] sm:$0xff]  ;;  %v1869_v34 = vld [vmem:[#allocation12 + $0x378] sm:$0xff] }
 0x3cd   :  { %4235 = vmatprep.subr.bf16.mxu1 %v4234_v38  ;;  %v4274_v38 = vpack.c.bf16 %v1851_v36, %v1850_v35  ;;  %v1902_v35 = vld [vmem:[#allocation12 + $0x480] sm:$0xff]  ;;  %v1903_v36 = vld [vmem:[#allocation12 + $0x488] sm:$0xff] }
 0x3d0   :  { %4237 = vmatpush3.bf16.msra.mxu1 %v4236_v43  ;;  %v4276_v43 = vpack.c.bf16 %v1835_v40, %v1834_v39  ;;  %v1886_v39 = vld [vmem:[#allocation12 + $0x400] sm:$0xff]  ;;  %v1887_v40 = vld [vmem:[#allocation12 + $0x408] sm:$0xff] }
 0x3d1   :  { %4239 = vmatprep.subr.bf16.mxu1 %v4238_v44  ;;  %v4278_v44 = vpack.c.bf16 %v1853_v42, %v1852_v41  ;;  %v1904_v41 = vld [vmem:[#allocation12 + $0x490] sm:$0xff]  ;;  %v1905_v42 = vld [vmem:[#allocation12 + $0x498] sm:$0xff] }
 0x3d4   :  { %4241 = vmatpush3.bf16.msra.mxu1 %v4240_v49  ;;  %v4280_v49 = vpack.c.bf16 %v1837_v46, %v1836_v45  ;;  %v1888_v45 = vld [vmem:[#allocation12 + $0x410] sm:$0xff]  ;;  %v1889_v46 = vld [vmem:[#allocation12 + $0x418] sm:$0xff] }
 0x3d5   :  { %4243 = vmatprep.subr.bf16.mxu1 %v4242_v50  ;;  %v4282_v50 = vpack.c.bf16 %v1871_v48, %v1870_v47  ;;  %v1906_v47 = vld [vmem:[#allocation12 + $0x4a0] sm:$0xff]  ;;  %v1907_v48 = vld [vmem:[#allocation12 + $0x4a8] sm:$0xff] }
 0x3d8   :  { %4245 = vmatpush3.bf16.msra.mxu1 %v4244_v55  ;;  %v4284_v55 = vpack.c.bf16 %v1855_v52, %v1854_v51  ;;  %v4588_v51 = vld [vmem:[#allocation3 + $0x48] sm:$0xff]  ;;  %v4322_v52 = vpack.c.bf16 %v1907_v48, %v1906_v47 }
 0x3d9   :  { %4247 = vmatprep.subr.bf16.mxu1 %v4246_v56  ;;  %v4286_v56 = vpack.c.bf16 %v1873_v54, %v1872_v53  ;;  %v1890_v53 = vld [vmem:[#allocation12 + $0x420] sm:$0xff]  ;;  %v1891_v54 = vld [vmem:[#allocation12 + $0x428] sm:$0xff]  ;;  %v1924_v47 = vld [vmem:[#allocation12 + $0x530] sm:$0xff] }
 0x3da   :  { %v1925_v48 = vld [vmem:[#allocation12 + $0x538] sm:$0xff] }
 0x3dc   :  { %4249 = vmatpush3.bf16.msra.mxu1 %v4248_v61  ;;  %v4585_v61 = vld [vmem:[#allocation3 + $0x20] sm:$0xff] }
 0x3dd   :  { %4251 = vmatprep.subr.bf16.mxu1 %v4250_v62  ;;  %v4288_v62 = vpack.c.bf16 %v1857_v58, %v1856_v57  ;;  %v4324_v57 = vpack.c.bf16 %v1891_v54, %v1890_v53  ;;  %v1926_v53 = vld [vmem:[#allocation12 + $0x540] sm:$0xff]  ;;  %v1927_v54 = vld [vmem:[#allocation12 + $0x548] sm:$0xff] }
 0x3df   :  { %2224 = vmatmul.mubr.f32.vlgmr.msra.gmra.mrb[6].mxu1 %v4583_v10  ;;  %v1878_v10 = vld [vmem:[#allocation12 + $0x3c0] sm:$0xff] }
 0x3e0   :  { %4253 = vmatpush3.bf16.msra.mxu1 %v4252_v4  ;;  %2293 = vmatprep.mubr.f32.mxu1 %v4584_v12  ;;  %v1876_v4 = vld [vmem:[#allocation12 + $0x3b0] sm:$0xff]  ;;  %v4296_v12 = vpack.c.bf16 %v1861_v9, %v1860_v8  ;;  %v1897_v9 = vld [vmem:[#allocation12 + $0x458] sm:$0xff] }
 0x3e1   :  { %4255 = vmatprep.subr.bf16.mxu1 %v4254_v5  ;;  %v1877_v5 = vld [vmem:[#allocation12 + $0x3b8] sm:$0xff]  ;;  %v1896_v8 = vld [vmem:[#allocation12 + $0x450] sm:$0xff] }
 0x3e2   :  { %v4294_v7 = vpack.c.bf16 %v1877_v5, %v1876_v4  ;;  %v1912_v4 = vld [vmem:[#allocation12 + $0x4d0] sm:$0xff]  ;;  %v1913_v5 = vld [vmem:[#allocation12 + $0x4d8] sm:$0xff] }
 0x3e4   :  { %4257 = vmatpush3.bf16.msra.mxu1 %v4256_v11  ;;  %v1879_v11 = vld [vmem:[#allocation12 + $0x3c8] sm:$0xff] }
 0x3e5   :  { %4259 = vmatprep.subr.bf16.mxu1 %v4258_v14  ;;  %v4298_v14 = vpack.c.bf16 %v1879_v11, %v1878_v10  ;;  %v1914_v10 = vld [vmem:[#allocation12 + $0x4e0] sm:$0xff]  ;;  %v1915_v11 = vld [vmem:[#allocation12 + $0x4e8] sm:$0xff] }
 0x3e8   :  { %4261 = vmatpush3.bf16.msra.mxu1 %v4260_v19  ;;  %v4300_v19 = vpack.c.bf16 %v1863_v16, %v1862_v15  ;;  %v1898_v15 = vld [vmem:[#allocation12 + $0x460] sm:$0xff]  ;;  %v1899_v16 = vld [vmem:[#allocation12 + $0x468] sm:$0xff] }
 0x3e9   :  { %4263 = vmatprep.subr.bf16.mxu1 %v4262_v20  ;;  %v4302_v20 = vpack.c.bf16 %v1881_v18, %v1880_v17  ;;  %v1916_v17 = vld [vmem:[#allocation12 + $0x4f0] sm:$0xff]  ;;  %v1917_v18 = vld [vmem:[#allocation12 + $0x4f8] sm:$0xff] }
 0x3ec   :  { %4265 = vmatpush3.bf16.msra.mxu1 %v4264_v25  ;;  %v4304_v25 = vpack.c.bf16 %v1865_v22, %v1864_v21  ;;  %v1900_v21 = vld [vmem:[#allocation12 + $0x470] sm:$0xff]  ;;  %v1901_v22 = vld [vmem:[#allocation12 + $0x478] sm:$0xff] }
 0x3ed   :  { %4267 = vmatprep.subr.bf16.mxu1 %v4266_v26  ;;  %v4306_v26 = vpack.c.bf16 %v1883_v24, %v1882_v23  ;;  %v1934_v23 = vld [vmem:[#allocation12 + $0x580] sm:$0xff]  ;;  %v1935_v24 = vld [vmem:[#allocation12 + $0x588] sm:$0xff] }
 0x3f0   :  { %4269 = vmatpush3.bf16.msra.mxu1 %v4268_v31  ;;  %v4308_v31 = vpack.c.bf16 %v1867_v28, %v1866_v27  ;;  %v1918_v27 = vld [vmem:[#allocation12 + $0x500] sm:$0xff]  ;;  %v1919_v28 = vld [vmem:[#allocation12 + $0x508] sm:$0xff] }
 0x3f1   :  { %4271 = vmatprep.subr.bf16.mxu1 %v4270_v32  ;;  %v4310_v32 = vpack.c.bf16 %v1885_v30, %v1884_v29  ;;  %v1936_v29 = vld [vmem:[#allocation12 + $0x590] sm:$0xff]  ;;  %v1937_v30 = vld [vmem:[#allocation12 + $0x598] sm:$0xff] }
 0x3f4   :  { %4273 = vmatpush3.bf16.msra.mxu1 %v4272_v37  ;;  %v4312_v37 = vpack.c.bf16 %v1869_v34, %v1868_v33  ;;  %v1920_v33 = vld [vmem:[#allocation12 + $0x510] sm:$0xff]  ;;  %v1921_v34 = vld [vmem:[#allocation12 + $0x518] sm:$0xff] }
 0x3f5   :  { %4275 = vmatprep.subr.bf16.mxu1 %v4274_v38  ;;  %v4314_v38 = vpack.c.bf16 %v1903_v36, %v1902_v35  ;;  %v1938_v35 = vld [vmem:[#allocation12 + $0x5a0] sm:$0xff]  ;;  %v1939_v36 = vld [vmem:[#allocation12 + $0x5a8] sm:$0xff] }
 0x3f8   :  { %4277 = vmatpush3.bf16.msra.mxu1 %v4276_v43  ;;  %v4316_v43 = vpack.c.bf16 %v1887_v40, %v1886_v39  ;;  %v4590_v39 = vld [vmem:[#allocation3 + $0x58] sm:$0xff]  ;;  %v4354_v40 = vpack.c.bf16 %v1939_v36, %v1938_v35  ;;  %v1956_v35 = vld [vmem:[#allocation12 + $0x630] sm:$0xff]  ;;  %v1957_v36 = vld [vmem:[#allocation12 + $0x638] sm:$0xff] }
 0x3f9   :  { %4279 = vmatprep.subr.bf16.mxu1 %v4278_v44  ;;  %v4318_v44 = vpack.c.bf16 %v1905_v42, %v1904_v41  ;;  %v1922_v41 = vld [vmem:[#allocation12 + $0x520] sm:$0xff]  ;;  %v1923_v42 = vld [vmem:[#allocation12 + $0x528] sm:$0xff] }
 0x3fc   :  { %4281 = vmatpush3.bf16.msra.mxu1 %v4280_v49  ;;  %v4587_v49 = vld [vmem:[#allocation3 + $0x30] sm:$0xff] }
 0x3fd   :  { %4283 = vmatprep.subr.bf16.mxu1 %v4282_v50  ;;  %v4320_v50 = vpack.c.bf16 %v1889_v46, %v1888_v45  ;;  %v4356_v45 = vpack.c.bf16 %v1923_v42, %v1922_v41  ;;  %v1958_v41 = vld [vmem:[#allocation12 + $0x640] sm:$0xff]  ;;  %v1959_v42 = vld [vmem:[#allocation12 + $0x648] sm:$0xff] }
 0x3ff   :  { %2294 = vmatmul.mubr.f32.vlgmr.msra.gmra.mrb[8].mxu1 %v4585_v61  ;;  %v1910_v61 = vld [vmem:[#allocation12 + $0x4c0] sm:$0xff] }
 0x400   :  { %4285 = vmatpush3.bf16.msra.mxu1 %v4284_v55  ;;  %2363 = vmatprep.mubr.f32.mxu1 %v4586_v0  ;;  %v1908_v55 = vld [vmem:[#allocation12 + $0x4b0] sm:$0xff]  ;;  %v4328_v0 = vpack.c.bf16 %v1893_v60, %v1892_v59  ;;  %v1929_v60 = vld [vmem:[#allocation12 + $0x558] sm:$0xff] }
 0x401   :  { %4287 = vmatprep.subr.bf16.mxu1 %v4286_v56  ;;  %v1909_v56 = vld [vmem:[#allocation12 + $0x4b8] sm:$0xff]  ;;  %v1928_v59 = vld [vmem:[#allocation12 + $0x550] sm:$0xff] }
 0x402   :  { %v4326_v58 = vpack.c.bf16 %v1909_v56, %v1908_v55  ;;  %v1944_v55 = vld [vmem:[#allocation12 + $0x5d0] sm:$0xff]  ;;  %v1945_v56 = vld [vmem:[#allocation12 + $0x5d8] sm:$0xff] }
 0x404   :  { %4289 = vmatpush3.bf16.msra.mxu1 %v4288_v62  ;;  %v1911_v62 = vld [vmem:[#allocation12 + $0x4c8] sm:$0xff] }
 0x405   :  { %4291 = vmatprep.subr.bf16.mxu1 %v4290_v1  ;;  %v4330_v1 = vpack.c.bf16 %v1911_v62, %v1910_v61  ;;  %v1946_v61 = vld [vmem:[#allocation12 + $0x5e0] sm:$0xff]  ;;  %v1947_v62 = vld [vmem:[#allocation12 + $0x5e8] sm:$0xff] }
 0x408   :  { %4293 = vmatpush3.bf16.msra.mxu1 %v4292_v6  ;;  %v4332_v6 = vpack.c.bf16 %v1895_v3, %v1894_v2  ;;  %v1930_v2 = vld [vmem:[#allocation12 + $0x560] sm:$0xff]  ;;  %v1931_v3 = vld [vmem:[#allocation12 + $0x568] sm:$0xff] }
 0x409   :  { %4295 = vmatprep.subr.bf16.mxu1 %v4294_v7  ;;  %v4334_v7 = vpack.c.bf16 %v1913_v5, %v1912_v4  ;;  %v1948_v4 = vld [vmem:[#allocation12 + $0x5f0] sm:$0xff]  ;;  %v1949_v5 = vld [vmem:[#allocation12 + $0x5f8] sm:$0xff] }
 0x40c   :  { %4297 = vmatpush3.bf16.msra.mxu1 %v4296_v12  ;;  %v4336_v12 = vpack.c.bf16 %v1897_v9, %v1896_v8  ;;  %v1932_v8 = vld [vmem:[#allocation12 + $0x570] sm:$0xff]  ;;  %v1933_v9 = vld [vmem:[#allocation12 + $0x578] sm:$0xff] }
 0x40d   :  { %4299 = vmatprep.subr.bf16.mxu1 %v4298_v14  ;;  %v4338_v14 = vpack.c.bf16 %v1915_v11, %v1914_v10  ;;  %v1966_v10 = vld [vmem:[#allocation12 + $0x680] sm:$0xff]  ;;  %v1967_v11 = vld [vmem:[#allocation12 + $0x688] sm:$0xff] }
 0x410   :  { %4301 = vmatpush3.bf16.msra.mxu1 %v4300_v19  ;;  %v4340_v19 = vpack.c.bf16 %v1899_v16, %v1898_v15  ;;  %v1950_v15 = vld [vmem:[#allocation12 + $0x600] sm:$0xff]  ;;  %v1951_v16 = vld [vmem:[#allocation12 + $0x608] sm:$0xff] }
 0x411   :  { %4303 = vmatprep.subr.bf16.mxu1 %v4302_v20  ;;  %v4342_v20 = vpack.c.bf16 %v1917_v18, %v1916_v17  ;;  %v1968_v17 = vld [vmem:[#allocation12 + $0x690] sm:$0xff]  ;;  %v1969_v18 = vld [vmem:[#allocation12 + $0x698] sm:$0xff] }
 0x414   :  { %4305 = vmatpush3.bf16.msra.mxu1 %v4304_v25  ;;  %v4344_v25 = vpack.c.bf16 %v1901_v22, %v1900_v21  ;;  %v1952_v21 = vld [vmem:[#allocation12 + $0x610] sm:$0xff]  ;;  %v1953_v22 = vld [vmem:[#allocation12 + $0x618] sm:$0xff] }
 0x415   :  { %4307 = vmatprep.subr.bf16.mxu1 %v4306_v26  ;;  %v4346_v26 = vpack.c.bf16 %v1935_v24, %v1934_v23  ;;  %v1970_v23 = vld [vmem:[#allocation12 + $0x6a0] sm:$0xff]  ;;  %v1971_v24 = vld [vmem:[#allocation12 + $0x6a8] sm:$0xff] }
 0x418   :  { %4309 = vmatpush3.bf16.msra.mxu1 %v4308_v31  ;;  %v4348_v31 = vpack.c.bf16 %v1919_v28, %v1918_v27  ;;  %v4592_v27 = vld [vmem:[#allocation3 + $0x68] sm:$0xff]  ;;  %v4386_v28 = vpack.c.bf16 %v1971_v24, %v1970_v23  ;;  %v1987_v23 = vld [vmem:[#allocation12 + $0x728] sm:$0xff] }
 0x419   :  { %4311 = vmatprep.subr.bf16.mxu1 %v4310_v32  ;;  %v4350_v32 = vpack.c.bf16 %v1937_v30, %v1936_v29  ;;  %v1954_v29 = vld [vmem:[#allocation12 + $0x620] sm:$0xff]  ;;  %v1955_v30 = vld [vmem:[#allocation12 + $0x628] sm:$0xff]  ;;  %v2004_v24 = vld [vmem:[#allocation12 + $0x7b0] sm:$0xff] }
 0x41c   :  { %4313 = vmatpush3.bf16.msra.mxu1 %v4312_v37  ;;  %v4589_v37 = vld [vmem:[#allocation3 + $0x40] sm:$0xff] }
 0x41d   :  { %4315 = vmatprep.subr.bf16.mxu1 %v4314_v38  ;;  %v4352_v38 = vpack.c.bf16 %v1921_v34, %v1920_v33  ;;  %v4388_v33 = vpack.c.bf16 %v1955_v30, %v1954_v29  ;;  %v1989_v29 = vld [vmem:[#allocation12 + $0x738] sm:$0xff]  ;;  %v2006_v30 = vld [vmem:[#allocation12 + $0x7c0] sm:$0xff] }
 0x41f   :  { %2364 = vmatmul.mubr.f32.vlgmr.msra.gmra.mrb[10].mxu1 %v4587_v49  ;;  %v1942_v49 = vld [vmem:[#allocation12 + $0x5c0] sm:$0xff] }
 0x420   :  { %4317 = vmatpush3.bf16.msra.mxu1 %v4316_v43  ;;  %2433 = vmatprep.mubr.f32.mxu1 %v4588_v51  ;;  %v1940_v43 = vld [vmem:[#allocation12 + $0x5b0] sm:$0xff]  ;;  %v4360_v51 = vpack.c.bf16 %v1925_v48, %v1924_v47  ;;  %v1961_v48 = vld [vmem:[#allocation12 + $0x658] sm:$0xff] }
 0x421   :  { %4319 = vmatprep.subr.bf16.mxu1 %v4318_v44  ;;  %v1941_v44 = vld [vmem:[#allocation12 + $0x5b8] sm:$0xff]  ;;  %v1960_v47 = vld [vmem:[#allocation12 + $0x650] sm:$0xff] }
 0x422   :  { %v4358_v46 = vpack.c.bf16 %v1941_v44, %v1940_v43  ;;  %v1976_v43 = vld [vmem:[#allocation12 + $0x6d0] sm:$0xff]  ;;  %v1977_v44 = vld [vmem:[#allocation12 + $0x6d8] sm:$0xff] }
 0x424   :  { %4321 = vmatpush3.bf16.msra.mxu1 %v4320_v50  ;;  %v1943_v50 = vld [vmem:[#allocation12 + $0x5c8] sm:$0xff] }
 0x425   :  { %4323 = vmatprep.subr.bf16.mxu1 %v4322_v52  ;;  %v4362_v52 = vpack.c.bf16 %v1943_v50, %v1942_v49  ;;  %v1978_v49 = vld [vmem:[#allocation12 + $0x6e0] sm:$0xff]  ;;  %v1979_v50 = vld [vmem:[#allocation12 + $0x6e8] sm:$0xff] }
 0x428   :  { %4325 = vmatpush3.bf16.msra.mxu1 %v4324_v57  ;;  %v4364_v57 = vpack.c.bf16 %v1927_v54, %v1926_v53  ;;  %v4402_v53 = vpack.c.bf16 %v1979_v50, %v1978_v49  ;;  %v1962_v54 = vld [vmem:[#allocation12 + $0x660] sm:$0xff]  ;;  %v2012_v49 = vld [vmem:[#allocation12 + $0x7f0] sm:$0xff]  ;;  %v2013_v50 = vld [vmem:[#allocation12 + $0x7f8] sm:$0xff] }
 0x429   :  { %4327 = vmatprep.subr.bf16.mxu1 %v4326_v58  ;;  %v4366_v58 = vpack.c.bf16 %v1945_v56, %v1944_v55  ;;  %v1963_v55 = vld [vmem:[#allocation12 + $0x668] sm:$0xff] }
 0x42c   :  { %4329 = vmatpush3.bf16.msra.mxu1 %v4328_v0  ;;  %v4368_v0 = vpack.c.bf16 %v1929_v60, %v1928_v59 }
 0x42d   :  { %4331 = vmatprep.subr.bf16.mxu1 %v4330_v1  ;;  %v4370_v1 = vpack.c.bf16 %v1947_v62, %v1946_v61  ;;  %v4404_v61 = vpack.c.bf16 %v1963_v55, %v1962_v54  ;;  %v4438_v54 = vpack.c.bf16 %v2013_v50, %v2012_v49  ;;  %v1996_v55 = vld [vmem:[#allocation12 + $0x770] sm:$0xff]  ;;  %v2029_v50 = vld [vmem:[#allocation12 + $0x878] sm:$0xff] }
 0x42e   :  { %v2028_v49 = vld [vmem:[#allocation12 + $0x870] sm:$0xff] }
 0x430   :  { %4333 = vmatpush3.bf16.msra.mxu1 %v4332_v6  ;;  %v4372_v6 = vpack.c.bf16 %v1931_v3, %v1930_v2  ;;  %v1965_v2 = vld [vmem:[#allocation12 + $0x678] sm:$0xff]  ;;  %v1998_v3 = vld [vmem:[#allocation12 + $0x780] sm:$0xff] }
 0x431   :  { %4335 = vmatprep.subr.bf16.mxu1 %v4334_v7  ;;  %v4374_v7 = vpack.c.bf16 %v1949_v5, %v1948_v4  ;;  %v1999_v4 = vld [vmem:[#allocation12 + $0x788] sm:$0xff] }
 0x434   :  { %4337 = vmatpush3.bf16.msra.mxu1 %v4336_v12  ;;  %v4376_v12 = vpack.c.bf16 %v1933_v9, %v1932_v8  ;;  %v1983_v8 = vld [vmem:[#allocation12 + $0x708] sm:$0xff]  ;;  %v2000_v9 = vld [vmem:[#allocation12 + $0x790] sm:$0xff] }
 0x435   :  { %4339 = vmatprep.subr.bf16.mxu1 %v4338_v14  ;;  %v4378_v14 = vpack.c.bf16 %v1967_v11, %v1966_v10  ;;  %v2001_v10 = vld [vmem:[#allocation12 + $0x798] sm:$0xff] }
 0x438   :  { %4341 = vmatpush3.bf16.msra.mxu1 %v4340_v19  ;;  %v4380_v19 = vpack.c.bf16 %v1951_v16, %v1950_v15  ;;  %v1985_v15 = vld [vmem:[#allocation12 + $0x718] sm:$0xff]  ;;  %v2002_v16 = vld [vmem:[#allocation12 + $0x7a0] sm:$0xff] }
 0x439   :  { %4343 = vmatprep.subr.bf16.mxu1 %v4342_v20  ;;  %v4382_v20 = vpack.c.bf16 %v1969_v18, %v1968_v17  ;;  %v2003_v17 = vld [vmem:[#allocation12 + $0x7a8] sm:$0xff] }
 0x43a   :  { %v4593_v18 = vld [vmem:[#allocation3 + $0x60] sm:$0xff] }
 0x43c   :  { %4345 = vmatpush3.bf16.msra.mxu1 %v4344_v25  ;;  %v4591_v25 = vld [vmem:[#allocation3 + $0x50] sm:$0xff] }
 0x43d   :  { %4347 = vmatprep.subr.bf16.mxu1 %v4346_v26  ;;  %v4384_v26 = vpack.c.bf16 %v1953_v22, %v1952_v21  ;;  %v4418_v21 = vpack.c.bf16 %v2003_v17, %v2002_v16  ;;  %v1986_v22 = vld [vmem:[#allocation12 + $0x720] sm:$0xff]  ;;  %v2036_v16 = vld [vmem:[#allocation12 + $0x8b0] sm:$0xff]  ;;  %v2037_v17 = vld [vmem:[#allocation12 + $0x8b8] sm:$0xff] }
 0x43f   :  { %2434 = vmatmul.mubr.f32.vlgmr.msra.gmra.mrb[12].mxu1 %v4589_v37  ;;  %v1974_v37 = vld [vmem:[#allocation12 + $0x6c0] sm:$0xff] }
 0x440   :  { %4349 = vmatpush3.bf16.msra.mxu1 %v4348_v31  ;;  %2503 = vmatprep.mubr.f32.mxu1 %v4590_v39  ;;  %v1972_v31 = vld [vmem:[#allocation12 + $0x6b0] sm:$0xff]  ;;  %v4392_v39 = vpack.c.bf16 %v1957_v36, %v1956_v35  ;;  %v1991_v35 = vld [vmem:[#allocation12 + $0x748] sm:$0xff] }
 0x441   :  { %4351 = vmatprep.subr.bf16.mxu1 %v4350_v32  ;;  %v1973_v32 = vld [vmem:[#allocation12 + $0x6b8] sm:$0xff]  ;;  %v2008_v36 = vld [vmem:[#allocation12 + $0x7d0] sm:$0xff] }
 0x442   :  { %v4390_v34 = vpack.c.bf16 %v1973_v32, %v1972_v31  ;;  %v2007_v31 = vld [vmem:[#allocation12 + $0x7c8] sm:$0xff] }
 0x444   :  { %4353 = vmatpush3.bf16.msra.mxu1 %v4352_v38  ;;  %v1975_v38 = vld [vmem:[#allocation12 + $0x6c8] sm:$0xff] }
 0x445   :  { %4355 = vmatprep.subr.bf16.mxu1 %v4354_v40  ;;  %v4394_v40 = vpack.c.bf16 %v1975_v38, %v1974_v37  ;;  %v2009_v37 = vld [vmem:[#allocation12 + $0x7d8] sm:$0xff] }
 0x448   :  { %4357 = vmatpush3.bf16.msra.mxu1 %v4356_v45  ;;  %v4396_v45 = vpack.c.bf16 %v1959_v42, %v1958_v41  ;;  %v1993_v41 = vld [vmem:[#allocation12 + $0x758] sm:$0xff]  ;;  %v2010_v42 = vld [vmem:[#allocation12 + $0x7e0] sm:$0xff] }
 0x449   :  { %4359 = vmatprep.subr.bf16.mxu1 %v4358_v46  ;;  %v4398_v46 = vpack.c.bf16 %v1977_v44, %v1976_v43  ;;  %v2011_v43 = vld [vmem:[#allocation12 + $0x7e8] sm:$0xff] }
 0x44c   :  { %4361 = vmatpush3.bf16.msra.mxu1 %v4360_v51  ;;  %v3079_v51 = vld [vmem:[#allocation11] ss:$0 sm:$0xff] }
 0x44d   :  { %4363 = vmatprep.subr.bf16.mxu1 %v4362_v52  ;;  %v4400_v52 = vpack.c.bf16 %v1961_v48, %v1960_v47  ;;  %v1995_v47 = vld [vmem:[#allocation12 + $0x768] sm:$0xff] }
 0x450   :  { %4365 = vmatpush3.bf16.msra.mxu1 %v4364_v57  ;;  %v1980_v57 = vld [vmem:[#allocation12 + $0x6f0] sm:$0xff] }
 0x451   :  { %4367 = vmatprep.subr.bf16.mxu1 %v4366_v58  ;;  %v1981_v58 = vld [vmem:[#allocation12 + $0x6f8] sm:$0xff] }
 0x454   :  { %4369 = vmatpush3.bf16.msra.mxu1 %v4368_v0  ;;  %v4406_v0 = vpack.c.bf16 %v1981_v58, %v1980_v57  ;;  %v2030_v57 = vld [vmem:[#allocation12 + $0x880] sm:$0xff]  ;;  %v2031_v58 = vld [vmem:[#allocation12 + $0x888] sm:$0xff] }
 0x455   :  { %4371 = vmatprep.subr.bf16.mxu1 %v4370_v1  ;;  %v1964_v1 = vld [vmem:[#allocation12 + $0x670] sm:$0xff] }
 0x456   :  { %v4408_v5 = vpack.c.bf16 %v1965_v2, %v1964_v1  ;;  %v2032_v1 = vld [vmem:[#allocation12 + $0x890] sm:$0xff]  ;;  %v2033_v2 = vld [vmem:[#allocation12 + $0x898] sm:$0xff] }
 0x458   :  { %4373 = vmatpush3.bf16.msra.mxu1 %v4372_v6  ;;  %v4410_v6 = vpack.c.bf16 %v1999_v4, %v1998_v3  ;;  %v4446_v4 = vpack.c.bf16 %v2033_v2, %v2032_v1  ;;  %v2049_v1 = vld [vmem:[#allocation12 + $0x918] sm:$0xff]  ;;  %v2066_v2 = vld [vmem:[#allocation12 + $0x9a0] sm:$0xff] }
 0x459   :  { %4375 = vmatprep.subr.bf16.mxu1 %v4374_v7  ;;  %v1982_v7 = vld [vmem:[#allocation12 + $0x700] sm:$0xff] }
 0x45a   :  { %v4412_v11 = vpack.c.bf16 %v1983_v8, %v1982_v7  ;;  %v2034_v7 = vld [vmem:[#allocation12 + $0x8a0] sm:$0xff]  ;;  %v2035_v8 = vld [vmem:[#allocation12 + $0x8a8] sm:$0xff] }
 0x45c   :  { %4377 = vmatpush3.bf16.msra.mxu1 %v4376_v12  ;;  %v4414_v12 = vpack.c.bf16 %v2001_v10, %v2000_v9  ;;  %v4595_v9 = vld [vmem:[#allocation3 + $0x70] sm:$0xff] }
 0x45d   :  { %4379 = vmatprep.subr.bf16.mxu1 %v4378_v14  ;;  %v1984_v14 = vld [vmem:[#allocation12 + $0x710] sm:$0xff] }
 0x45f   :  { %2504 = vmatmul.mubr.f32.vlgmr.msra.gmra.mrb[14].mxu1 %v4591_v25  ;;  %v2005_v25 = vld [vmem:[#allocation12 + $0x7b8] sm:$0xff] }
 0x460   :  { %4381 = vmatpush3.bf16.msra.mxu1 %v4380_v19  ;;  %2573 = vmatprep.mubr.f32.mxu1 %v4592_v27  ;;  %v4416_v19 = vpack.c.bf16 %v1985_v15, %v1984_v14  ;;  %v4422_v27 = vpack.c.bf16 %v2005_v25, %v2004_v24  ;;  %v2018_v14 = vld [vmem:[#allocation12 + $0x820] sm:$0xff]  ;;  %v2019_v15 = vld [vmem:[#allocation12 + $0x828] sm:$0xff] }
 0x461   :  { %4383 = vmatprep.subr.bf16.mxu1 %v4382_v20  ;;  %v4594_v20 = vld [vmem:[#allocation3 + $0x78] sm:$0xff] }
 0x464   :  { %4385 = vmatpush3.bf16.msra.mxu1 %v4384_v26  ;;  %v4420_v26 = vpack.c.bf16 %v1987_v23, %v1986_v22  ;;  %v2038_v22 = vld [vmem:[#allocation12 + $0x8c0] sm:$0xff]  ;;  %v2039_v23 = vld [vmem:[#allocation12 + $0x8c8] sm:$0xff] }
 0x465   :  { %4387 = vmatprep.subr.bf16.mxu1 %v4386_v28  ;;  %v1988_v28 = vld [vmem:[#allocation12 + $0x730] sm:$0xff]  ;;  %v4458_v25 = vpack.c.bf16 %v2039_v23, %v2038_v22  ;;  %v2055_v22 = vld [vmem:[#allocation12 + $0x948] sm:$0xff] }
 0x466   :  { %v4424_v32 = vpack.c.bf16 %v1989_v29, %v1988_v28  ;;  %v2040_v28 = vld [vmem:[#allocation12 + $0x8d0] sm:$0xff]  ;;  %v2041_v29 = vld [vmem:[#allocation12 + $0x8d8] sm:$0xff] }
 0x467   :  { %v2072_v23 = vld [vmem:[#allocation12 + $0x9d0] sm:$0xff] }
 0x468   :  { %4389 = vmatpush3.bf16.msra.mxu1 %v4388_v33  ;;  %v4426_v33 = vpack.c.bf16 %v2007_v31, %v2006_v30  ;;  %v4462_v31 = vpack.c.bf16 %v2041_v29, %v2040_v28  ;;  %v2057_v28 = vld [vmem:[#allocation12 + $0x958] sm:$0xff]  ;;  %v2074_v29 = vld [vmem:[#allocation12 + $0x9e0] sm:$0xff] }
 0x469   :  { %4391 = vmatprep.subr.bf16.mxu1 %v4390_v34  ;;  %v1990_v34 = vld [vmem:[#allocation12 + $0x740] sm:$0xff] }
 0x46a   :  { %v4428_v38 = vpack.c.bf16 %v1991_v35, %v1990_v34  ;;  %v2042_v34 = vld [vmem:[#allocation12 + $0x8e0] sm:$0xff]  ;;  %v2043_v35 = vld [vmem:[#allocation12 + $0x8e8] sm:$0xff] }
 0x46c   :  { %4393 = vmatpush3.bf16.msra.mxu1 %v4392_v39  ;;  %v4430_v39 = vpack.c.bf16 %v2009_v37, %v2008_v36  ;;  %v3082_v37 = vld [vmem:[#allocation14] ss:$0 sm:$0xff] }
 0x46d   :  { %4395 = vmatprep.subr.bf16.mxu1 %v4394_v40  ;;  %v1992_v40 = vld [vmem:[#allocation12 + $0x750] sm:$0xff] }
 0x46e   :  { %v4432_v44 = vpack.c.bf16 %v1993_v41, %v1992_v40  ;;  %v2027_v40 = vld [vmem:[#allocation12 + $0x868] sm:$0xff] }
 0x470   :  { %4397 = vmatpush3.bf16.msra.mxu1 %v4396_v45  ;;  %v4434_v45 = vpack.c.bf16 %v2011_v43, %v2010_v42  ;;  %v2044_v42 = vld [vmem:[#allocation12 + $0x8f0] sm:$0xff]  ;;  %v2045_v43 = vld [vmem:[#allocation12 + $0x8f8] sm:$0xff] }
 0x471   :  { %4399 = vmatprep.subr.bf16.mxu1 %v4398_v46  ;;  %v1994_v46 = vld [vmem:[#allocation12 + $0x760] sm:$0xff] }
 0x472   :  { %v1740_v56 = vpop.f32.mrb[2].mxu1 }
 0x473   :  { %v5127_v59 = vadd.f32 %v3079_v51, %v1740_v56  ;;  %v1742_v60 = vpop.f32.mrb[3].mxu1  ;;  %v1997_v56 = vld [vmem:[#allocation12 + $0x778] sm:$0xff] }
 0x474   :  { %4401 = vmatpush3.bf16.msra.mxu1 %v4400_v52  ;;  %v4440_v60 = vpack.c.bf16 %v1997_v56, %v1996_v55  ;;  %v4472_v55 = vpack.c.bf16 %v2029_v50, %v2028_v49  ;;  %v2080_v49 = vld [vmem:[#allocation12 + $0xa10] sm:$0xff]  ;;  %v2081_v50 = vld [vmem:[#allocation12 + $0xa18] sm:$0xff] }
 0x475   :  { %4403 = vmatprep.subr.bf16.mxu1 %v4402_v53  ;;  %v1745_v62 = vsel %vm1744_vm3, %v5127_v59, -inf  ;;  %v4436_v53 = vpack.c.bf16 %v1995_v47, %v1994_v46 }
 0x476   :  { %1746 = vmax.xlane.f32.xlu0 %v1745_v62  ;;  %v2014_v62 = vld [vmem:[#allocation12 + $0x800] sm:$0xff] }
 0x478   :  { %4405 = vmatpush3.bf16.msra.mxu1 %v4404_v61  ;;  %v4442_v61 = vpack.c.bf16 %v2031_v58, %v2030_v57  ;;  %v2046_v57 = vld [vmem:[#allocation12 + $0x900] sm:$0xff]  ;;  %v2047_v58 = vld [vmem:[#allocation12 + $0x908] sm:$0xff] }
 0x479   :  { %4407 = vmatprep.subr.bf16.mxu1 %v4406_v0  ;;  %v2015_v0 = vld [vmem:[#allocation12 + $0x808] sm:$0xff] }
 0x47a   :  { %v4444_v3 = vpack.c.bf16 %v2015_v0, %v2014_v62  ;;  %v2048_v0 = vld [vmem:[#allocation12 + $0x910] sm:$0xff] }
 0x47c   :  { %4409 = vmatpush3.bf16.msra.mxu1 %v4408_v5  ;;  %v2016_v5 = vld [vmem:[#allocation12 + $0x810] sm:$0xff] }
 0x47d   :  { %4411 = vmatprep.subr.bf16.mxu1 %v4410_v6  ;;  %v2017_v6 = vld [vmem:[#allocation12 + $0x818] sm:$0xff] }
 0x47e   :  { %v4448_v10 = vpack.c.bf16 %v2017_v6, %v2016_v5  ;;  %v4480_v5 = vpack.c.bf16 %v2049_v1, %v2048_v0  ;;  %v4598_v6 = vld [vmem:[#allocation3 + $0x98] sm:$0xff] }
 0x47f   :  { %2574 = vmatmul.mubr.f32.vlgmr.msra.gmra.mrb[16].mxu1 %v4593_v18  ;;  %v4452_v18 = vpack.c.bf16 %v2019_v15, %v2018_v14  ;;  %v2052_v15 = vld [vmem:[#allocation12 + $0x930] sm:$0xff] }
 0x480   :  { %4413 = vmatpush3.bf16.msra.mxu1 %v4412_v11  ;;  %2643 = vmatprep.mubr.f32.mxu1 %v4594_v20  ;;  %v4596_v11 = vld [vmem:[#allocation3 + $0x88] sm:$0xff] }
 0x481   :  { %4415 = vmatprep.subr.bf16.mxu1 %v4414_v12  ;;  %v4450_v12 = vpack.c.bf16 %v2035_v8, %v2034_v7  ;;  %v2020_v20 = vld [vmem:[#allocation12 + $0x830] sm:$0xff]  ;;  %v2050_v8 = vld [vmem:[#allocation12 + $0x920] sm:$0xff] }
 0x484   :  { %4417 = vmatpush3.bf16.msra.mxu1 %v4416_v19  ;;  %v4454_v19 = vpack.c.bf16 %v2037_v17, %v2036_v16  ;;  %v2053_v16 = vld [vmem:[#allocation12 + $0x938] sm:$0xff]  ;;  %v2070_v17 = vld [vmem:[#allocation12 + $0x9c0] sm:$0xff] }
 0x485   :  { %4419 = vmatprep.subr.bf16.mxu1 %v4418_v21  ;;  %v2021_v21 = vld [vmem:[#allocation12 + $0x838] sm:$0xff] }
 0x486   :  { %v4456_v24 = vpack.c.bf16 %v2021_v21, %v2020_v20  ;;  %v2054_v21 = vld [vmem:[#allocation12 + $0x940] sm:$0xff] }
 0x488   :  { %4421 = vmatpush3.bf16.msra.mxu1 %v4420_v26  ;;  %v2022_v26 = vld [vmem:[#allocation12 + $0x840] sm:$0xff] }
 0x489   :  { %4423 = vmatprep.subr.bf16.mxu1 %v4422_v27  ;;  %v2023_v27 = vld [vmem:[#allocation12 + $0x848] sm:$0xff] }
 0x48a   :  { %v4460_v30 = vpack.c.bf16 %v2023_v27, %v2022_v26  ;;  %v2056_v27 = vld [vmem:[#allocation12 + $0x950] sm:$0xff] }
 0x48c   :  { %4425 = vmatpush3.bf16.msra.mxu1 %v4424_v32  ;;  %v2024_v32 = vld [vmem:[#allocation12 + $0x850] sm:$0xff] }
 0x48d   :  { %4427 = vmatprep.subr.bf16.mxu1 %v4426_v33  ;;  %v2025_v33 = vld [vmem:[#allocation12 + $0x858] sm:$0xff] }
 0x48e   :  { %v4464_v36 = vpack.c.bf16 %v2025_v33, %v2024_v32  ;;  %v2058_v33 = vld [vmem:[#allocation12 + $0x960] sm:$0xff] }
 0x490   :  { %4429 = vmatpush3.bf16.msra.mxu1 %v4428_v38  ;;  %v4466_v38 = vpack.c.bf16 %v2043_v35, %v2042_v34  ;;  %v2059_v34 = vld [vmem:[#allocation12 + $0x968] sm:$0xff] }
 0x491   :  { %4431 = vmatprep.subr.bf16.mxu1 %v4430_v39  ;;  %v2026_v39 = vld [vmem:[#allocation12 + $0x860] sm:$0xff] }
 0x492   :  { %v3121_v48 = vpop.f32.mrb[4].mxu1  ;;  %v4468_v47 = vpack.c.bf16 %v2027_v40, %v2026_v39  ;;  %v4500_v40 = vpack.c.bf16 %v2059_v34, %v2058_v33 }
 0x493   :  { %v3122_v51 = vpop.f32.mrb[5].mxu1 }
 0x494   :  { %v5131_v52 = vadd.f32 %v3122_v51, %v3121_v48  ;;  %4433 = vmatpush3.bf16.msra.mxu1 %v4432_v44  ;;  %v4470_v48 = vpack.c.bf16 %v2045_v43, %v2044_v42  ;;  %v2060_v42 = vld [vmem:[#allocation12 + $0x970] sm:$0xff]  ;;  %v2061_v43 = vld [vmem:[#allocation12 + $0x978] sm:$0xff] }
 0x495   :  { %4435 = vmatprep.subr.bf16.mxu1 %v4434_v45 }
 0x496   :  { %v2156_v45 = vadd.f32 %v5131_v52, %v3082_v37  ;;  %v4476_v52 = vpack.c.bf16 %v2047_v58, %v2046_v57  ;;  %v2077_v37 = vld [vmem:[#allocation12 + $0x9f8] sm:$0xff] }
 0x498   :  { %4437 = vmatpush3.bf16.msra.mxu1 %v4436_v53  ;;  %v2062_v53 = vld [vmem:[#allocation12 + $0x980] sm:$0xff] }
 0x499   :  { %4439 = vmatprep.subr.bf16.mxu1 %v4438_v54  ;;  %v2063_v54 = vld [vmem:[#allocation12 + $0x988] sm:$0xff] }
 0x49a   :  { %v4474_v56 = vpack.c.bf16 %v2063_v54, %v2062_v53  ;;  %v4599_v53 = vld [vmem:[#allocation3 + $0x90] sm:$0xff]  ;;  %v4510_v54 = vpack.c.bf16 %v2081_v50, %v2080_v49 }
 0x49c   :  { %4441 = vmatpush3.bf16.msra.mxu1 %v4440_v60  ;;  %v2064_v60 = vld [vmem:[#allocation12 + $0x990] sm:$0xff] }
 0x49d   :  { %4443 = vmatprep.subr.bf16.mxu1 %v4442_v61  ;;  %v2065_v61 = vld [vmem:[#allocation12 + $0x998] sm:$0xff] }
 0x49e   :  { %v4478_v62 = vpack.c.bf16 %v2065_v61, %v2064_v60 }
 0x49f   :  { %2644 = vmatmul.mubr.f32.vlgmr.msra.gmra.mrb[18].mxu1 %v4595_v9  ;;  %v2051_v9 = vld [vmem:[#allocation12 + $0x928] sm:$0xff] }
 0x4a0   :  { %4445 = vmatpush3.bf16.msra.mxu1 %v4444_v3  ;;  %2713 = vmatprep.mubr.f32.mxu1 %v4596_v11  ;;  %v2067_v3 = vld [vmem:[#allocation12 + $0x9a8] sm:$0xff]  ;;  %v2069_v11 = vld [vmem:[#allocation12 + $0x9b8] sm:$0xff] }
 0x4a1   :  { %4447 = vmatprep.subr.bf16.mxu1 %v4446_v4  ;;  %v4597_v4 = vld [vmem:[#allocation3 + $0x80] sm:$0xff]  ;;  %v4482_v7 = vpack.c.bf16 %v2067_v3, %v2066_v2 }
 0x4a4   :  { %4449 = vmatpush3.bf16.msra.mxu1 %v4448_v10  ;;  %v2068_v10 = vld [vmem:[#allocation12 + $0x9b0] sm:$0xff] }
 0x4a5   :  { %4451 = vmatprep.subr.bf16.mxu1 %v4450_v12  ;;  %v4484_v12 = vpack.c.bf16 %v2051_v9, %v2050_v8  ;;  %v4486_v14 = vpack.c.bf16 %v2069_v11, %v2068_v10  ;;  %v2862_v8 = vld [vmem:[#allocation15 + $0x10] sm:$0xff]  ;;  %v2863_v9 = vld [vmem:[#allocation15 + $0x18] sm:$0xff]  ;;  %v2865_v11 = vld [vmem:[#allocation15 + $0x28] sm:$0xff] }
 0x4a6   :  { %v4516_v10 = vpack.c.bf16 %v2863_v9, %v2862_v8 }
 0x4a8   :  { %4453 = vmatpush3.bf16.msra.mxu1 %v4452_v18  ;;  %v2071_v18 = vld [vmem:[#allocation12 + $0x9c8] sm:$0xff] }
 0x4a9   :  { %4455 = vmatprep.subr.bf16.mxu1 %v4454_v19  ;;  %v4488_v19 = vpack.c.bf16 %v2053_v16, %v2052_v15  ;;  %v4490_v20 = vpack.c.bf16 %v2071_v18, %v2070_v17  ;;  %v2866_v16 = vld [vmem:[#allocation15 + $0x30] sm:$0xff]  ;;  %v2867_v17 = vld [vmem:[#allocation15 + $0x38] sm:$0xff] }
 0x4ac   :  { %4457 = vmatpush3.bf16.msra.mxu1 %v4456_v24  ;;  %v2073_v24 = vld [vmem:[#allocation12 + $0x9d8] sm:$0xff] }
 0x4ad   :  { %4459 = vmatprep.subr.bf16.mxu1 %v4458_v25  ;;  %v4492_v25 = vpack.c.bf16 %v2055_v22, %v2054_v21  ;;  %v4494_v26 = vpack.c.bf16 %v2073_v24, %v2072_v23  ;;  %v2868_v21 = vld [vmem:[#allocation15 + $0x40] sm:$0xff]  ;;  %v2869_v22 = vld [vmem:[#allocation15 + $0x48] sm:$0xff]  ;;  %v2870_v24 = vld [vmem:[#allocation15 + $0x50] sm:$0x1] }
 0x4ae   :  { %v4525_v23 = vpack.c.bf16 %v2869_v22, %v2868_v21 }
 0x4b0   :  { %4461 = vmatpush3.bf16.msra.mxu1 %v4460_v30  ;;  %v2075_v30 = vld [vmem:[#allocation12 + $0x9e8] sm:$0xff] }
 0x4b1   :  { %4463 = vmatprep.subr.bf16.mxu1 %v4462_v31  ;;  %v4496_v31 = vpack.c.bf16 %v2057_v28, %v2056_v27  ;;  %v4498_v32 = vpack.c.bf16 %v2075_v30, %v2074_v29 }
 0x4b2   :  { %v3156_v41 = vpop.f32.mrb[6].mxu1 }
 0x4b3   :  { %v3157_v44 = vpop.f32.mrb[7].mxu1 }
 0x4b4   :  { %v3158_v46 = vadd.f32 %v3157_v44, %v3156_v41  ;;  %4465 = vmatpush3.bf16.msra.mxu1 %v4464_v36  ;;  %v2076_v36 = vld [vmem:[#allocation12 + $0x9f0] sm:$0xff] }
 0x4b5   :  { %4467 = vmatprep.subr.bf16.mxu1 %v4466_v38  ;;  %v4502_v41 = vpack.c.bf16 %v2077_v37, %v2076_v36 }
 0x4b6   :  { %v5134_v51 = vadd.f32 %v3158_v46, %v2156_v45  ;;  %v4504_v45 = vpack.c.bf16 %v2061_v43, %v2060_v42  ;;  %v2078_v46 = vld [vmem:[#allocation12 + $0xa00] sm:$0xff] }
 0x4b8   :  { %4469 = vmatpush3.bf16.msra.mxu1 %v4468_v47  ;;  %v2079_v47 = vld [vmem:[#allocation12 + $0xa08] sm:$0xff] }
 0x4b9   :  { %4471 = vmatprep.subr.bf16.mxu1 %v4470_v48  ;;  %v4507_v48 = vpack.c.bf16 %v2079_v47, %v2078_v46  ;;  %v2958_v46 = vld [vmem:[#allocation18 + $0x8] sm:$0xff] }
 0x4bc   :  { %4473 = vmatpush3.bf16.msra.mxu1 %v4472_v55 }
 0x4bd   :  { %4475 = vmatprep.subr.bf16.mxu1 %v4474_v56 }
 0x4bf   :  { %2714 = vmatmul.mubr.f32.vlgmr.msra.gmra.mrb[20].mxu1 %v4597_v4 }
 0x4c0   :  { %4477 = vmatpush3.bf16.msra.mxu1 %v4476_v52  ;;  %2783 = vmatprep.mubr.f32.mxu1 %v4598_v6  ;;  %v2861_v6 = vld [vmem:[#allocation15 + $0x8] sm:$0xff] }
 0x4c1   :  { %4479 = vmatprep.subr.bf16.mxu1 %v4478_v62 }
 0x4c4   :  { %4481 = vmatpush3.bf16.msra.mxu1 %v4480_v5  ;;  %v2860_v5 = vld [vmem:[#allocation15] sm:$0xff] }
 0x4c5   :  { %4483 = vmatprep.subr.bf16.mxu1 %v4482_v7  ;;  %v4513_v7 = vpack.c.bf16 %v2861_v6, %v2860_v5 }
 0x4c8   :  { %4485 = vmatpush3.bf16.msra.mxu1 %v4484_v12 }
 0x4c9   :  { %4487 = vmatprep.subr.bf16.mxu1 %v4486_v14 }
 0x4cc   :  { %4489 = vmatpush3.bf16.msra.mxu1 %v4488_v19  ;;  %v4522_v19 = vpack.c.bf16 %v2867_v17, %v2866_v16 }
 0x4cd   :  { %4491 = vmatprep.subr.bf16.mxu1 %v4490_v20 }
 0x4d0   :  { %4493 = vmatpush3.bf16.msra.mxu1 %v4492_v25 }
 0x4d1   :  { %4495 = vmatprep.subr.bf16.mxu1 %v4494_v26 }
 0x4d2   :  { %v3191_v35 = vpop.f32.mrb[8].mxu1 }
 0x4d3   :  { %v3192_v38 = vpop.f32.mrb[9].mxu1 }
 0x4d4   :  { %v3193_v39 = vadd.f32 %v3192_v38, %v3191_v35  ;;  %4497 = vmatpush3.bf16.msra.mxu1 %v4496_v31 }
 0x4d5   :  { %4499 = vmatprep.subr.bf16.mxu1 %v4498_v32 }
 0x4d6   :  { %v2296_v44 = vadd.f32 %v3193_v39, %v5134_v51  ;;  %v4600_v51 = vld [vmem:[#allocation3 + $0xa0] sm:$0xff] }
 0x4d8   :  { %4501 = vmatpush3.bf16.msra.mxu1 %v4500_v40 }
 0x4d9   :  { %4503 = vmatprep.subr.bf16.mxu1 %v4502_v41 }
 0x4dc   :  { %4505 = vmatpush3.bf16.msra.mxu1 %v4504_v45  ;;  %v2957_v45 = vld [vmem:[#allocation18] sm:$0xff] }
 0x4dd   :  { %4506 = vmatprep.subr.bf16.mxu1 %v4895_v13  ;;  %v4528_v50 = vpack.c.bf16 %v2958_v46, %v2957_v45 }
 0x4df   :  { %2784 = vmatmul.mubr.f32.vlgmr.msra.gmra.mrb[22].mxu1 %v4599_v53 }
 0x4e0   :  { %4508 = vmatpush3.bf16.msra.mxu1 %v4507_v48  ;;  %3469 = vmatprep.mubr.msk.f32.mxu1 %vm4897_vm4, %v4896_v63 }
 0x4e1   :  { %4509 = vmatprep.subr.bf16.mxu1 %v4895_v13 }
 0x4e4   :  { %4511 = vmatpush3.bf16.msra.mxu1 %v4510_v54  ;;  %v2959_v54 = vld [vmem:[#allocation18 + $0x10] sm:$0xff] }
 0x4e5   :  { %4512 = vmatprep.subr.bf16.mxu1 %v4895_v13 }
 0x4e7   :  { %3470 = vmatmul.mubr.msk.f32.vlgmr.msra.gmra.mrb[24].mxu1 %vm851_vm0, %v4600_v51  ;;  %v2960_v51 = vld [vmem:[#allocation18 + $0x18] sm:$0xff] }
 0x4e8   :  { %3494 = vmatprep.mubr.msk.f32.mxu1 %vm4897_vm4, %v4896_v63  ;;  %4514 = vmatpush3.bf16.msra.mxu1 %v4513_v7 }
 0x4e9   :  { %4515 = vmatprep.subr.bf16.mxu1 %v4895_v13 }
 0x4ec   :  { %4517 = vmatpush3.bf16.msra.mxu1 %v4516_v10 }
 0x4ed   :  { %4518 = vmatprep.subr.bf16.mxu1 %v4895_v13 }
 0x4f2   :  { %v3226_v55 = vpop.f32.mrb[10].mxu1 }
 0x4f3   :  { %v3227_v56 = vpop.f32.mrb[11].mxu1 }
 0x4f4   :  { %v3228_v57 = vadd.f32 %v3227_v56, %v3226_v55  ;;  %v4531_v55 = vpack.c.bf16 %v2960_v51, %v2959_v54  ;;  %v3084_v56 = vld [vmem:[#allocation17] ss:$0 sm:$0xff] }
 0x4f6   :  { %v2366_v58 = vadd.f32 %v3228_v57, %v2296_v44 }
 0x503   :  { %v1747_v60 = vpop.xlane.xlu0 %1746 }
 0x504   :  { %v1748_v61 = vsub.f32 %v5127_v59, %v1747_v60  ;;  %v2864_v59 = vld [vmem:[#allocation15 + $0x20] sm:$0xff] }
 0x505   :  { %v4519_v12 = vpack.c.bf16 %v2865_v11, %v2864_v59 }
 0x506   :  { %v1749_v52 = vmul.f32 1.442695, %v1748_v61 }
 0x507   :  { %4520 = vmatpush3.bf16.msra.mxu1 %v4519_v12 }
 0x508   :  { %4574 = vpow2.f32 %v1749_v52  ;;  %4521 = vmatprep.subr.bf16.mxu1 %v4895_v13 }
 0x50b   :  { %4523 = vmatpush3.bf16.msra.mxu1 %v4522_v19 }
 0x50c   :  { %4524 = vmatprep.subr.bf16.mxu1 %v4895_v13 }
 0x50f   :  { %4526 = vmatpush3.bf16.msra.mxu1 %v4525_v23 }
 0x510   :  { %3492 = vmatprep.subr.mxu1 %v4896_v63 }
 0x512   :  { %v4575_v62 = vpop.eup %4574  ;;  %v3261_v0 = vpop.f32.mrb[12].mxu1 }
 0x513   :  { %v3262_v1 = vpop.f32.mrb[13].mxu1  ;;  %v1751_v2 = vsel %vm1744_vm3, %v4575_v62, 0.0  ;;  %3493 = vmatpush3.msk.msra.mxu1 %vm2882_vm5, %v2870_v24 }
 0x514   :  { %v3263_v3 = vadd.f32 %v3262_v1, %v3261_v0  ;;  %1752 = vadd.xlane.f32.xlu0 %v1751_v2  ;;  %4527 = vmatprep.subr.bf16.mxu1 %v4895_v13 }
 0x516   :  { %v2436_v4 = vadd.f32 %v3263_v3, %v2366_v58 }
 0x532   :  { %v3296_v14 = vpop.f32.mrb[14].mxu1 }
 0x533   :  { %v3297_v15 = vpop.f32.mrb[15].mxu1 }
 0x534   :  { %v3298_v18 = vadd.f32 %v3297_v15, %v3296_v14 }
 0x536   :  { %v2506_v20 = vadd.f32 %v3298_v18, %v2436_v4 }
 0x552   :  { %v3331_v25 = vpop.f32.mrb[16].mxu1 }
 0x553   :  { %v3332_v26 = vpop.f32.mrb[17].mxu1 }
 0x554   :  { %v3333_v27 = vadd.f32 %v3332_v26, %v3331_v25 }
 0x556   :  { %v2576_v28 = vadd.f32 %v3333_v27, %v2506_v20 }
 0x572   :  { %v3366_v29 = vpop.f32.mrb[18].mxu1 }
 0x573   :  { %v3367_v30 = vpop.f32.mrb[19].mxu1 }
 0x574   :  { %v3368_v31 = vadd.f32 %v3367_v30, %v3366_v29 }
 0x576   :  { %v2646_v32 = vadd.f32 %v3368_v31, %v2576_v28 }
 0x592   :  { %v3401_v33 = vpop.f32.mrb[20].mxu1 }
 0x593   :  { %v3402_v34 = vpop.f32.mrb[21].mxu1 }
 0x594   :  { %v3403_v35 = vadd.f32 %v3402_v34, %v3401_v33 }
 0x596   :  { %v2716_v36 = vadd.f32 %v3403_v35, %v2646_v32 }
 0x5a1   :  { %v1753_v37 = vpop.xlane.xlu0 %1752 }
 0x5a2   :  { %4576 = vlog2.f32 %v1753_v37 }
 0x5ac   :  { %v4577_v38 = vpop.eup %4576 }
 0x5ad   :  { %v1755_v39 = vmul.f32 0.6931472, %v4577_v38 }
 0x5af   :  { %v1756_v40 = vsub.f32 %v1748_v61, %v1755_v39 }
 0x5b1   :  { %1757 = vst.msk [vmem:[#allocation20] sm:$0xff] %vm1744_vm3, %v1756_v40 }
 0x5b2   :  { %v3436_v41 = vpop.f32.mrb[22].mxu1 }
 0x5b3   :  { %v3437_v42 = vpop.f32.mrb[23].mxu1 }
 0x5b4   :  { %v3438_v43 = vadd.f32 %v3437_v42, %v3436_v41 }
 0x5b6   :  { %v2786_v44 = vadd.f32 %v3438_v43, %v2716_v36 }
 0x5ba   :  { %v2855_v47 = vpop.f32.mrb[24].mxu1 }
 0x5bb   :  { %v2856_v48 = vadd.f32 %v2855_v47, %v2786_v44  ;;  %v3471_v49 = vpop.f32.mrb[25].mxu1 }
 0x5bd   :  { %v2859_v53 = vmax.f32 %v2856_v48, 0.0 }
 0x5bf   :  { %3495 = vmatmul.mubr.msk.f32.vlgmr.msra.gmra.mrb[26].mxu1 %vm2878_vm6, %v2859_v53 }
 0x5c0   :  { %4529 = vmatpush3.bf16.msra.mxu1 %v4528_v50  ;;  %3505 = vmatprep.mubr.msk.f32.mxu1 %vm4897_vm4, %v4896_v63 }
 0x5c1   :  { %4530 = vmatprep.subr.bf16.mxu1 %v4895_v13 }
 0x5c4   :  { %4532 = vmatpush3.bf16.msra.mxu1 %v4531_v55 }
 0x692   :  { %v2952_v57 = vpop.f32.mrb[26].mxu1 }
 0x693   :  { %v2953_v58 = vadd.f32 %v3084_v56, %v2952_v57  ;;  %v3496_v60 = vpop.f32.mrb[27].mxu1 }
 0x695   :  { %v2956_v61 = vmax.f32 %v2953_v58, 0.0 }
 0x697   :  { %3506 = vmatmul.mubr.msk.f32.vlgmr.msra.gmra.mrb[28].mxu1 %vm851_vm0, %v2956_v61 }
 0x698   :  { %4832 = shalt.err (!%p4829_p0)
}
 0x699   :  { %s4833_s19 = scalar_lea.hbm %s5193_s11, 128 }
 0x69a   :  { %p4834_p1 = scmp.ne.s32.totalorder %s5193_s11, %s4833_s19  ;;  %p4837_p2 = scmp.lt.u32.totalorder %s4833_s19, %s5193_s11 }
 0x69c   :  { %p4839_p3 = pnand %p4837_p2, %p4834_p1 }
 0x69e   :  { %4842 = shalt.err (!%p4839_p3)
}
 0x69f   :  { %3053 = dma.vmem_to_hbm [thread:$0]  %s3051_s1, 128, %s5193_s11, [#allocation5]   ;;  %v3087_v13 = vld [vmem:[#allocation2] ss:$0 sm:$0xff]  ;;  %vm3042_vm7 = vcmask 7168  }
 0x6a0   :  { %s4899_s2 = smov [#allocation21]  }
 0x6a1   :  { %s3060_s21 = sshll.u32 %s4899_s2, 4  ;;  %s3061_s21 = int_to_ptr.vmem [resolvable:$true] %s3060_s21 }
 0x6a2   :  { %s4843_s29 = scalar_lea.vmem %s3061_s21, 128  ;;  %p4848_p5 = scmp.lt.s32.totalorder %s3061_s21, %s3061_s21 }
 0x6a3   :  { %p4844_p4 = scmp.ne.s32.totalorder %s3061_s21, %s4843_s29  ;;  %p4849_p6 = scmp.lt.s32.totalorder %s4843_s29, %s4843_s29 }
 0x6a5   :  { %p4850_p7 = por %p4849_p6, %p4848_p5 }
 0x6a7   :  { %p4851_p8 = pnand %p4850_p7, %p4844_p4 }
 0x76a   :  { %v3037_v63 = vpop.f32.mrb[28].mxu1 }
 0x76b   :  { %v3038_v52 = vadd.f32 %v3087_v13, %v3037_v63  ;;  %v3507_v62 = vpop.f32.mrb[29].mxu1 }
 0x76d   :  { %4578 = vtanh.f32 %v3038_v52 }
 0x777   :  { %v4579_v0 = vpop.eup %4578 }
 0x778   :  { %3043 = vst.msk [vmem:[#allocation21] sm:$0xff] %vm3042_vm7, %v4579_v0 }
 0x779   :  { %4854 = shalt.err (!%p4851_p8)
}
 0x77a   :  { %s4855_s3 = scalar_lea.hbm %s5194_s12, 128 }
 0x77b   :  { %p4856_p9 = scmp.ne.s32.totalorder %s5194_s12, %s4855_s3  ;;  %p4859_p10 = scmp.lt.u32.totalorder %s4855_s3, %s5194_s12 }
 0x77d   :  { %p4861_p11 = pnand %p4859_p10, %p4856_p9 }
 0x77f   :  { %4864 = shalt.err (!%p4861_p11)
}
 0x780   :  { %3063 = dma.vmem_to_hbm [thread:$0]  %s3061_s21, 128, %s5194_s12, [#allocation22]  }
 0x781   :  { %4877 = dma.done.wait [#allocation5], 128  }
 0x782   :  { %4878 = vsyncadd [#allocation5], 4294967168 }
 0x783   :  { %4879 = dma.done.wait [#allocation22], 128  }
 0x784   :  { %4880 = vsyncadd [#allocation22], 4294967168 }
 0x785   :  { %3070 = vsyncpa [#allocation4], 1 }
 0x786   :  { %3071 = vsyncpa [#allocation7], 1 }
 0x787   :  { %3072 = vsyncpa [#allocation10], 1 }
 0x788   :  { %3073 = vsyncpa [#allocation13], 1 }
 0x789   :  { %3074 = vsyncpa [#allocation16], 1 }
 0x78a   :  { %3075 = vsyncpa [#allocation19], 1 }
 0x78b   :  { %3076 = vsyncpa [#allocation5], 1 }
 0x78c   :  { %3077 = vsyncpa [#allocation22], 1 }

</bundles_post_ra>
